<compile_context>
chip_gen: v6e
topology: v6e:2x2x1
jax: 0.10.0
libtpu: 0.0.40
codegen_flags: <defaults>
</compile_context>

<pallas_src>
import math

import jax
import jax.numpy as jnp
from jax.experimental import pallas as pl
from jax.experimental.pallas import tpu as pltpu


# ----------------------------------------------------------------------------
# Kernel
# ----------------------------------------------------------------------------
def char_rnn_gru_kernel(x_seq_ref,    # VMEM [T, B, H]   bf16  pre-embedded inputs
                        h0_ref,       # VMEM [B, H]      f32   initial hidden
                        w_big_ref,    # VMEM [2H, 4H]    bf16  fused gate weights
                        b_rz_ref,     # VMEM [B, 2H]     f32
                        b_in_ref,     # VMEM [B, H]      f32
                        b_hn_ref,     # VMEM [B, H]      f32
                        w_dec_ref,    # VMEM [H, OPAD]   bf16
                        b_dec_ref,    # VMEM [1, OPAD]   f32
                        logits_ref,   # out  [T*B, OPAD] f32
                        h_out_ref,    # out  [B, H]      f32
                        xh_scratch,   # VMEM [B, 2H]     bf16  persistent [x | h]
                        hseq_scratch  # VMEM [T*B, H]    f32   collected hidden states
                        ):
    T, B, H = x_seq_ref.shape

    # Seed the hidden half of the fused matmul input with h0.
    xh_scratch[:, H:] = h0_ref[...].astype(jnp.bfloat16)

    def step(t, h):
        # h: [B, H] f32 carry (exact hidden state, matches torch numerics).
        xh_scratch[:, :H] = x_seq_ref[t]                       # x_t (bf16)

        # One fused MXU matmul for all gate projections: [B,2H] @ [2H,4H].
        gates = jnp.dot(xh_scratch[...], w_big_ref[...],
                        preferred_element_type=jnp.float32)    # [B, 4H] f32

        rz = jax.nn.sigmoid(gates[:, :2 * H] + b_rz_ref[...])  # [B, 2H]
        r = rz[:, :H]
        z = rz[:, H:]
        i_n = gates[:, 2 * H:3 * H] + b_in_ref[...]            # x-part only (exact)
        h_n = gates[:, 3 * H:] + b_hn_ref[...]                 # h-part only (exact)
        n = jnp.tanh(i_n + r * h_n)

        h_new = (1.0 - z) * n + z * h                          # f32 gate math

        # Feed next step's matmul input and stash h_new for the batched decoder.
        xh_scratch[:, H:] = h_new.astype(jnp.bfloat16)
        row = pl.multiple_of(t * B, B)
        hseq_scratch[pl.ds(row, B), :] = h_new
        return h_new

    h_final = jax.lax.fori_loop(0, T, step, h0_ref[...], unroll=True)
    h_out_ref[...] = h_final

    # Batched decoder over all T steps: one [T*B, H] @ [H, OPAD] matmul.
    logits_ref[...] = (
        jnp.dot(hseq_scratch[...].astype(jnp.bfloat16), w_dec_ref[...],
                preferred_element_type=jnp.float32)
        + b_dec_ref[...])


# ----------------------------------------------------------------------------
# Wrappers
# ----------------------------------------------------------------------------
def char_rnn_forward_sequence(kparams, token_ids, hidden):
    """token_ids: [T, B] int32, hidden: [1, B, H] f32
       -> (logits [T, B, O] f32, hidden [1, B, H] f32)."""
    T, B = token_ids.shape
    H = kparams["w_big"].shape[0] // 2
    OPAD = kparams["w_dec"].shape[1]
    O = kparams["output_size"]

    # Embedding once, outside the recurrence (mode="clip" bounds bad ids).
    x_seq = jnp.take(kparams["embedding"], token_ids.astype(jnp.int32),
                     axis=0, mode="clip")                       # [T, B, H] bf16
    h0 = hidden[0].astype(jnp.float32)                          # [B, H]

    inputs = (x_seq, h0, kparams["w_big"], kparams["b_rz"], kparams["b_in"],
              kparams["b_hn"], kparams["w_dec"], kparams["b_dec"])

    def resident(a):
        nd = a.ndim
        return pl.BlockSpec(a.shape, lambda i, nd=nd: (0,) * nd)

    logits_flat, h_new = pl.pallas_call(
        char_rnn_gru_kernel,
        grid=(1,),
        in_specs=[resident(a) for a in inputs],
        out_specs=(
            pl.BlockSpec((T * B, OPAD), lambda i: (0, 0)),
            pl.BlockSpec((B, H), lambda i: (0, 0)),
        ),
        out_shape=(
            jax.ShapeDtypeStruct((T * B, OPAD), jnp.float32),
            jax.ShapeDtypeStruct((B, H), jnp.float32),
        ),
        scratch_shapes=[
            pltpu.VMEM((B, 2 * H), jnp.bfloat16),   # persistent [x | h]
            pltpu.VMEM((T * B, H), jnp.float32),    # hidden states for decoder
        ],
        compiler_params=pltpu.CompilerParams(
            dimension_semantics=("arbitrary",)),
    )(*inputs)

    logits = logits_flat.reshape(T, B, OPAD)[:, :, :O]
    return logits, h_new[None]


def char_rnn_forward(kparams, token_ids, hidden):
    """Matches CharRNN.forward: token_ids [B], hidden [1, B, H]
       -> (logits [B, O], hidden [1, B, H])."""
    logits_seq, h_new = char_rnn_forward_sequence(kparams, token_ids[None, :], hidden)
    return logits_seq[0], h_new


# ----------------------------------------------------------------------------
# Parameters
# ----------------------------------------------------------------------------
def init_params(key, input_size, hidden_size, output_size):
    """PyTorch-style init: N(0,1) embedding, U(+-1/sqrt(H)) GRU/Linear params."""
    ks = jax.random.split(key, 7)
    bound = 1.0 / math.sqrt(hidden_size)
    u = lambda k, shape: jax.random.uniform(k, shape, jnp.float32, -bound, bound)
    return {
        "embedding": jax.random.normal(ks[0], (input_size, hidden_size), jnp.float32),
        # GRU weights transposed for right-multiplication, torch gate order (r, z, n):
        "w_ih_t": u(ks[1], (hidden_size, 3 * hidden_size)),
        "w_hh_t": u(ks[2], (hidden_size, 3 * hidden_size)),
        "b_ih": u(ks[3], (1, 3 * hidden_size)),
        "b_hh": u(ks[4], (1, 3 * hidden_size)),
        # Linear(hidden_size, output_size), transposed: [H, O]
        "w_dec_t": u(ks[5], (hidden_size, output_size)),
        "b_dec": u(ks[6], (1, output_size)),
    }


def prepare_kernel_params(params, batch_size, lane=128):
    """Kernel-layout params: bf16 weights, fully-fused gate projection,
    lane-padded decoder, gate biases pre-broadcast to [B, .]."""
    H = params["w_hh_t"].shape[0]
    O = params["w_dec_t"].shape[1]
    OPAD = ((O + lane - 1) // lane) * lane

    w_ih, w_hh = params["w_ih_t"], params["w_hh_t"]   # [H, 3H] each, gate order r,z,n
    b_ih, b_hh = params["b_ih"], params["b_hh"]       # [1, 3H]

    # Fused gate weight: one xh @ W_big yields [rz_pre | i_n_pre | h_n_pre].
    zeros = jnp.zeros((H, H), jnp.float32)
    w_big = jnp.concatenate([
        jnp.concatenate([w_ih[:, :2 * H], w_ih[:, 2 * H:], zeros], axis=1),  # x rows
        jnp.concatenate([w_hh[:, :2 * H], zeros, w_hh[:, 2 * H:]], axis=1),  # h rows
    ], axis=0)                                                               # [2H, 4H]

    b_rz = b_ih[:, :2 * H] + b_hh[:, :2 * H]          # exact for sigmoid gates
    b_in = b_ih[:, 2 * H:]
    b_hn = b_hh[:, 2 * H:]

    w_dec = jnp.zeros((H, OPAD), jnp.float32).at[:, :O].set(params["w_dec_t"])
    b_dec = jnp.zeros((1, OPAD), jnp.float32).at[:, :O].set(params["b_dec"])

    bcast = lambda b: jnp.broadcast_to(b, (batch_size, b.shape[1])).astype(jnp.float32)

    return {
        "embedding": params["embedding"].astype(jnp.bfloat16),
        "w_big": w_big.astype(jnp.bfloat16),
        "b_rz": bcast(b_rz),
        "b_in": bcast(b_in),
        "b_hn": bcast(b_hn),
        "w_dec": w_dec.astype(jnp.bfloat16),
        "b_dec": b_dec,                 # [1, OPAD], broadcast in-kernel
        "output_size": O,
    }


# ----------------------------------------------------------------------------
# Pure-JAX reference (mirrors the kernel's bf16-at-MXU / f32-gate numerics)
# ----------------------------------------------------------------------------
def reference_forward_sequence(params, token_ids, hidden):
    f32 = jnp.float32
    emb = params["embedding"].astype(jnp.bfloat16).astype(f32)
    w_ih = params["w_ih_t"].astype(jnp.bfloat16).astype(f32)
    w_hh = params["w_hh_t"].astype(jnp.bfloat16).astype(f32)
    w_dec = params["w_dec_t"].astype(jnp.bfloat16).astype(f32)
    b_ih, b_hh, b_dec = params["b_ih"], params["b_hh"], params["b_dec"]
    H = w_hh.shape[0]

    def step(h, ids):
        x = emb[ids]                                        # [B, H]
        hb = h.astype(jnp.bfloat16).astype(f32)
        gi = x @ w_ih + b_ih
        gh = hb @ w_hh + b_hh
        i_r, i_z, i_n = gi[:, :H], gi[:, H:2 * H], gi[:, 2 * H:]
        h_r, h_z, h_n = gh[:, :H], gh[:, H:2 * H], gh[:, 2 * H:]
        r = jax.nn.sigmoid(i_r + h_r)
        z = jax.nn.sigmoid(i_z + h_z)
        n = jnp.tanh(i_n + r * h_n)
        h_new = (1.0 - z) * n + z * h
        logits = h_new.astype(jnp.bfloat16).astype(f32) @ w_dec + b_dec
        return h_new, logits

    h_final, logits_seq = jax.lax.scan(step, hidden[0].astype(f32), token_ids)
    return logits_seq, h_final[None]


# ----------------------------------------------------------------------------
if __name__ == "__main__":
    VOCAB = 96        # input_size == output_size (character vocab)
    HIDDEN = 128      # hidden_size (lane-aligned)
    BATCH = 8         # batch_size (sublane-aligned)
    SEQ = 16          # characters processed by one pallas_call
    N_LAYERS = 1

    key = jax.random.PRNGKey(0)
    pkey, ikey = jax.random.split(key)

    params = init_params(pkey, VOCAB, HIDDEN, VOCAB)
    kparams = prepare_kernel_params(params, BATCH)

    token_seq = jax.random.randint(ikey, (SEQ, BATCH), 0, VOCAB, dtype=jnp.int32)
    hidden0 = jnp.zeros((N_LAYERS, BATCH, HIDDEN), jnp.float32)   # init_hidden()

    # Whole-sequence kernel call (time loop inside the kernel).
    logits_seq, hidden_T = char_rnn_forward_sequence(kparams, token_seq, hidden0)
    # Single-step call, matching CharRNN.forward's signature (T=1).
    logits_step, hidden_1 = char_rnn_forward(kparams, token_seq[0], hidden0)
    jax.block_until_ready((logits_seq, hidden_T, logits_step, hidden_1))

    # Shape checks (per-step semantics identical to the PyTorch forward).
    assert logits_seq.shape == (SEQ, BATCH, VOCAB), logits_seq.shape
    assert hidden_T.shape == (N_LAYERS, BATCH, HIDDEN), hidden_T.shape
    assert logits_step.shape == (BATCH, VOCAB), logits_step.shape
    assert hidden_1.shape == (N_LAYERS, BATCH, HIDDEN), hidden_1.shape
    assert bool(jnp.all(jnp.isfinite(logits_seq)))

    # Numerical check against a pure-JAX GRU reference.
    ref_logits, ref_hidden = reference_forward_sequence(params, token_seq, hidden0)
    assert bool(jnp.allclose(logits_seq, ref_logits, atol=1e-2, rtol=1e-2))
    assert bool(jnp.allclose(hidden_T, ref_hidden, atol=1e-2, rtol=1e-2))
    assert bool(jnp.allclose(logits_step, ref_logits[0], atol=1e-2, rtol=1e-2))

    print("KERNEL_OK")
</pallas_src>

<mosaic_0001>
module attributes {stable_mosaic.version = 11 : i64} {
  func.func @char_rnn_gru_kernel(%arg0: i32, %arg1: memref<16x8x128xbf16, #tpu.memory_space<vmem>>, %arg2: memref<8x128xf32, #tpu.memory_space<vmem>>, %arg3: memref<256x512xbf16, #tpu.memory_space<vmem>>, %arg4: memref<8x256xf32, #tpu.memory_space<vmem>>, %arg5: memref<8x128xf32, #tpu.memory_space<vmem>>, %arg6: memref<8x128xf32, #tpu.memory_space<vmem>>, %arg7: memref<128x128xbf16, #tpu.memory_space<vmem>>, %arg8: memref<1x128xf32, #tpu.memory_space<vmem>>, %arg9: memref<128x128xf32, #tpu.memory_space<vmem>>, %arg10: memref<8x128xf32, #tpu.memory_space<vmem>>, %arg11: memref<8x256xbf16, #tpu.memory_space<vmem>>, %arg12: memref<128x128xf32, #tpu.memory_space<vmem>>) attributes {dimension_semantics = [#tpu.dimension_semantics<arbitrary>], iteration_bounds = array<i64: 1>, scalar_prefetch = 0 : i64, scratch_operands = 2 : i64, tpu.core_type = #tpu.core_type<tc>, window_params = [{pipeline_mode = #tpu.pipeline_mode<synchronous>, transform_indices = @transform_0, window_bounds = array<i64: 16, 8, 128>}, {pipeline_mode = #tpu.pipeline_mode<synchronous>, transform_indices = @transform_1, window_bounds = array<i64: 8, 128>}, {pipeline_mode = #tpu.pipeline_mode<synchronous>, transform_indices = @transform_2, window_bounds = array<i64: 256, 512>}, {pipeline_mode = #tpu.pipeline_mode<synchronous>, transform_indices = @transform_3, window_bounds = array<i64: 8, 256>}, {pipeline_mode = #tpu.pipeline_mode<synchronous>, transform_indices = @transform_4, window_bounds = array<i64: 8, 128>}, {pipeline_mode = #tpu.pipeline_mode<synchronous>, transform_indices = @transform_5, window_bounds = array<i64: 8, 128>}, {pipeline_mode = #tpu.pipeline_mode<synchronous>, transform_indices = @transform_6, window_bounds = array<i64: 128, 128>}, {pipeline_mode = #tpu.pipeline_mode<synchronous>, transform_indices = @transform_7, window_bounds = array<i64: 1, 128>}, {pipeline_mode = #tpu.pipeline_mode<synchronous>, transform_indices = @transform_8, window_bounds = array<i64: 128, 128>}, {pipeline_mode = #tpu.pipeline_mode<synchronous>, transform_indices = @transform_9, window_bounds = array<i64: 8, 128>}]} {
    %c0 = arith.constant 0 : index
    %c0_0 = arith.constant 0 : index
    %0 = vector.load %arg2[%c0, %c0_0] : memref<8x128xf32, #tpu.memory_space<vmem>>, vector<8x128xf32>
    %1 = arith.truncf %0 : vector<8x128xf32> to vector<8x128xbf16>
    %c0_1 = arith.constant 0 : index
    %c128 = arith.constant 128 : index
    %2 = vector.load %arg11[%c0_1, %c128] : memref<8x256xbf16, #tpu.memory_space<vmem>>, vector<8x128xbf16>
    tpu.vector_store %arg11[%c0_1, %c128], %1 {strides = array<i32>} : memref<8x256xbf16, #tpu.memory_space<vmem>>, vector<8x128xbf16>,
    %c0_2 = arith.constant 0 : index
    %c0_3 = arith.constant 0 : index
    %3 = vector.load %arg2[%c0_2, %c0_3] : memref<8x128xf32, #tpu.memory_space<vmem>>, vector<8x128xf32>
    %c0_i32 = arith.constant 0 : i32
    %4 = arith.index_cast %c0_i32 : i32 to index
    %c0_4 = arith.constant 0 : index
    %c0_5 = arith.constant 0 : index
    %5 = vector.load %arg1[%4, %c0_4, %c0_5] : memref<16x8x128xbf16, #tpu.memory_space<vmem>>, vector<1x8x128xbf16>
    %6 = vector.shape_cast %5 : vector<1x8x128xbf16> to vector<8x128xbf16>
    %c0_6 = arith.constant 0 : index
    %c0_7 = arith.constant 0 : index
    %7 = vector.load %arg11[%c0_6, %c0_7] : memref<8x256xbf16, #tpu.memory_space<vmem>>, vector<8x128xbf16>
    tpu.vector_store %arg11[%c0_6, %c0_7], %6 {strides = array<i32>} : memref<8x256xbf16, #tpu.memory_space<vmem>>, vector<8x128xbf16>,
    %c0_8 = arith.constant 0 : index
    %c0_9 = arith.constant 0 : index
    %8 = vector.load %arg11[%c0_8, %c0_9] : memref<8x256xbf16, #tpu.memory_space<vmem>>, vector<8x256xbf16>
    %c0_10 = arith.constant 0 : index
    %c0_11 = arith.constant 0 : index
    %9 = vector.load %arg3[%c0_10, %c0_11] : memref<256x512xbf16, #tpu.memory_space<vmem>>, vector<256x512xbf16>
    %cst = arith.constant dense<0.000000e+00> : vector<8x512xf32>
    %10 = tpu.matmul %8, %9, %cst {dimension_numbers = #tpu.dot_dimension_numbers<[1], [0], [0], [1], [0, 0, 1, 1], [], []>} : vector<8x256xbf16>, vector<256x512xbf16>, vector<8x512xf32> -> vector<8x512xf32>
    %11 = vector.extract_strided_slice %10 {offsets = [0, 0], sizes = [8, 256], strides = [1, 1]} : vector<8x512xf32> to vector<8x256xf32>
    %c0_12 = arith.constant 0 : index
    %c0_13 = arith.constant 0 : index
    %12 = vector.load %arg4[%c0_12, %c0_13] : memref<8x256xf32, #tpu.memory_space<vmem>>, vector<8x256xf32>
    %13 = arith.addf %11, %12 : vector<8x256xf32>
    %14 = arith.negf %13 : vector<8x256xf32>
    %15 = math.exp %14 : vector<8x256xf32>
    %cst_14 = arith.constant 1.000000e+00 : f32
    %16 = vector.broadcast %cst_14 : f32 to vector<8x256xf32>
    %17 = arith.addf %16, %15 : vector<8x256xf32>
    %18 = arith.divf %16, %17 : vector<8x256xf32>
    %19 = vector.extract_strided_slice %18 {offsets = [0, 0], sizes = [8, 128], strides = [1, 1]} : vector<8x256xf32> to vector<8x128xf32>
    %20 = vector.extract_strided_slice %18 {offsets = [0, 128], sizes = [8, 128], strides = [1, 1]} : vector<8x256xf32> to vector<8x128xf32>
    %21 = vector.extract_strided_slice %10 {offsets = [0, 256], sizes = [8, 128], strides = [1, 1]} : vector<8x512xf32> to vector<8x128xf32>
    %c0_15 = arith.constant 0 : index
    %c0_16 = arith.constant 0 : index
    %22 = vector.load %arg5[%c0_15, %c0_16] : memref<8x128xf32, #tpu.memory_space<vmem>>, vector<8x128xf32>
    %23 = arith.addf %21, %22 : vector<8x128xf32>
    %24 = vector.extract_strided_slice %10 {offsets = [0, 384], sizes = [8, 128], strides = [1, 1]} : vector<8x512xf32> to vector<8x128xf32>
    %c0_17 = arith.constant 0 : index
    %c0_18 = arith.constant 0 : index
    %25 = vector.load %arg6[%c0_17, %c0_18] : memref<8x128xf32, #tpu.memory_space<vmem>>, vector<8x128xf32>
    %26 = arith.addf %24, %25 : vector<8x128xf32>
    %27 = arith.mulf %19, %26 : vector<8x128xf32>
    %28 = arith.addf %23, %27 : vector<8x128xf32>
    %29 = math.tanh %28 : vector<8x128xf32>
    %cst_19 = arith.constant 1.000000e+00 : f32
    %30 = vector.broadcast %cst_19 : f32 to vector<8x128xf32>
    %31 = arith.subf %30, %20 : vector<8x128xf32>
    %32 = arith.mulf %31, %29 : vector<8x128xf32>
    %33 = arith.mulf %20, %3 : vector<8x128xf32>
    %34 = arith.addf %32, %33 : vector<8x128xf32>
    %35 = arith.truncf %34 : vector<8x128xf32> to vector<8x128xbf16>
    %c0_20 = arith.constant 0 : index
    %c128_21 = arith.constant 128 : index
    %36 = vector.load %arg11[%c0_20, %c128_21] : memref<8x256xbf16, #tpu.memory_space<vmem>>, vector<8x128xbf16>
    tpu.vector_store %arg11[%c0_20, %c128_21], %35 {strides = array<i32>} : memref<8x256xbf16, #tpu.memory_space<vmem>>, vector<8x128xbf16>,
    %c8_i32 = arith.constant 8 : i32
    %37 = arith.muli %c0_i32, %c8_i32 : i32
    %38 = tpu.assume_multiple %37, 8 : i32
    %39 = arith.index_cast %38 : i32 to index
    %c0_22 = arith.constant 0 : index
    %40 = vector.load %arg12[%39, %c0_22] : memref<128x128xf32, #tpu.memory_space<vmem>>, vector<8x128xf32>
    tpu.vector_store %arg12[%39, %c0_22], %34 {strides = array<i32>} : memref<128x128xf32, #tpu.memory_space<vmem>>, vector<8x128xf32>,
    %c1_i32 = arith.constant 1 : i32
    %41 = arith.index_cast %c1_i32 : i32 to index
    %c0_23 = arith.constant 0 : index
    %c0_24 = arith.constant 0 : index
    %42 = vector.load %arg1[%41, %c0_23, %c0_24] : memref<16x8x128xbf16, #tpu.memory_space<vmem>>, vector<1x8x128xbf16>
    %43 = vector.shape_cast %42 : vector<1x8x128xbf16> to vector<8x128xbf16>
    %c0_25 = arith.constant 0 : index
    %c0_26 = arith.constant 0 : index
    %44 = vector.load %arg11[%c0_25, %c0_26] : memref<8x256xbf16, #tpu.memory_space<vmem>>, vector<8x128xbf16>
    tpu.vector_store %arg11[%c0_25, %c0_26], %43 {strides = array<i32>} : memref<8x256xbf16, #tpu.memory_space<vmem>>, vector<8x128xbf16>,
    %c0_27 = arith.constant 0 : index
    %c0_28 = arith.constant 0 : index
    %45 = vector.load %arg11[%c0_27, %c0_28] : memref<8x256xbf16, #tpu.memory_space<vmem>>, vector<8x256xbf16>
    %c0_29 = arith.constant 0 : index
    %c0_30 = arith.constant 0 : index
    %46 = vector.load %arg3[%c0_29, %c0_30] : memref<256x512xbf16, #tpu.memory_space<vmem>>, vector<256x512xbf16>
    %cst_31 = arith.constant dense<0.000000e+00> : vector<8x512xf32>
    %47 = tpu.matmul %45, %46, %cst_31 {dimension_numbers = #tpu.dot_dimension_numbers<[1], [0], [0], [1], [0, 0, 1, 1], [], []>} : vector<8x256xbf16>, vector<256x512xbf16>, vector<8x512xf32> -> vector<8x512xf32>
    %48 = vector.extract_strided_slice %47 {offsets = [0, 0], sizes = [8, 256], strides = [1, 1]} : vector<8x512xf32> to vector<8x256xf32>
    %c0_32 = arith.constant 0 : index
    %c0_33 = arith.constant 0 : index
    %49 = vector.load %arg4[%c0_32, %c0_33] : memref<8x256xf32, #tpu.memory_space<vmem>>, vector<8x256xf32>
    %50 = arith.addf %48, %49 : vector<8x256xf32>
    %51 = arith.negf %50 : vector<8x256xf32>
    %52 = math.exp %51 : vector<8x256xf32>
    %cst_34 = arith.constant 1.000000e+00 : f32
    %53 = vector.broadcast %cst_34 : f32 to vector<8x256xf32>
    %54 = arith.addf %53, %52 : vector<8x256xf32>
    %55 = arith.divf %53, %54 : vector<8x256xf32>
    %56 = vector.extract_strided_slice %55 {offsets = [0, 0], sizes = [8, 128], strides = [1, 1]} : vector<8x256xf32> to vector<8x128xf32>
    %57 = vector.extract_strided_slice %55 {offsets = [0, 128], sizes = [8, 128], strides = [1, 1]} : vector<8x256xf32> to vector<8x128xf32>
    %58 = vector.extract_strided_slice %47 {offsets = [0, 256], sizes = [8, 128], strides = [1, 1]} : vector<8x512xf32> to vector<8x128xf32>
    %c0_35 = arith.constant 0 : index
    %c0_36 = arith.constant 0 : index
    %59 = vector.load %arg5[%c0_35, %c0_36] : memref<8x128xf32, #tpu.memory_space<vmem>>, vector<8x128xf32>
    %60 = arith.addf %58, %59 : vector<8x128xf32>
    %61 = vector.extract_strided_slice %47 {offsets = [0, 384], sizes = [8, 128], strides = [1, 1]} : vector<8x512xf32> to vector<8x128xf32>
    %c0_37 = arith.constant 0 : index
    %c0_38 = arith.constant 0 : index
    %62 = vector.load %arg6[%c0_37, %c0_38] : memref<8x128xf32, #tpu.memory_space<vmem>>, vector<8x128xf32>
    %63 = arith.addf %61, %62 : vector<8x128xf32>
    %64 = arith.mulf %56, %63 : vector<8x128xf32>
    %65 = arith.addf %60, %64 : vector<8x128xf32>
    %66 = math.tanh %65 : vector<8x128xf32>
    %cst_39 = arith.constant 1.000000e+00 : f32
    %67 = vector.broadcast %cst_39 : f32 to vector<8x128xf32>
    %68 = arith.subf %67, %57 : vector<8x128xf32>
    %69 = arith.mulf %68, %66 : vector<8x128xf32>
    %70 = arith.mulf %57, %34 : vector<8x128xf32>
    %71 = arith.addf %69, %70 : vector<8x128xf32>
    %72 = arith.truncf %71 : vector<8x128xf32> to vector<8x128xbf16>
    %c0_40 = arith.constant 0 : index
    %c128_41 = arith.constant 128 : index
    %73 = vector.load %arg11[%c0_40, %c128_41] : memref<8x256xbf16, #tpu.memory_space<vmem>>, vector<8x128xbf16>
    tpu.vector_store %arg11[%c0_40, %c128_41], %72 {strides = array<i32>} : memref<8x256xbf16, #tpu.memory_space<vmem>>, vector<8x128xbf16>,
    %c8_i32_42 = arith.constant 8 : i32
    %74 = arith.muli %c1_i32, %c8_i32_42 : i32
    %75 = tpu.assume_multiple %74, 8 : i32
    %76 = arith.index_cast %75 : i32 to index
    %c0_43 = arith.constant 0 : index
    %77 = vector.load %arg12[%76, %c0_43] : memref<128x128xf32, #tpu.memory_space<vmem>>, vector<8x128xf32>
    tpu.vector_store %arg12[%76, %c0_43], %71 {strides = array<i32>} : memref<128x128xf32, #tpu.memory_space<vmem>>, vector<8x128xf32>,
    %c2_i32 = arith.constant 2 : i32
    %78 = arith.index_cast %c2_i32 : i32 to index
    %c0_44 = arith.constant 0 : index
    %c0_45 = arith.constant 0 : index
    %79 = vector.load %arg1[%78, %c0_44, %c0_45] : memref<16x8x128xbf16, #tpu.memory_space<vmem>>, vector<1x8x128xbf16>
    %80 = vector.shape_cast %79 : vector<1x8x128xbf16> to vector<8x128xbf16>
    %c0_46 = arith.constant 0 : index
    %c0_47 = arith.constant 0 : index
    %81 = vector.load %arg11[%c0_46, %c0_47] : memref<8x256xbf16, #tpu.memory_space<vmem>>, vector<8x128xbf16>
    tpu.vector_store %arg11[%c0_46, %c0_47], %80 {strides = array<i32>} : memref<8x256xbf16, #tpu.memory_space<vmem>>, vector<8x128xbf16>,
    %c0_48 = arith.constant 0 : index
    %c0_49 = arith.constant 0 : index
    %82 = vector.load %arg11[%c0_48, %c0_49] : memref<8x256xbf16, #tpu.memory_space<vmem>>, vector<8x256xbf16>
    %c0_50 = arith.constant 0 : index
    %c0_51 = arith.constant 0 : index
    %83 = vector.load %arg3[%c0_50, %c0_51] : memref<256x512xbf16, #tpu.memory_space<vmem>>, vector<256x512xbf16>
    %cst_52 = arith.constant dense<0.000000e+00> : vector<8x512xf32>
    %84 = tpu.matmul %82, %83, %cst_52 {dimension_numbers = #tpu.dot_dimension_numbers<[1], [0], [0], [1], [0, 0, 1, 1], [], []>} : vector<8x256xbf16>, vector<256x512xbf16>, vector<8x512xf32> -> vector<8x512xf32>
    %85 = vector.extract_strided_slice %84 {offsets = [0, 0], sizes = [8, 256], strides = [1, 1]} : vector<8x512xf32> to vector<8x256xf32>
    %c0_53 = arith.constant 0 : index
    %c0_54 = arith.constant 0 : index
    %86 = vector.load %arg4[%c0_53, %c0_54] : memref<8x256xf32, #tpu.memory_space<vmem>>, vector<8x256xf32>
    %87 = arith.addf %85, %86 : vector<8x256xf32>
    %88 = arith.negf %87 : vector<8x256xf32>
    %89 = math.exp %88 : vector<8x256xf32>
    %cst_55 = arith.constant 1.000000e+00 : f32
    %90 = vector.broadcast %cst_55 : f32 to vector<8x256xf32>
    %91 = arith.addf %90, %89 : vector<8x256xf32>
    %92 = arith.divf %90, %91 : vector<8x256xf32>
    %93 = vector.extract_strided_slice %92 {offsets = [0, 0], sizes = [8, 128], strides = [1, 1]} : vector<8x256xf32> to vector<8x128xf32>
    %94 = vector.extract_strided_slice %92 {offsets = [0, 128], sizes = [8, 128], strides = [1, 1]} : vector<8x256xf32> to vector<8x128xf32>
    %95 = vector.extract_strided_slice %84 {offsets = [0, 256], sizes = [8, 128], strides = [1, 1]} : vector<8x512xf32> to vector<8x128xf32>
    %c0_56 = arith.constant 0 : index
    %c0_57 = arith.constant 0 : index
    %96 = vector.load %arg5[%c0_56, %c0_57] : memref<8x128xf32, #tpu.memory_space<vmem>>, vector<8x128xf32>
    %97 = arith.addf %95, %96 : vector<8x128xf32>
    %98 = vector.extract_strided_slice %84 {offsets = [0, 384], sizes = [8, 128], strides = [1, 1]} : vector<8x512xf32> to vector<8x128xf32>
    %c0_58 = arith.constant 0 : index
    %c0_59 = arith.constant 0 : index
    %99 = vector.load %arg6[%c0_58, %c0_59] : memref<8x128xf32, #tpu.memory_space<vmem>>, vector<8x128xf32>
    %100 = arith.addf %98, %99 : vector<8x128xf32>
    %101 = arith.mulf %93, %100 : vector<8x128xf32>
    %102 = arith.addf %97, %101 : vector<8x128xf32>
    %103 = math.tanh %102 : vector<8x128xf32>
    %cst_60 = arith.constant 1.000000e+00 : f32
    %104 = vector.broadcast %cst_60 : f32 to vector<8x128xf32>
    %105 = arith.subf %104, %94 : vector<8x128xf32>
    %106 = arith.mulf %105, %103 : vector<8x128xf32>
    %107 = arith.mulf %94, %71 : vector<8x128xf32>
    %108 = arith.addf %106, %107 : vector<8x128xf32>
    %109 = arith.truncf %108 : vector<8x128xf32> to vector<8x128xbf16>
    %c0_61 = arith.constant 0 : index
    %c128_62 = arith.constant 128 : index
    %110 = vector.load %arg11[%c0_61, %c128_62] : memref<8x256xbf16, #tpu.memory_space<vmem>>, vector<8x128xbf16>
    tpu.vector_store %arg11[%c0_61, %c128_62], %109 {strides = array<i32>} : memref<8x256xbf16, #tpu.memory_space<vmem>>, vector<8x128xbf16>,
    %c8_i32_63 = arith.constant 8 : i32
    %111 = arith.muli %c2_i32, %c8_i32_63 : i32
    %112 = tpu.assume_multiple %111, 8 : i32
    %113 = arith.index_cast %112 : i32 to index
    %c0_64 = arith.constant 0 : index
    %114 = vector.load %arg12[%113, %c0_64] : memref<128x128xf32, #tpu.memory_space<vmem>>, vector<8x128xf32>
    tpu.vector_store %arg12[%113, %c0_64], %108 {strides = array<i32>} : memref<128x128xf32, #tpu.memory_space<vmem>>, vector<8x128xf32>,
    %c3_i32 = arith.constant 3 : i32
    %115 = arith.index_cast %c3_i32 : i32 to index
    %c0_65 = arith.constant 0 : index
    %c0_66 = arith.constant 0 : index
    %116 = vector.load %arg1[%115, %c0_65, %c0_66] : memref<16x8x128xbf16, #tpu.memory_space<vmem>>, vector<1x8x128xbf16>
    %117 = vector.shape_cast %116 : vector<1x8x128xbf16> to vector<8x128xbf16>
    %c0_67 = arith.constant 0 : index
    %c0_68 = arith.constant 0 : index
    %118 = vector.load %arg11[%c0_67, %c0_68] : memref<8x256xbf16, #tpu.memory_space<vmem>>, vector<8x128xbf16>
    tpu.vector_store %arg11[%c0_67, %c0_68], %117 {strides = array<i32>} : memref<8x256xbf16, #tpu.memory_space<vmem>>, vector<8x128xbf16>,
    %c0_69 = arith.constant 0 : index
    %c0_70 = arith.constant 0 : index
    %119 = vector.load %arg11[%c0_69, %c0_70] : memref<8x256xbf16, #tpu.memory_space<vmem>>, vector<8x256xbf16>
    %c0_71 = arith.constant 0 : index
    %c0_72 = arith.constant 0 : index
    %120 = vector.load %arg3[%c0_71, %c0_72] : memref<256x512xbf16, #tpu.memory_space<vmem>>, vector<256x512xbf16>
    %cst_73 = arith.constant dense<0.000000e+00> : vector<8x512xf32>
    %121 = tpu.matmul %119, %120, %cst_73 {dimension_numbers = #tpu.dot_dimension_numbers<[1], [0], [0], [1], [0, 0, 1, 1], [], []>} : vector<8x256xbf16>, vector<256x512xbf16>, vector<8x512xf32> -> vector<8x512xf32>
    %122 = vector.extract_strided_slice %121 {offsets = [0, 0], sizes = [8, 256], strides = [1, 1]} : vector<8x512xf32> to vector<8x256xf32>
    %c0_74 = arith.constant 0 : index
    %c0_75 = arith.constant 0 : index
    %123 = vector.load %arg4[%c0_74, %c0_75] : memref<8x256xf32, #tpu.memory_space<vmem>>, vector<8x256xf32>
    %124 = arith.addf %122, %123 : vector<8x256xf32>
    %125 = arith.negf %124 : vector<8x256xf32>
    %126 = math.exp %125 : vector<8x256xf32>
    %cst_76 = arith.constant 1.000000e+00 : f32
    %127 = vector.broadcast %cst_76 : f32 to vector<8x256xf32>
    %128 = arith.addf %127, %126 : vector<8x256xf32>
    %129 = arith.divf %127, %128 : vector<8x256xf32>
    %130 = vector.extract_strided_slice %129 {offsets = [0, 0], sizes = [8, 128], strides = [1, 1]} : vector<8x256xf32> to vector<8x128xf32>
    %131 = vector.extract_strided_slice %129 {offsets = [0, 128], sizes = [8, 128], strides = [1, 1]} : vector<8x256xf32> to vector<8x128xf32>
    %132 = vector.extract_strided_slice %121 {offsets = [0, 256], sizes = [8, 128], strides = [1, 1]} : vector<8x512xf32> to vector<8x128xf32>
    %c0_77 = arith.constant 0 : index
    %c0_78 = arith.constant 0 : index
    %133 = vector.load %arg5[%c0_77, %c0_78] : memref<8x128xf32, #tpu.memory_space<vmem>>, vector<8x128xf32>
    %134 = arith.addf %132, %133 : vector<8x128xf32>
    %135 = vector.extract_strided_slice %121 {offsets = [0, 384], sizes = [8, 128], strides = [1, 1]} : vector<8x512xf32> to vector<8x128xf32>
    %c0_79 = arith.constant 0 : index
    %c0_80 = arith.constant 0 : index
    %136 = vector.load %arg6[%c0_79, %c0_80] : memref<8x128xf32, #tpu.memory_space<vmem>>, vector<8x128xf32>
    %137 = arith.addf %135, %136 : vector<8x128xf32>
    %138 = arith.mulf %130, %137 : vector<8x128xf32>
    %139 = arith.addf %134, %138 : vector<8x128xf32>
    %140 = math.tanh %139 : vector<8x128xf32>
    %cst_81 = arith.constant 1.000000e+00 : f32
    %141 = vector.broadcast %cst_81 : f32 to vector<8x128xf32>
    %142 = arith.subf %141, %131 : vector<8x128xf32>
    %143 = arith.mulf %142, %140 : vector<8x128xf32>
    %144 = arith.mulf %131, %108 : vector<8x128xf32>
    %145 = arith.addf %143, %144 : vector<8x128xf32>
    %146 = arith.truncf %145 : vector<8x128xf32> to vector<8x128xbf16>
    %c0_82 = arith.constant 0 : index
    %c128_83 = arith.constant 128 : index
    %147 = vector.load %arg11[%c0_82, %c128_83] : memref<8x256xbf16, #tpu.memory_space<vmem>>, vector<8x128xbf16>
    tpu.vector_store %arg11[%c0_82, %c128_83], %146 {strides = array<i32>} : memref<8x256xbf16, #tpu.memory_space<vmem>>, vector<8x128xbf16>,
    %c8_i32_84 = arith.constant 8 : i32
    %148 = arith.muli %c3_i32, %c8_i32_84 : i32
    %149 = tpu.assume_multiple %148, 8 : i32
    %150 = arith.index_cast %149 : i32 to index
    %c0_85 = arith.constant 0 : index
    %151 = vector.load %arg12[%150, %c0_85] : memref<128x128xf32, #tpu.memory_space<vmem>>, vector<8x128xf32>
    tpu.vector_store %arg12[%150, %c0_85], %145 {strides = array<i32>} : memref<128x128xf32, #tpu.memory_space<vmem>>, vector<8x128xf32>,
    %c4_i32 = arith.constant 4 : i32
    %152 = arith.index_cast %c4_i32 : i32 to index
    %c0_86 = arith.constant 0 : index
    %c0_87 = arith.constant 0 : index
    %153 = vector.load %arg1[%152, %c0_86, %c0_87] : memref<16x8x128xbf16, #tpu.memory_space<vmem>>, vector<1x8x128xbf16>
    %154 = vector.shape_cast %153 : vector<1x8x128xbf16> to vector<8x128xbf16>
    %c0_88 = arith.constant 0 : index
    %c0_89 = arith.constant 0 : index
    %155 = vector.load %arg11[%c0_88, %c0_89] : memref<8x256xbf16, #tpu.memory_space<vmem>>, vector<8x128xbf16>
    tpu.vector_store %arg11[%c0_88, %c0_89], %154 {strides = array<i32>} : memref<8x256xbf16, #tpu.memory_space<vmem>>, vector<8x128xbf16>,
    %c0_90 = arith.constant 0 : index
    %c0_91 = arith.constant 0 : index
    %156 = vector.load %arg11[%c0_90, %c0_91] : memref<8x256xbf16, #tpu.memory_space<vmem>>, vector<8x256xbf16>
    %c0_92 = arith.constant 0 : index
    %c0_93 = arith.constant 0 : index
    %157 = vector.load %arg3[%c0_92, %c0_93] : memref<256x512xbf16, #tpu.memory_space<vmem>>, vector<256x512xbf16>
    %cst_94 = arith.constant dense<0.000000e+00> : vector<8x512xf32>
    %158 = tpu.matmul %156, %157, %cst_94 {dimension_numbers = #tpu.dot_dimension_numbers<[1], [0], [0], [1], [0, 0, 1, 1], [], []>} : vector<8x256xbf16>, vector<256x512xbf16>, vector<8x512xf32> -> vector<8x512xf32>
    %159 = vector.extract_strided_slice %158 {offsets = [0, 0], sizes = [8, 256], strides = [1, 1]} : vector<8x512xf32> to vector<8x256xf32>
    %c0_95 = arith.constant 0 : index
    %c0_96 = arith.constant 0 : index
    %160 = vector.load %arg4[%c0_95, %c0_96] : memref<8x256xf32, #tpu.memory_space<vmem>>, vector<8x256xf32>
    %161 = arith.addf %159, %160 : vector<8x256xf32>
    %162 = arith.negf %161 : vector<8x256xf32>
    %163 = math.exp %162 : vector<8x256xf32>
    %cst_97 = arith.constant 1.000000e+00 : f32
    %164 = vector.broadcast %cst_97 : f32 to vector<8x256xf32>
    %165 = arith.addf %164, %163 : vector<8x256xf32>
    %166 = arith.divf %164, %165 : vector<8x256xf32>
    %167 = vector.extract_strided_slice %166 {offsets = [0, 0], sizes = [8, 128], strides = [1, 1]} : vector<8x256xf32> to vector<8x128xf32>
    %168 = vector.extract_strided_slice %166 {offsets = [0, 128], sizes = [8, 128], strides = [1, 1]} : vector<8x256xf32> to vector<8x128xf32>
    %169 = vector.extract_strided_slice %158 {offsets = [0, 256], sizes = [8, 128], strides = [1, 1]} : vector<8x512xf32> to vector<8x128xf32>
    %c0_98 = arith.constant 0 : index
    %c0_99 = arith.constant 0 : index
    %170 = vector.load %arg5[%c0_98, %c0_99] : memref<8x128xf32, #tpu.memory_space<vmem>>, vector<8x128xf32>
    %171 = arith.addf %169, %170 : vector<8x128xf32>
    %172 = vector.extract_strided_slice %158 {offsets = [0, 384], sizes = [8, 128], strides = [1, 1]} : vector<8x512xf32> to vector<8x128xf32>
    %c0_100 = arith.constant 0 : index
    %c0_101 = arith.constant 0 : index
    %173 = vector.load %arg6[%c0_100, %c0_101] : memref<8x128xf32, #tpu.memory_space<vmem>>, vector<8x128xf32>
    %174 = arith.addf %172, %173 : vector<8x128xf32>
    %175 = arith.mulf %167, %174 : vector<8x128xf32>
    %176 = arith.addf %171, %175 : vector<8x128xf32>
    %177 = math.tanh %176 : vector<8x128xf32>
    %cst_102 = arith.constant 1.000000e+00 : f32
    %178 = vector.broadcast %cst_102 : f32 to vector<8x128xf32>
    %179 = arith.subf %178, %168 : vector<8x128xf32>
    %180 = arith.mulf %179, %177 : vector<8x128xf32>
    %181 = arith.mulf %168, %145 : vector<8x128xf32>
    %182 = arith.addf %180, %181 : vector<8x128xf32>
    %183 = arith.truncf %182 : vector<8x128xf32> to vector<8x128xbf16>
    %c0_103 = arith.constant 0 : index
    %c128_104 = arith.constant 128 : index
    %184 = vector.load %arg11[%c0_103, %c128_104] : memref<8x256xbf16, #tpu.memory_space<vmem>>, vector<8x128xbf16>
    tpu.vector_store %arg11[%c0_103, %c128_104], %183 {strides = array<i32>} : memref<8x256xbf16, #tpu.memory_space<vmem>>, vector<8x128xbf16>,
    %c8_i32_105 = arith.constant 8 : i32
    %185 = arith.muli %c4_i32, %c8_i32_105 : i32
    %186 = tpu.assume_multiple %185, 8 : i32
    %187 = arith.index_cast %186 : i32 to index
    %c0_106 = arith.constant 0 : index
    %188 = vector.load %arg12[%187, %c0_106] : memref<128x128xf32, #tpu.memory_space<vmem>>, vector<8x128xf32>
    tpu.vector_store %arg12[%187, %c0_106], %182 {strides = array<i32>} : memref<128x128xf32, #tpu.memory_space<vmem>>, vector<8x128xf32>,
    %c5_i32 = arith.constant 5 : i32
    %189 = arith.index_cast %c5_i32 : i32 to index
    %c0_107 = arith.constant 0 : index
    %c0_108 = arith.constant 0 : index
    %190 = vector.load %arg1[%189, %c0_107, %c0_108] : memref<16x8x128xbf16, #tpu.memory_space<vmem>>, vector<1x8x128xbf16>
    %191 = vector.shape_cast %190 : vector<1x8x128xbf16> to vector<8x128xbf16>
    %c0_109 = arith.constant 0 : index
    %c0_110 = arith.constant 0 : index
    %192 = vector.load %arg11[%c0_109, %c0_110] : memref<8x256xbf16, #tpu.memory_space<vmem>>, vector<8x128xbf16>
    tpu.vector_store %arg11[%c0_109, %c0_110], %191 {strides = array<i32>} : memref<8x256xbf16, #tpu.memory_space<vmem>>, vector<8x128xbf16>,
    %c0_111 = arith.constant 0 : index
    %c0_112 = arith.constant 0 : index
    %193 = vector.load %arg11[%c0_111, %c0_112] : memref<8x256xbf16, #tpu.memory_space<vmem>>, vector<8x256xbf16>
    %c0_113 = arith.constant 0 : index
    %c0_114 = arith.constant 0 : index
    %194 = vector.load %arg3[%c0_113, %c0_114] : memref<256x512xbf16, #tpu.memory_space<vmem>>, vector<256x512xbf16>
    %cst_115 = arith.constant dense<0.000000e+00> : vector<8x512xf32>
    %195 = tpu.matmul %193, %194, %cst_115 {dimension_numbers = #tpu.dot_dimension_numbers<[1], [0], [0], [1], [0, 0, 1, 1], [], []>} : vector<8x256xbf16>, vector<256x512xbf16>, vector<8x512xf32> -> vector<8x512xf32>
    %196 = vector.extract_strided_slice %195 {offsets = [0, 0], sizes = [8, 256], strides = [1, 1]} : vector<8x512xf32> to vector<8x256xf32>
    %c0_116 = arith.constant 0 : index
    %c0_117 = arith.constant 0 : index
    %197 = vector.load %arg4[%c0_116, %c0_117] : memref<8x256xf32, #tpu.memory_space<vmem>>, vector<8x256xf32>
    %198 = arith.addf %196, %197 : vector<8x256xf32>
    %199 = arith.negf %198 : vector<8x256xf32>
    %200 = math.exp %199 : vector<8x256xf32>
    %cst_118 = arith.constant 1.000000e+00 : f32
    %201 = vector.broadcast %cst_118 : f32 to vector<8x256xf32>
    %202 = arith.addf %201, %200 : vector<8x256xf32>
    %203 = arith.divf %201, %202 : vector<8x256xf32>
    %204 = vector.extract_strided_slice %203 {offsets = [0, 0], sizes = [8, 128], strides = [1, 1]} : vector<8x256xf32> to vector<8x128xf32>
    %205 = vector.extract_strided_slice %203 {offsets = [0, 128], sizes = [8, 128], strides = [1, 1]} : vector<8x256xf32> to vector<8x128xf32>
    %206 = vector.extract_strided_slice %195 {offsets = [0, 256], sizes = [8, 128], strides = [1, 1]} : vector<8x512xf32> to vector<8x128xf32>
    %c0_119 = arith.constant 0 : index
    %c0_120 = arith.constant 0 : index
    %207 = vector.load %arg5[%c0_119, %c0_120] : memref<8x128xf32, #tpu.memory_space<vmem>>, vector<8x128xf32>
    %208 = arith.addf %206, %207 : vector<8x128xf32>
    %209 = vector.extract_strided_slice %195 {offsets = [0, 384], sizes = [8, 128], strides = [1, 1]} : vector<8x512xf32> to vector<8x128xf32>
    %c0_121 = arith.constant 0 : index
    %c0_122 = arith.constant 0 : index
    %210 = vector.load %arg6[%c0_121, %c0_122] : memref<8x128xf32, #tpu.memory_space<vmem>>, vector<8x128xf32>
    %211 = arith.addf %209, %210 : vector<8x128xf32>
    %212 = arith.mulf %204, %211 : vector<8x128xf32>
    %213 = arith.addf %208, %212 : vector<8x128xf32>
    %214 = math.tanh %213 : vector<8x128xf32>
    %cst_123 = arith.constant 1.000000e+00 : f32
    %215 = vector.broadcast %cst_123 : f32 to vector<8x128xf32>
    %216 = arith.subf %215, %205 : vector<8x128xf32>
    %217 = arith.mulf %216, %214 : vector<8x128xf32>
    %218 = arith.mulf %205, %182 : vector<8x128xf32>
    %219 = arith.addf %217, %218 : vector<8x128xf32>
    %220 = arith.truncf %219 : vector<8x128xf32> to vector<8x128xbf16>
    %c0_124 = arith.constant 0 : index
    %c128_125 = arith.constant 128 : index
    %221 = vector.load %arg11[%c0_124, %c128_125] : memref<8x256xbf16, #tpu.memory_space<vmem>>, vector<8x128xbf16>
    tpu.vector_store %arg11[%c0_124, %c128_125], %220 {strides = array<i32>} : memref<8x256xbf16, #tpu.memory_space<vmem>>, vector<8x128xbf16>,
    %c8_i32_126 = arith.constant 8 : i32
    %222 = arith.muli %c5_i32, %c8_i32_126 : i32
    %223 = tpu.assume_multiple %222, 8 : i32
    %224 = arith.index_cast %223 : i32 to index
    %c0_127 = arith.constant 0 : index
    %225 = vector.load %arg12[%224, %c0_127] : memref<128x128xf32, #tpu.memory_space<vmem>>, vector<8x128xf32>
    tpu.vector_store %arg12[%224, %c0_127], %219 {strides = array<i32>} : memref<128x128xf32, #tpu.memory_space<vmem>>, vector<8x128xf32>,
    %c6_i32 = arith.constant 6 : i32
    %226 = arith.index_cast %c6_i32 : i32 to index
    %c0_128 = arith.constant 0 : index
    %c0_129 = arith.constant 0 : index
    %227 = vector.load %arg1[%226, %c0_128, %c0_129] : memref<16x8x128xbf16, #tpu.memory_space<vmem>>, vector<1x8x128xbf16>
    %228 = vector.shape_cast %227 : vector<1x8x128xbf16> to vector<8x128xbf16>
    %c0_130 = arith.constant 0 : index
    %c0_131 = arith.constant 0 : index
    %229 = vector.load %arg11[%c0_130, %c0_131] : memref<8x256xbf16, #tpu.memory_space<vmem>>, vector<8x128xbf16>
    tpu.vector_store %arg11[%c0_130, %c0_131], %228 {strides = array<i32>} : memref<8x256xbf16, #tpu.memory_space<vmem>>, vector<8x128xbf16>,
    %c0_132 = arith.constant 0 : index
    %c0_133 = arith.constant 0 : index
    %230 = vector.load %arg11[%c0_132, %c0_133] : memref<8x256xbf16, #tpu.memory_space<vmem>>, vector<8x256xbf16>
    %c0_134 = arith.constant 0 : index
    %c0_135 = arith.constant 0 : index
    %231 = vector.load %arg3[%c0_134, %c0_135] : memref<256x512xbf16, #tpu.memory_space<vmem>>, vector<256x512xbf16>
    %cst_136 = arith.constant dense<0.000000e+00> : vector<8x512xf32>
    %232 = tpu.matmul %230, %231, %cst_136 {dimension_numbers = #tpu.dot_dimension_numbers<[1], [0], [0], [1], [0, 0, 1, 1], [], []>} : vector<8x256xbf16>, vector<256x512xbf16>, vector<8x512xf32> -> vector<8x512xf32>
    %233 = vector.extract_strided_slice %232 {offsets = [0, 0], sizes = [8, 256], strides = [1, 1]} : vector<8x512xf32> to vector<8x256xf32>
    %c0_137 = arith.constant 0 : index
    %c0_138 = arith.constant 0 : index
    %234 = vector.load %arg4[%c0_137, %c0_138] : memref<8x256xf32, #tpu.memory_space<vmem>>, vector<8x256xf32>
    %235 = arith.addf %233, %234 : vector<8x256xf32>
    %236 = arith.negf %235 : vector<8x256xf32>
    %237 = math.exp %236 : vector<8x256xf32>
    %cst_139 = arith.constant 1.000000e+00 : f32
    %238 = vector.broadcast %cst_139 : f32 to vector<8x256xf32>
    %239 = arith.addf %238, %237 : vector<8x256xf32>
    %240 = arith.divf %238, %239 : vector<8x256xf32>
    %241 = vector.extract_strided_slice %240 {offsets = [0, 0], sizes = [8, 128], strides = [1, 1]} : vector<8x256xf32> to vector<8x128xf32>
    %242 = vector.extract_strided_slice %240 {offsets = [0, 128], sizes = [8, 128], strides = [1, 1]} : vector<8x256xf32> to vector<8x128xf32>
    %243 = vector.extract_strided_slice %232 {offsets = [0, 256], sizes = [8, 128], strides = [1, 1]} : vector<8x512xf32> to vector<8x128xf32>
    %c0_140 = arith.constant 0 : index
    %c0_141 = arith.constant 0 : index
    %244 = vector.load %arg5[%c0_140, %c0_141] : memref<8x128xf32, #tpu.memory_space<vmem>>, vector<8x128xf32>
    %245 = arith.addf %243, %244 : vector<8x128xf32>
    %246 = vector.extract_strided_slice %232 {offsets = [0, 384], sizes = [8, 128], strides = [1, 1]} : vector<8x512xf32> to vector<8x128xf32>
    %c0_142 = arith.constant 0 : index
    %c0_143 = arith.constant 0 : index
    %247 = vector.load %arg6[%c0_142, %c0_143] : memref<8x128xf32, #tpu.memory_space<vmem>>, vector<8x128xf32>
    %248 = arith.addf %246, %247 : vector<8x128xf32>
    %249 = arith.mulf %241, %248 : vector<8x128xf32>
    %250 = arith.addf %245, %249 : vector<8x128xf32>
    %251 = math.tanh %250 : vector<8x128xf32>
    %cst_144 = arith.constant 1.000000e+00 : f32
    %252 = vector.broadcast %cst_144 : f32 to vector<8x128xf32>
    %253 = arith.subf %252, %242 : vector<8x128xf32>
    %254 = arith.mulf %253, %251 : vector<8x128xf32>
    %255 = arith.mulf %242, %219 : vector<8x128xf32>
    %256 = arith.addf %254, %255 : vector<8x128xf32>
    %257 = arith.truncf %256 : vector<8x128xf32> to vector<8x128xbf16>
    %c0_145 = arith.constant 0 : index
    %c128_146 = arith.constant 128 : index
    %258 = vector.load %arg11[%c0_145, %c128_146] : memref<8x256xbf16, #tpu.memory_space<vmem>>, vector<8x128xbf16>
    tpu.vector_store %arg11[%c0_145, %c128_146], %257 {strides = array<i32>} : memref<8x256xbf16, #tpu.memory_space<vmem>>, vector<8x128xbf16>,
    %c8_i32_147 = arith.constant 8 : i32
    %259 = arith.muli %c6_i32, %c8_i32_147 : i32
    %260 = tpu.assume_multiple %259, 8 : i32
    %261 = arith.index_cast %260 : i32 to index
    %c0_148 = arith.constant 0 : index
    %262 = vector.load %arg12[%261, %c0_148] : memref<128x128xf32, #tpu.memory_space<vmem>>, vector<8x128xf32>
    tpu.vector_store %arg12[%261, %c0_148], %256 {strides = array<i32>} : memref<128x128xf32, #tpu.memory_space<vmem>>, vector<8x128xf32>,
    %c7_i32 = arith.constant 7 : i32
    %263 = arith.index_cast %c7_i32 : i32 to index
    %c0_149 = arith.constant 0 : index
    %c0_150 = arith.constant 0 : index
    %264 = vector.load %arg1[%263, %c0_149, %c0_150] : memref<16x8x128xbf16, #tpu.memory_space<vmem>>, vector<1x8x128xbf16>
    %265 = vector.shape_cast %264 : vector<1x8x128xbf16> to vector<8x128xbf16>
    %c0_151 = arith.constant 0 : index
    %c0_152 = arith.constant 0 : index
    %266 = vector.load %arg11[%c0_151, %c0_152] : memref<8x256xbf16, #tpu.memory_space<vmem>>, vector<8x128xbf16>
    tpu.vector_store %arg11[%c0_151, %c0_152], %265 {strides = array<i32>} : memref<8x256xbf16, #tpu.memory_space<vmem>>, vector<8x128xbf16>,
    %c0_153 = arith.constant 0 : index
    %c0_154 = arith.constant 0 : index
    %267 = vector.load %arg11[%c0_153, %c0_154] : memref<8x256xbf16, #tpu.memory_space<vmem>>, vector<8x256xbf16>
    %c0_155 = arith.constant 0 : index
    %c0_156 = arith.constant 0 : index
    %268 = vector.load %arg3[%c0_155, %c0_156] : memref<256x512xbf16, #tpu.memory_space<vmem>>, vector<256x512xbf16>
    %cst_157 = arith.constant dense<0.000000e+00> : vector<8x512xf32>
    %269 = tpu.matmul %267, %268, %cst_157 {dimension_numbers = #tpu.dot_dimension_numbers<[1], [0], [0], [1], [0, 0, 1, 1], [], []>} : vector<8x256xbf16>, vector<256x512xbf16>, vector<8x512xf32> -> vector<8x512xf32>
    %270 = vector.extract_strided_slice %269 {offsets = [0, 0], sizes = [8, 256], strides = [1, 1]} : vector<8x512xf32> to vector<8x256xf32>
    %c0_158 = arith.constant 0 : index
    %c0_159 = arith.constant 0 : index
    %271 = vector.load %arg4[%c0_158, %c0_159] : memref<8x256xf32, #tpu.memory_space<vmem>>, vector<8x256xf32>
    %272 = arith.addf %270, %271 : vector<8x256xf32>
    %273 = arith.negf %272 : vector<8x256xf32>
    %274 = math.exp %273 : vector<8x256xf32>
    %cst_160 = arith.constant 1.000000e+00 : f32
    %275 = vector.broadcast %cst_160 : f32 to vector<8x256xf32>
    %276 = arith.addf %275, %274 : vector<8x256xf32>
    %277 = arith.divf %275, %276 : vector<8x256xf32>
    %278 = vector.extract_strided_slice %277 {offsets = [0, 0], sizes = [8, 128], strides = [1, 1]} : vector<8x256xf32> to vector<8x128xf32>
    %279 = vector.extract_strided_slice %277 {offsets = [0, 128], sizes = [8, 128], strides = [1, 1]} : vector<8x256xf32> to vector<8x128xf32>
    %280 = vector.extract_strided_slice %269 {offsets = [0, 256], sizes = [8, 128], strides = [1, 1]} : vector<8x512xf32> to vector<8x128xf32>
    %c0_161 = arith.constant 0 : index
    %c0_162 = arith.constant 0 : index
    %281 = vector.load %arg5[%c0_161, %c0_162] : memref<8x128xf32, #tpu.memory_space<vmem>>, vector<8x128xf32>
    %282 = arith.addf %280, %281 : vector<8x128xf32>
    %283 = vector.extract_strided_slice %269 {offsets = [0, 384], sizes = [8, 128], strides = [1, 1]} : vector<8x512xf32> to vector<8x128xf32>
    %c0_163 = arith.constant 0 : index
    %c0_164 = arith.constant 0 : index
    %284 = vector.load %arg6[%c0_163, %c0_164] : memref<8x128xf32, #tpu.memory_space<vmem>>, vector<8x128xf32>
    %285 = arith.addf %283, %284 : vector<8x128xf32>
    %286 = arith.mulf %278, %285 : vector<8x128xf32>
    %287 = arith.addf %282, %286 : vector<8x128xf32>
    %288 = math.tanh %287 : vector<8x128xf32>
    %cst_165 = arith.constant 1.000000e+00 : f32
    %289 = vector.broadcast %cst_165 : f32 to vector<8x128xf32>
    %290 = arith.subf %289, %279 : vector<8x128xf32>
    %291 = arith.mulf %290, %288 : vector<8x128xf32>
    %292 = arith.mulf %279, %256 : vector<8x128xf32>
    %293 = arith.addf %291, %292 : vector<8x128xf32>
    %294 = arith.truncf %293 : vector<8x128xf32> to vector<8x128xbf16>
    %c0_166 = arith.constant 0 : index
    %c128_167 = arith.constant 128 : index
    %295 = vector.load %arg11[%c0_166, %c128_167] : memref<8x256xbf16, #tpu.memory_space<vmem>>, vector<8x128xbf16>
    tpu.vector_store %arg11[%c0_166, %c128_167], %294 {strides = array<i32>} : memref<8x256xbf16, #tpu.memory_space<vmem>>, vector<8x128xbf16>,
    %c8_i32_168 = arith.constant 8 : i32
    %296 = arith.muli %c7_i32, %c8_i32_168 : i32
    %297 = tpu.assume_multiple %296, 8 : i32
    %298 = arith.index_cast %297 : i32 to index
    %c0_169 = arith.constant 0 : index
    %299 = vector.load %arg12[%298, %c0_169] : memref<128x128xf32, #tpu.memory_space<vmem>>, vector<8x128xf32>
    tpu.vector_store %arg12[%298, %c0_169], %293 {strides = array<i32>} : memref<128x128xf32, #tpu.memory_space<vmem>>, vector<8x128xf32>,
    %c8_i32_170 = arith.constant 8 : i32
    %300 = arith.index_cast %c8_i32_170 : i32 to index
    %c0_171 = arith.constant 0 : index
    %c0_172 = arith.constant 0 : index
    %301 = vector.load %arg1[%300, %c0_171, %c0_172] : memref<16x8x128xbf16, #tpu.memory_space<vmem>>, vector<1x8x128xbf16>
    %302 = vector.shape_cast %301 : vector<1x8x128xbf16> to vector<8x128xbf16>
    %c0_173 = arith.constant 0 : index
    %c0_174 = arith.constant 0 : index
    %303 = vector.load %arg11[%c0_173, %c0_174] : memref<8x256xbf16, #tpu.memory_space<vmem>>, vector<8x128xbf16>
    tpu.vector_store %arg11[%c0_173, %c0_174], %302 {strides = array<i32>} : memref<8x256xbf16, #tpu.memory_space<vmem>>, vector<8x128xbf16>,
    %c0_175 = arith.constant 0 : index
    %c0_176 = arith.constant 0 : index
    %304 = vector.load %arg11[%c0_175, %c0_176] : memref<8x256xbf16, #tpu.memory_space<vmem>>, vector<8x256xbf16>
    %c0_177 = arith.constant 0 : index
    %c0_178 = arith.constant 0 : index
    %305 = vector.load %arg3[%c0_177, %c0_178] : memref<256x512xbf16, #tpu.memory_space<vmem>>, vector<256x512xbf16>
    %cst_179 = arith.constant dense<0.000000e+00> : vector<8x512xf32>
    %306 = tpu.matmul %304, %305, %cst_179 {dimension_numbers = #tpu.dot_dimension_numbers<[1], [0], [0], [1], [0, 0, 1, 1], [], []>} : vector<8x256xbf16>, vector<256x512xbf16>, vector<8x512xf32> -> vector<8x512xf32>
    %307 = vector.extract_strided_slice %306 {offsets = [0, 0], sizes = [8, 256], strides = [1, 1]} : vector<8x512xf32> to vector<8x256xf32>
    %c0_180 = arith.constant 0 : index
    %c0_181 = arith.constant 0 : index
    %308 = vector.load %arg4[%c0_180, %c0_181] : memref<8x256xf32, #tpu.memory_space<vmem>>, vector<8x256xf32>
    %309 = arith.addf %307, %308 : vector<8x256xf32>
    %310 = arith.negf %309 : vector<8x256xf32>
    %311 = math.exp %310 : vector<8x256xf32>
    %cst_182 = arith.constant 1.000000e+00 : f32
    %312 = vector.broadcast %cst_182 : f32 to vector<8x256xf32>
    %313 = arith.addf %312, %311 : vector<8x256xf32>
    %314 = arith.divf %312, %313 : vector<8x256xf32>
    %315 = vector.extract_strided_slice %314 {offsets = [0, 0], sizes = [8, 128], strides = [1, 1]} : vector<8x256xf32> to vector<8x128xf32>
    %316 = vector.extract_strided_slice %314 {offsets = [0, 128], sizes = [8, 128], strides = [1, 1]} : vector<8x256xf32> to vector<8x128xf32>
    %317 = vector.extract_strided_slice %306 {offsets = [0, 256], sizes = [8, 128], strides = [1, 1]} : vector<8x512xf32> to vector<8x128xf32>
    %c0_183 = arith.constant 0 : index
    %c0_184 = arith.constant 0 : index
    %318 = vector.load %arg5[%c0_183, %c0_184] : memref<8x128xf32, #tpu.memory_space<vmem>>, vector<8x128xf32>
    %319 = arith.addf %317, %318 : vector<8x128xf32>
    %320 = vector.extract_strided_slice %306 {offsets = [0, 384], sizes = [8, 128], strides = [1, 1]} : vector<8x512xf32> to vector<8x128xf32>
    %c0_185 = arith.constant 0 : index
    %c0_186 = arith.constant 0 : index
    %321 = vector.load %arg6[%c0_185, %c0_186] : memref<8x128xf32, #tpu.memory_space<vmem>>, vector<8x128xf32>
    %322 = arith.addf %320, %321 : vector<8x128xf32>
    %323 = arith.mulf %315, %322 : vector<8x128xf32>
    %324 = arith.addf %319, %323 : vector<8x128xf32>
    %325 = math.tanh %324 : vector<8x128xf32>
    %cst_187 = arith.constant 1.000000e+00 : f32
    %326 = vector.broadcast %cst_187 : f32 to vector<8x128xf32>
    %327 = arith.subf %326, %316 : vector<8x128xf32>
    %328 = arith.mulf %327, %325 : vector<8x128xf32>
    %329 = arith.mulf %316, %293 : vector<8x128xf32>
    %330 = arith.addf %328, %329 : vector<8x128xf32>
    %331 = arith.truncf %330 : vector<8x128xf32> to vector<8x128xbf16>
    %c0_188 = arith.constant 0 : index
    %c128_189 = arith.constant 128 : index
    %332 = vector.load %arg11[%c0_188, %c128_189] : memref<8x256xbf16, #tpu.memory_space<vmem>>, vector<8x128xbf16>
    tpu.vector_store %arg11[%c0_188, %c128_189], %331 {strides = array<i32>} : memref<8x256xbf16, #tpu.memory_space<vmem>>, vector<8x128xbf16>,
    %c8_i32_190 = arith.constant 8 : i32
    %333 = arith.muli %c8_i32_170, %c8_i32_190 : i32
    %334 = tpu.assume_multiple %333, 8 : i32
    %335 = arith.index_cast %334 : i32 to index
    %c0_191 = arith.constant 0 : index
    %336 = vector.load %arg12[%335, %c0_191] : memref<128x128xf32, #tpu.memory_space<vmem>>, vector<8x128xf32>
    tpu.vector_store %arg12[%335, %c0_191], %330 {strides = array<i32>} : memref<128x128xf32, #tpu.memory_space<vmem>>, vector<8x128xf32>,
    %c9_i32 = arith.constant 9 : i32
    %337 = arith.index_cast %c9_i32 : i32 to index
    %c0_192 = arith.constant 0 : index
    %c0_193 = arith.constant 0 : index
    %338 = vector.load %arg1[%337, %c0_192, %c0_193] : memref<16x8x128xbf16, #tpu.memory_space<vmem>>, vector<1x8x128xbf16>
    %339 = vector.shape_cast %338 : vector<1x8x128xbf16> to vector<8x128xbf16>
    %c0_194 = arith.constant 0 : index
    %c0_195 = arith.constant 0 : index
    %340 = vector.load %arg11[%c0_194, %c0_195] : memref<8x256xbf16, #tpu.memory_space<vmem>>, vector<8x128xbf16>
    tpu.vector_store %arg11[%c0_194, %c0_195], %339 {strides = array<i32>} : memref<8x256xbf16, #tpu.memory_space<vmem>>, vector<8x128xbf16>,
    %c0_196 = arith.constant 0 : index
    %c0_197 = arith.constant 0 : index
    %341 = vector.load %arg11[%c0_196, %c0_197] : memref<8x256xbf16, #tpu.memory_space<vmem>>, vector<8x256xbf16>
    %c0_198 = arith.constant 0 : index
    %c0_199 = arith.constant 0 : index
    %342 = vector.load %arg3[%c0_198, %c0_199] : memref<256x512xbf16, #tpu.memory_space<vmem>>, vector<256x512xbf16>
    %cst_200 = arith.constant dense<0.000000e+00> : vector<8x512xf32>
    %343 = tpu.matmul %341, %342, %cst_200 {dimension_numbers = #tpu.dot_dimension_numbers<[1], [0], [0], [1], [0, 0, 1, 1], [], []>} : vector<8x256xbf16>, vector<256x512xbf16>, vector<8x512xf32> -> vector<8x512xf32>
    %344 = vector.extract_strided_slice %343 {offsets = [0, 0], sizes = [8, 256], strides = [1, 1]} : vector<8x512xf32> to vector<8x256xf32>
    %c0_201 = arith.constant 0 : index
    %c0_202 = arith.constant 0 : index
    %345 = vector.load %arg4[%c0_201, %c0_202] : memref<8x256xf32, #tpu.memory_space<vmem>>, vector<8x256xf32>
    %346 = arith.addf %344, %345 : vector<8x256xf32>
    %347 = arith.negf %346 : vector<8x256xf32>
    %348 = math.exp %347 : vector<8x256xf32>
    %cst_203 = arith.constant 1.000000e+00 : f32
    %349 = vector.broadcast %cst_203 : f32 to vector<8x256xf32>
    %350 = arith.addf %349, %348 : vector<8x256xf32>
    %351 = arith.divf %349, %350 : vector<8x256xf32>
    %352 = vector.extract_strided_slice %351 {offsets = [0, 0], sizes = [8, 128], strides = [1, 1]} : vector<8x256xf32> to vector<8x128xf32>
    %353 = vector.extract_strided_slice %351 {offsets = [0, 128], sizes = [8, 128], strides = [1, 1]} : vector<8x256xf32> to vector<8x128xf32>
    %354 = vector.extract_strided_slice %343 {offsets = [0, 256], sizes = [8, 128], strides = [1, 1]} : vector<8x512xf32> to vector<8x128xf32>
    %c0_204 = arith.constant 0 : index
    %c0_205 = arith.constant 0 : index
    %355 = vector.load %arg5[%c0_204, %c0_205] : memref<8x128xf32, #tpu.memory_space<vmem>>, vector<8x128xf32>
    %356 = arith.addf %354, %355 : vector<8x128xf32>
    %357 = vector.extract_strided_slice %343 {offsets = [0, 384], sizes = [8, 128], strides = [1, 1]} : vector<8x512xf32> to vector<8x128xf32>
    %c0_206 = arith.constant 0 : index
    %c0_207 = arith.constant 0 : index
    %358 = vector.load %arg6[%c0_206, %c0_207] : memref<8x128xf32, #tpu.memory_space<vmem>>, vector<8x128xf32>
    %359 = arith.addf %357, %358 : vector<8x128xf32>
    %360 = arith.mulf %352, %359 : vector<8x128xf32>
    %361 = arith.addf %356, %360 : vector<8x128xf32>
    %362 = math.tanh %361 : vector<8x128xf32>
    %cst_208 = arith.constant 1.000000e+00 : f32
    %363 = vector.broadcast %cst_208 : f32 to vector<8x128xf32>
    %364 = arith.subf %363, %353 : vector<8x128xf32>
    %365 = arith.mulf %364, %362 : vector<8x128xf32>
    %366 = arith.mulf %353, %330 : vector<8x128xf32>
    %367 = arith.addf %365, %366 : vector<8x128xf32>
    %368 = arith.truncf %367 : vector<8x128xf32> to vector<8x128xbf16>
    %c0_209 = arith.constant 0 : index
    %c128_210 = arith.constant 128 : index
    %369 = vector.load %arg11[%c0_209, %c128_210] : memref<8x256xbf16, #tpu.memory_space<vmem>>, vector<8x128xbf16>
    tpu.vector_store %arg11[%c0_209, %c128_210], %368 {strides = array<i32>} : memref<8x256xbf16, #tpu.memory_space<vmem>>, vector<8x128xbf16>,
    %c8_i32_211 = arith.constant 8 : i32
    %370 = arith.muli %c9_i32, %c8_i32_211 : i32
    %371 = tpu.assume_multiple %370, 8 : i32
    %372 = arith.index_cast %371 : i32 to index
    %c0_212 = arith.constant 0 : index
    %373 = vector.load %arg12[%372, %c0_212] : memref<128x128xf32, #tpu.memory_space<vmem>>, vector<8x128xf32>
    tpu.vector_store %arg12[%372, %c0_212], %367 {strides = array<i32>} : memref<128x128xf32, #tpu.memory_space<vmem>>, vector<8x128xf32>,
    %c10_i32 = arith.constant 10 : i32
    %374 = arith.index_cast %c10_i32 : i32 to index
    %c0_213 = arith.constant 0 : index
    %c0_214 = arith.constant 0 : index
    %375 = vector.load %arg1[%374, %c0_213, %c0_214] : memref<16x8x128xbf16, #tpu.memory_space<vmem>>, vector<1x8x128xbf16>
    %376 = vector.shape_cast %375 : vector<1x8x128xbf16> to vector<8x128xbf16>
    %c0_215 = arith.constant 0 : index
    %c0_216 = arith.constant 0 : index
    %377 = vector.load %arg11[%c0_215, %c0_216] : memref<8x256xbf16, #tpu.memory_space<vmem>>, vector<8x128xbf16>
    tpu.vector_store %arg11[%c0_215, %c0_216], %376 {strides = array<i32>} : memref<8x256xbf16, #tpu.memory_space<vmem>>, vector<8x128xbf16>,
    %c0_217 = arith.constant 0 : index
    %c0_218 = arith.constant 0 : index
    %378 = vector.load %arg11[%c0_217, %c0_218] : memref<8x256xbf16, #tpu.memory_space<vmem>>, vector<8x256xbf16>
    %c0_219 = arith.constant 0 : index
    %c0_220 = arith.constant 0 : index
    %379 = vector.load %arg3[%c0_219, %c0_220] : memref<256x512xbf16, #tpu.memory_space<vmem>>, vector<256x512xbf16>
    %cst_221 = arith.constant dense<0.000000e+00> : vector<8x512xf32>
    %380 = tpu.matmul %378, %379, %cst_221 {dimension_numbers = #tpu.dot_dimension_numbers<[1], [0], [0], [1], [0, 0, 1, 1], [], []>} : vector<8x256xbf16>, vector<256x512xbf16>, vector<8x512xf32> -> vector<8x512xf32>
    %381 = vector.extract_strided_slice %380 {offsets = [0, 0], sizes = [8, 256], strides = [1, 1]} : vector<8x512xf32> to vector<8x256xf32>
    %c0_222 = arith.constant 0 : index
    %c0_223 = arith.constant 0 : index
    %382 = vector.load %arg4[%c0_222, %c0_223] : memref<8x256xf32, #tpu.memory_space<vmem>>, vector<8x256xf32>
    %383 = arith.addf %381, %382 : vector<8x256xf32>
    %384 = arith.negf %383 : vector<8x256xf32>
    %385 = math.exp %384 : vector<8x256xf32>
    %cst_224 = arith.constant 1.000000e+00 : f32
    %386 = vector.broadcast %cst_224 : f32 to vector<8x256xf32>
    %387 = arith.addf %386, %385 : vector<8x256xf32>
    %388 = arith.divf %386, %387 : vector<8x256xf32>
    %389 = vector.extract_strided_slice %388 {offsets = [0, 0], sizes = [8, 128], strides = [1, 1]} : vector<8x256xf32> to vector<8x128xf32>
    %390 = vector.extract_strided_slice %388 {offsets = [0, 128], sizes = [8, 128], strides = [1, 1]} : vector<8x256xf32> to vector<8x128xf32>
    %391 = vector.extract_strided_slice %380 {offsets = [0, 256], sizes = [8, 128], strides = [1, 1]} : vector<8x512xf32> to vector<8x128xf32>
    %c0_225 = arith.constant 0 : index
    %c0_226 = arith.constant 0 : index
    %392 = vector.load %arg5[%c0_225, %c0_226] : memref<8x128xf32, #tpu.memory_space<vmem>>, vector<8x128xf32>
    %393 = arith.addf %391, %392 : vector<8x128xf32>
    %394 = vector.extract_strided_slice %380 {offsets = [0, 384], sizes = [8, 128], strides = [1, 1]} : vector<8x512xf32> to vector<8x128xf32>
    %c0_227 = arith.constant 0 : index
    %c0_228 = arith.constant 0 : index
    %395 = vector.load %arg6[%c0_227, %c0_228] : memref<8x128xf32, #tpu.memory_space<vmem>>, vector<8x128xf32>
    %396 = arith.addf %394, %395 : vector<8x128xf32>
    %397 = arith.mulf %389, %396 : vector<8x128xf32>
    %398 = arith.addf %393, %397 : vector<8x128xf32>
    %399 = math.tanh %398 : vector<8x128xf32>
    %cst_229 = arith.constant 1.000000e+00 : f32
    %400 = vector.broadcast %cst_229 : f32 to vector<8x128xf32>
    %401 = arith.subf %400, %390 : vector<8x128xf32>
    %402 = arith.mulf %401, %399 : vector<8x128xf32>
    %403 = arith.mulf %390, %367 : vector<8x128xf32>
    %404 = arith.addf %402, %403 : vector<8x128xf32>
    %405 = arith.truncf %404 : vector<8x128xf32> to vector<8x128xbf16>
    %c0_230 = arith.constant 0 : index
    %c128_231 = arith.constant 128 : index
    %406 = vector.load %arg11[%c0_230, %c128_231] : memref<8x256xbf16, #tpu.memory_space<vmem>>, vector<8x128xbf16>
    tpu.vector_store %arg11[%c0_230, %c128_231], %405 {strides = array<i32>} : memref<8x256xbf16, #tpu.memory_space<vmem>>, vector<8x128xbf16>,
    %c8_i32_232 = arith.constant 8 : i32
    %407 = arith.muli %c10_i32, %c8_i32_232 : i32
    %408 = tpu.assume_multiple %407, 8 : i32
    %409 = arith.index_cast %408 : i32 to index
    %c0_233 = arith.constant 0 : index
    %410 = vector.load %arg12[%409, %c0_233] : memref<128x128xf32, #tpu.memory_space<vmem>>, vector<8x128xf32>
    tpu.vector_store %arg12[%409, %c0_233], %404 {strides = array<i32>} : memref<128x128xf32, #tpu.memory_space<vmem>>, vector<8x128xf32>,
    %c11_i32 = arith.constant 11 : i32
    %411 = arith.index_cast %c11_i32 : i32 to index
    %c0_234 = arith.constant 0 : index
    %c0_235 = arith.constant 0 : index
    %412 = vector.load %arg1[%411, %c0_234, %c0_235] : memref<16x8x128xbf16, #tpu.memory_space<vmem>>, vector<1x8x128xbf16>
    %413 = vector.shape_cast %412 : vector<1x8x128xbf16> to vector<8x128xbf16>
    %c0_236 = arith.constant 0 : index
    %c0_237 = arith.constant 0 : index
    %414 = vector.load %arg11[%c0_236, %c0_237] : memref<8x256xbf16, #tpu.memory_space<vmem>>, vector<8x128xbf16>
    tpu.vector_store %arg11[%c0_236, %c0_237], %413 {strides = array<i32>} : memref<8x256xbf16, #tpu.memory_space<vmem>>, vector<8x128xbf16>,
    %c0_238 = arith.constant 0 : index
    %c0_239 = arith.constant 0 : index
    %415 = vector.load %arg11[%c0_238, %c0_239] : memref<8x256xbf16, #tpu.memory_space<vmem>>, vector<8x256xbf16>
    %c0_240 = arith.constant 0 : index
    %c0_241 = arith.constant 0 : index
    %416 = vector.load %arg3[%c0_240, %c0_241] : memref<256x512xbf16, #tpu.memory_space<vmem>>, vector<256x512xbf16>
    %cst_242 = arith.constant dense<0.000000e+00> : vector<8x512xf32>
    %417 = tpu.matmul %415, %416, %cst_242 {dimension_numbers = #tpu.dot_dimension_numbers<[1], [0], [0], [1], [0, 0, 1, 1], [], []>} : vector<8x256xbf16>, vector<256x512xbf16>, vector<8x512xf32> -> vector<8x512xf32>
    %418 = vector.extract_strided_slice %417 {offsets = [0, 0], sizes = [8, 256], strides = [1, 1]} : vector<8x512xf32> to vector<8x256xf32>
    %c0_243 = arith.constant 0 : index
    %c0_244 = arith.constant 0 : index
    %419 = vector.load %arg4[%c0_243, %c0_244] : memref<8x256xf32, #tpu.memory_space<vmem>>, vector<8x256xf32>
    %420 = arith.addf %418, %419 : vector<8x256xf32>
    %421 = arith.negf %420 : vector<8x256xf32>
    %422 = math.exp %421 : vector<8x256xf32>
    %cst_245 = arith.constant 1.000000e+00 : f32
    %423 = vector.broadcast %cst_245 : f32 to vector<8x256xf32>
    %424 = arith.addf %423, %422 : vector<8x256xf32>
    %425 = arith.divf %423, %424 : vector<8x256xf32>
    %426 = vector.extract_strided_slice %425 {offsets = [0, 0], sizes = [8, 128], strides = [1, 1]} : vector<8x256xf32> to vector<8x128xf32>
    %427 = vector.extract_strided_slice %425 {offsets = [0, 128], sizes = [8, 128], strides = [1, 1]} : vector<8x256xf32> to vector<8x128xf32>
    %428 = vector.extract_strided_slice %417 {offsets = [0, 256], sizes = [8, 128], strides = [1, 1]} : vector<8x512xf32> to vector<8x128xf32>
    %c0_246 = arith.constant 0 : index
    %c0_247 = arith.constant 0 : index
    %429 = vector.load %arg5[%c0_246, %c0_247] : memref<8x128xf32, #tpu.memory_space<vmem>>, vector<8x128xf32>
    %430 = arith.addf %428, %429 : vector<8x128xf32>
    %431 = vector.extract_strided_slice %417 {offsets = [0, 384], sizes = [8, 128], strides = [1, 1]} : vector<8x512xf32> to vector<8x128xf32>
    %c0_248 = arith.constant 0 : index
    %c0_249 = arith.constant 0 : index
    %432 = vector.load %arg6[%c0_248, %c0_249] : memref<8x128xf32, #tpu.memory_space<vmem>>, vector<8x128xf32>
    %433 = arith.addf %431, %432 : vector<8x128xf32>
    %434 = arith.mulf %426, %433 : vector<8x128xf32>
    %435 = arith.addf %430, %434 : vector<8x128xf32>
    %436 = math.tanh %435 : vector<8x128xf32>
    %cst_250 = arith.constant 1.000000e+00 : f32
    %437 = vector.broadcast %cst_250 : f32 to vector<8x128xf32>
    %438 = arith.subf %437, %427 : vector<8x128xf32>
    %439 = arith.mulf %438, %436 : vector<8x128xf32>
    %440 = arith.mulf %427, %404 : vector<8x128xf32>
    %441 = arith.addf %439, %440 : vector<8x128xf32>
    %442 = arith.truncf %441 : vector<8x128xf32> to vector<8x128xbf16>
    %c0_251 = arith.constant 0 : index
    %c128_252 = arith.constant 128 : index
    %443 = vector.load %arg11[%c0_251, %c128_252] : memref<8x256xbf16, #tpu.memory_space<vmem>>, vector<8x128xbf16>
    tpu.vector_store %arg11[%c0_251, %c128_252], %442 {strides = array<i32>} : memref<8x256xbf16, #tpu.memory_space<vmem>>, vector<8x128xbf16>,
    %c8_i32_253 = arith.constant 8 : i32
    %444 = arith.muli %c11_i32, %c8_i32_253 : i32
    %445 = tpu.assume_multiple %444, 8 : i32
    %446 = arith.index_cast %445 : i32 to index
    %c0_254 = arith.constant 0 : index
    %447 = vector.load %arg12[%446, %c0_254] : memref<128x128xf32, #tpu.memory_space<vmem>>, vector<8x128xf32>
    tpu.vector_store %arg12[%446, %c0_254], %441 {strides = array<i32>} : memref<128x128xf32, #tpu.memory_space<vmem>>, vector<8x128xf32>,
    %c12_i32 = arith.constant 12 : i32
    %448 = arith.index_cast %c12_i32 : i32 to index
    %c0_255 = arith.constant 0 : index
    %c0_256 = arith.constant 0 : index
    %449 = vector.load %arg1[%448, %c0_255, %c0_256] : memref<16x8x128xbf16, #tpu.memory_space<vmem>>, vector<1x8x128xbf16>
    %450 = vector.shape_cast %449 : vector<1x8x128xbf16> to vector<8x128xbf16>
    %c0_257 = arith.constant 0 : index
    %c0_258 = arith.constant 0 : index
    %451 = vector.load %arg11[%c0_257, %c0_258] : memref<8x256xbf16, #tpu.memory_space<vmem>>, vector<8x128xbf16>
    tpu.vector_store %arg11[%c0_257, %c0_258], %450 {strides = array<i32>} : memref<8x256xbf16, #tpu.memory_space<vmem>>, vector<8x128xbf16>,
    %c0_259 = arith.constant 0 : index
    %c0_260 = arith.constant 0 : index
    %452 = vector.load %arg11[%c0_259, %c0_260] : memref<8x256xbf16, #tpu.memory_space<vmem>>, vector<8x256xbf16>
    %c0_261 = arith.constant 0 : index
    %c0_262 = arith.constant 0 : index
    %453 = vector.load %arg3[%c0_261, %c0_262] : memref<256x512xbf16, #tpu.memory_space<vmem>>, vector<256x512xbf16>
    %cst_263 = arith.constant dense<0.000000e+00> : vector<8x512xf32>
    %454 = tpu.matmul %452, %453, %cst_263 {dimension_numbers = #tpu.dot_dimension_numbers<[1], [0], [0], [1], [0, 0, 1, 1], [], []>} : vector<8x256xbf16>, vector<256x512xbf16>, vector<8x512xf32> -> vector<8x512xf32>
    %455 = vector.extract_strided_slice %454 {offsets = [0, 0], sizes = [8, 256], strides = [1, 1]} : vector<8x512xf32> to vector<8x256xf32>
    %c0_264 = arith.constant 0 : index
    %c0_265 = arith.constant 0 : index
    %456 = vector.load %arg4[%c0_264, %c0_265] : memref<8x256xf32, #tpu.memory_space<vmem>>, vector<8x256xf32>
    %457 = arith.addf %455, %456 : vector<8x256xf32>
    %458 = arith.negf %457 : vector<8x256xf32>
    %459 = math.exp %458 : vector<8x256xf32>
    %cst_266 = arith.constant 1.000000e+00 : f32
    %460 = vector.broadcast %cst_266 : f32 to vector<8x256xf32>
    %461 = arith.addf %460, %459 : vector<8x256xf32>
    %462 = arith.divf %460, %461 : vector<8x256xf32>
    %463 = vector.extract_strided_slice %462 {offsets = [0, 0], sizes = [8, 128], strides = [1, 1]} : vector<8x256xf32> to vector<8x128xf32>
    %464 = vector.extract_strided_slice %462 {offsets = [0, 128], sizes = [8, 128], strides = [1, 1]} : vector<8x256xf32> to vector<8x128xf32>
    %465 = vector.extract_strided_slice %454 {offsets = [0, 256], sizes = [8, 128], strides = [1, 1]} : vector<8x512xf32> to vector<8x128xf32>
    %c0_267 = arith.constant 0 : index
    %c0_268 = arith.constant 0 : index
    %466 = vector.load %arg5[%c0_267, %c0_268] : memref<8x128xf32, #tpu.memory_space<vmem>>, vector<8x128xf32>
    %467 = arith.addf %465, %466 : vector<8x128xf32>
    %468 = vector.extract_strided_slice %454 {offsets = [0, 384], sizes = [8, 128], strides = [1, 1]} : vector<8x512xf32> to vector<8x128xf32>
    %c0_269 = arith.constant 0 : index
    %c0_270 = arith.constant 0 : index
    %469 = vector.load %arg6[%c0_269, %c0_270] : memref<8x128xf32, #tpu.memory_space<vmem>>, vector<8x128xf32>
    %470 = arith.addf %468, %469 : vector<8x128xf32>
    %471 = arith.mulf %463, %470 : vector<8x128xf32>
    %472 = arith.addf %467, %471 : vector<8x128xf32>
    %473 = math.tanh %472 : vector<8x128xf32>
    %cst_271 = arith.constant 1.000000e+00 : f32
    %474 = vector.broadcast %cst_271 : f32 to vector<8x128xf32>
    %475 = arith.subf %474, %464 : vector<8x128xf32>
    %476 = arith.mulf %475, %473 : vector<8x128xf32>
    %477 = arith.mulf %464, %441 : vector<8x128xf32>
    %478 = arith.addf %476, %477 : vector<8x128xf32>
    %479 = arith.truncf %478 : vector<8x128xf32> to vector<8x128xbf16>
    %c0_272 = arith.constant 0 : index
    %c128_273 = arith.constant 128 : index
    %480 = vector.load %arg11[%c0_272, %c128_273] : memref<8x256xbf16, #tpu.memory_space<vmem>>, vector<8x128xbf16>
    tpu.vector_store %arg11[%c0_272, %c128_273], %479 {strides = array<i32>} : memref<8x256xbf16, #tpu.memory_space<vmem>>, vector<8x128xbf16>,
    %c8_i32_274 = arith.constant 8 : i32
    %481 = arith.muli %c12_i32, %c8_i32_274 : i32
    %482 = tpu.assume_multiple %481, 8 : i32
    %483 = arith.index_cast %482 : i32 to index
    %c0_275 = arith.constant 0 : index
    %484 = vector.load %arg12[%483, %c0_275] : memref<128x128xf32, #tpu.memory_space<vmem>>, vector<8x128xf32>
    tpu.vector_store %arg12[%483, %c0_275], %478 {strides = array<i32>} : memref<128x128xf32, #tpu.memory_space<vmem>>, vector<8x128xf32>,
    %c13_i32 = arith.constant 13 : i32
    %485 = arith.index_cast %c13_i32 : i32 to index
    %c0_276 = arith.constant 0 : index
    %c0_277 = arith.constant 0 : index
    %486 = vector.load %arg1[%485, %c0_276, %c0_277] : memref<16x8x128xbf16, #tpu.memory_space<vmem>>, vector<1x8x128xbf16>
    %487 = vector.shape_cast %486 : vector<1x8x128xbf16> to vector<8x128xbf16>
    %c0_278 = arith.constant 0 : index
    %c0_279 = arith.constant 0 : index
    %488 = vector.load %arg11[%c0_278, %c0_279] : memref<8x256xbf16, #tpu.memory_space<vmem>>, vector<8x128xbf16>
    tpu.vector_store %arg11[%c0_278, %c0_279], %487 {strides = array<i32>} : memref<8x256xbf16, #tpu.memory_space<vmem>>, vector<8x128xbf16>,
    %c0_280 = arith.constant 0 : index
    %c0_281 = arith.constant 0 : index
    %489 = vector.load %arg11[%c0_280, %c0_281] : memref<8x256xbf16, #tpu.memory_space<vmem>>, vector<8x256xbf16>
    %c0_282 = arith.constant 0 : index
    %c0_283 = arith.constant 0 : index
    %490 = vector.load %arg3[%c0_282, %c0_283] : memref<256x512xbf16, #tpu.memory_space<vmem>>, vector<256x512xbf16>
    %cst_284 = arith.constant dense<0.000000e+00> : vector<8x512xf32>
    %491 = tpu.matmul %489, %490, %cst_284 {dimension_numbers = #tpu.dot_dimension_numbers<[1], [0], [0], [1], [0, 0, 1, 1], [], []>} : vector<8x256xbf16>, vector<256x512xbf16>, vector<8x512xf32> -> vector<8x512xf32>
    %492 = vector.extract_strided_slice %491 {offsets = [0, 0], sizes = [8, 256], strides = [1, 1]} : vector<8x512xf32> to vector<8x256xf32>
    %c0_285 = arith.constant 0 : index
    %c0_286 = arith.constant 0 : index
    %493 = vector.load %arg4[%c0_285, %c0_286] : memref<8x256xf32, #tpu.memory_space<vmem>>, vector<8x256xf32>
    %494 = arith.addf %492, %493 : vector<8x256xf32>
    %495 = arith.negf %494 : vector<8x256xf32>
    %496 = math.exp %495 : vector<8x256xf32>
    %cst_287 = arith.constant 1.000000e+00 : f32
    %497 = vector.broadcast %cst_287 : f32 to vector<8x256xf32>
    %498 = arith.addf %497, %496 : vector<8x256xf32>
    %499 = arith.divf %497, %498 : vector<8x256xf32>
    %500 = vector.extract_strided_slice %499 {offsets = [0, 0], sizes = [8, 128], strides = [1, 1]} : vector<8x256xf32> to vector<8x128xf32>
    %501 = vector.extract_strided_slice %499 {offsets = [0, 128], sizes = [8, 128], strides = [1, 1]} : vector<8x256xf32> to vector<8x128xf32>
    %502 = vector.extract_strided_slice %491 {offsets = [0, 256], sizes = [8, 128], strides = [1, 1]} : vector<8x512xf32> to vector<8x128xf32>
    %c0_288 = arith.constant 0 : index
    %c0_289 = arith.constant 0 : index
    %503 = vector.load %arg5[%c0_288, %c0_289] : memref<8x128xf32, #tpu.memory_space<vmem>>, vector<8x128xf32>
    %504 = arith.addf %502, %503 : vector<8x128xf32>
    %505 = vector.extract_strided_slice %491 {offsets = [0, 384], sizes = [8, 128], strides = [1, 1]} : vector<8x512xf32> to vector<8x128xf32>
    %c0_290 = arith.constant 0 : index
    %c0_291 = arith.constant 0 : index
    %506 = vector.load %arg6[%c0_290, %c0_291] : memref<8x128xf32, #tpu.memory_space<vmem>>, vector<8x128xf32>
    %507 = arith.addf %505, %506 : vector<8x128xf32>
    %508 = arith.mulf %500, %507 : vector<8x128xf32>
    %509 = arith.addf %504, %508 : vector<8x128xf32>
    %510 = math.tanh %509 : vector<8x128xf32>
    %cst_292 = arith.constant 1.000000e+00 : f32
    %511 = vector.broadcast %cst_292 : f32 to vector<8x128xf32>
    %512 = arith.subf %511, %501 : vector<8x128xf32>
    %513 = arith.mulf %512, %510 : vector<8x128xf32>
    %514 = arith.mulf %501, %478 : vector<8x128xf32>
    %515 = arith.addf %513, %514 : vector<8x128xf32>
    %516 = arith.truncf %515 : vector<8x128xf32> to vector<8x128xbf16>
    %c0_293 = arith.constant 0 : index
    %c128_294 = arith.constant 128 : index
    %517 = vector.load %arg11[%c0_293, %c128_294] : memref<8x256xbf16, #tpu.memory_space<vmem>>, vector<8x128xbf16>
    tpu.vector_store %arg11[%c0_293, %c128_294], %516 {strides = array<i32>} : memref<8x256xbf16, #tpu.memory_space<vmem>>, vector<8x128xbf16>,
    %c8_i32_295 = arith.constant 8 : i32
    %518 = arith.muli %c13_i32, %c8_i32_295 : i32
    %519 = tpu.assume_multiple %518, 8 : i32
    %520 = arith.index_cast %519 : i32 to index
    %c0_296 = arith.constant 0 : index
    %521 = vector.load %arg12[%520, %c0_296] : memref<128x128xf32, #tpu.memory_space<vmem>>, vector<8x128xf32>
    tpu.vector_store %arg12[%520, %c0_296], %515 {strides = array<i32>} : memref<128x128xf32, #tpu.memory_space<vmem>>, vector<8x128xf32>,
    %c14_i32 = arith.constant 14 : i32
    %522 = arith.index_cast %c14_i32 : i32 to index
    %c0_297 = arith.constant 0 : index
    %c0_298 = arith.constant 0 : index
    %523 = vector.load %arg1[%522, %c0_297, %c0_298] : memref<16x8x128xbf16, #tpu.memory_space<vmem>>, vector<1x8x128xbf16>
    %524 = vector.shape_cast %523 : vector<1x8x128xbf16> to vector<8x128xbf16>
    %c0_299 = arith.constant 0 : index
    %c0_300 = arith.constant 0 : index
    %525 = vector.load %arg11[%c0_299, %c0_300] : memref<8x256xbf16, #tpu.memory_space<vmem>>, vector<8x128xbf16>
    tpu.vector_store %arg11[%c0_299, %c0_300], %524 {strides = array<i32>} : memref<8x256xbf16, #tpu.memory_space<vmem>>, vector<8x128xbf16>,
    %c0_301 = arith.constant 0 : index
    %c0_302 = arith.constant 0 : index
    %526 = vector.load %arg11[%c0_301, %c0_302] : memref<8x256xbf16, #tpu.memory_space<vmem>>, vector<8x256xbf16>
    %c0_303 = arith.constant 0 : index
    %c0_304 = arith.constant 0 : index
    %527 = vector.load %arg3[%c0_303, %c0_304] : memref<256x512xbf16, #tpu.memory_space<vmem>>, vector<256x512xbf16>
    %cst_305 = arith.constant dense<0.000000e+00> : vector<8x512xf32>
    %528 = tpu.matmul %526, %527, %cst_305 {dimension_numbers = #tpu.dot_dimension_numbers<[1], [0], [0], [1], [0, 0, 1, 1], [], []>} : vector<8x256xbf16>, vector<256x512xbf16>, vector<8x512xf32> -> vector<8x512xf32>
    %529 = vector.extract_strided_slice %528 {offsets = [0, 0], sizes = [8, 256], strides = [1, 1]} : vector<8x512xf32> to vector<8x256xf32>
    %c0_306 = arith.constant 0 : index
    %c0_307 = arith.constant 0 : index
    %530 = vector.load %arg4[%c0_306, %c0_307] : memref<8x256xf32, #tpu.memory_space<vmem>>, vector<8x256xf32>
    %531 = arith.addf %529, %530 : vector<8x256xf32>
    %532 = arith.negf %531 : vector<8x256xf32>
    %533 = math.exp %532 : vector<8x256xf32>
    %cst_308 = arith.constant 1.000000e+00 : f32
    %534 = vector.broadcast %cst_308 : f32 to vector<8x256xf32>
    %535 = arith.addf %534, %533 : vector<8x256xf32>
    %536 = arith.divf %534, %535 : vector<8x256xf32>
    %537 = vector.extract_strided_slice %536 {offsets = [0, 0], sizes = [8, 128], strides = [1, 1]} : vector<8x256xf32> to vector<8x128xf32>
    %538 = vector.extract_strided_slice %536 {offsets = [0, 128], sizes = [8, 128], strides = [1, 1]} : vector<8x256xf32> to vector<8x128xf32>
    %539 = vector.extract_strided_slice %528 {offsets = [0, 256], sizes = [8, 128], strides = [1, 1]} : vector<8x512xf32> to vector<8x128xf32>
    %c0_309 = arith.constant 0 : index
    %c0_310 = arith.constant 0 : index
    %540 = vector.load %arg5[%c0_309, %c0_310] : memref<8x128xf32, #tpu.memory_space<vmem>>, vector<8x128xf32>
    %541 = arith.addf %539, %540 : vector<8x128xf32>
    %542 = vector.extract_strided_slice %528 {offsets = [0, 384], sizes = [8, 128], strides = [1, 1]} : vector<8x512xf32> to vector<8x128xf32>
    %c0_311 = arith.constant 0 : index
    %c0_312 = arith.constant 0 : index
    %543 = vector.load %arg6[%c0_311, %c0_312] : memref<8x128xf32, #tpu.memory_space<vmem>>, vector<8x128xf32>
    %544 = arith.addf %542, %543 : vector<8x128xf32>
    %545 = arith.mulf %537, %544 : vector<8x128xf32>
    %546 = arith.addf %541, %545 : vector<8x128xf32>
    %547 = math.tanh %546 : vector<8x128xf32>
    %cst_313 = arith.constant 1.000000e+00 : f32
    %548 = vector.broadcast %cst_313 : f32 to vector<8x128xf32>
    %549 = arith.subf %548, %538 : vector<8x128xf32>
    %550 = arith.mulf %549, %547 : vector<8x128xf32>
    %551 = arith.mulf %538, %515 : vector<8x128xf32>
    %552 = arith.addf %550, %551 : vector<8x128xf32>
    %553 = arith.truncf %552 : vector<8x128xf32> to vector<8x128xbf16>
    %c0_314 = arith.constant 0 : index
    %c128_315 = arith.constant 128 : index
    %554 = vector.load %arg11[%c0_314, %c128_315] : memref<8x256xbf16, #tpu.memory_space<vmem>>, vector<8x128xbf16>
    tpu.vector_store %arg11[%c0_314, %c128_315], %553 {strides = array<i32>} : memref<8x256xbf16, #tpu.memory_space<vmem>>, vector<8x128xbf16>,
    %c8_i32_316 = arith.constant 8 : i32
    %555 = arith.muli %c14_i32, %c8_i32_316 : i32
    %556 = tpu.assume_multiple %555, 8 : i32
    %557 = arith.index_cast %556 : i32 to index
    %c0_317 = arith.constant 0 : index
    %558 = vector.load %arg12[%557, %c0_317] : memref<128x128xf32, #tpu.memory_space<vmem>>, vector<8x128xf32>
    tpu.vector_store %arg12[%557, %c0_317], %552 {strides = array<i32>} : memref<128x128xf32, #tpu.memory_space<vmem>>, vector<8x128xf32>,
    %c15_i32 = arith.constant 15 : i32
    %559 = arith.index_cast %c15_i32 : i32 to index
    %c0_318 = arith.constant 0 : index
    %c0_319 = arith.constant 0 : index
    %560 = vector.load %arg1[%559, %c0_318, %c0_319] : memref<16x8x128xbf16, #tpu.memory_space<vmem>>, vector<1x8x128xbf16>
    %561 = vector.shape_cast %560 : vector<1x8x128xbf16> to vector<8x128xbf16>
    %c0_320 = arith.constant 0 : index
    %c0_321 = arith.constant 0 : index
    %562 = vector.load %arg11[%c0_320, %c0_321] : memref<8x256xbf16, #tpu.memory_space<vmem>>, vector<8x128xbf16>
    tpu.vector_store %arg11[%c0_320, %c0_321], %561 {strides = array<i32>} : memref<8x256xbf16, #tpu.memory_space<vmem>>, vector<8x128xbf16>,
    %c0_322 = arith.constant 0 : index
    %c0_323 = arith.constant 0 : index
    %563 = vector.load %arg11[%c0_322, %c0_323] : memref<8x256xbf16, #tpu.memory_space<vmem>>, vector<8x256xbf16>
    %c0_324 = arith.constant 0 : index
    %c0_325 = arith.constant 0 : index
    %564 = vector.load %arg3[%c0_324, %c0_325] : memref<256x512xbf16, #tpu.memory_space<vmem>>, vector<256x512xbf16>
    %cst_326 = arith.constant dense<0.000000e+00> : vector<8x512xf32>
    %565 = tpu.matmul %563, %564, %cst_326 {dimension_numbers = #tpu.dot_dimension_numbers<[1], [0], [0], [1], [0, 0, 1, 1], [], []>} : vector<8x256xbf16>, vector<256x512xbf16>, vector<8x512xf32> -> vector<8x512xf32>
    %566 = vector.extract_strided_slice %565 {offsets = [0, 0], sizes = [8, 256], strides = [1, 1]} : vector<8x512xf32> to vector<8x256xf32>
    %c0_327 = arith.constant 0 : index
    %c0_328 = arith.constant 0 : index
    %567 = vector.load %arg4[%c0_327, %c0_328] : memref<8x256xf32, #tpu.memory_space<vmem>>, vector<8x256xf32>
    %568 = arith.addf %566, %567 : vector<8x256xf32>
    %569 = arith.negf %568 : vector<8x256xf32>
    %570 = math.exp %569 : vector<8x256xf32>
    %cst_329 = arith.constant 1.000000e+00 : f32
    %571 = vector.broadcast %cst_329 : f32 to vector<8x256xf32>
    %572 = arith.addf %571, %570 : vector<8x256xf32>
    %573 = arith.divf %571, %572 : vector<8x256xf32>
    %574 = vector.extract_strided_slice %573 {offsets = [0, 0], sizes = [8, 128], strides = [1, 1]} : vector<8x256xf32> to vector<8x128xf32>
    %575 = vector.extract_strided_slice %573 {offsets = [0, 128], sizes = [8, 128], strides = [1, 1]} : vector<8x256xf32> to vector<8x128xf32>
    %576 = vector.extract_strided_slice %565 {offsets = [0, 256], sizes = [8, 128], strides = [1, 1]} : vector<8x512xf32> to vector<8x128xf32>
    %c0_330 = arith.constant 0 : index
    %c0_331 = arith.constant 0 : index
    %577 = vector.load %arg5[%c0_330, %c0_331] : memref<8x128xf32, #tpu.memory_space<vmem>>, vector<8x128xf32>
    %578 = arith.addf %576, %577 : vector<8x128xf32>
    %579 = vector.extract_strided_slice %565 {offsets = [0, 384], sizes = [8, 128], strides = [1, 1]} : vector<8x512xf32> to vector<8x128xf32>
    %c0_332 = arith.constant 0 : index
    %c0_333 = arith.constant 0 : index
    %580 = vector.load %arg6[%c0_332, %c0_333] : memref<8x128xf32, #tpu.memory_space<vmem>>, vector<8x128xf32>
    %581 = arith.addf %579, %580 : vector<8x128xf32>
    %582 = arith.mulf %574, %581 : vector<8x128xf32>
    %583 = arith.addf %578, %582 : vector<8x128xf32>
    %584 = math.tanh %583 : vector<8x128xf32>
    %cst_334 = arith.constant 1.000000e+00 : f32
    %585 = vector.broadcast %cst_334 : f32 to vector<8x128xf32>
    %586 = arith.subf %585, %575 : vector<8x128xf32>
    %587 = arith.mulf %586, %584 : vector<8x128xf32>
    %588 = arith.mulf %575, %552 : vector<8x128xf32>
    %589 = arith.addf %587, %588 : vector<8x128xf32>
    %590 = arith.truncf %589 : vector<8x128xf32> to vector<8x128xbf16>
    %c0_335 = arith.constant 0 : index
    %c128_336 = arith.constant 128 : index
    %591 = vector.load %arg11[%c0_335, %c128_336] : memref<8x256xbf16, #tpu.memory_space<vmem>>, vector<8x128xbf16>
    tpu.vector_store %arg11[%c0_335, %c128_336], %590 {strides = array<i32>} : memref<8x256xbf16, #tpu.memory_space<vmem>>, vector<8x128xbf16>,
    %c8_i32_337 = arith.constant 8 : i32
    %592 = arith.muli %c15_i32, %c8_i32_337 : i32
    %593 = tpu.assume_multiple %592, 8 : i32
    %594 = arith.index_cast %593 : i32 to index
    %c0_338 = arith.constant 0 : index
    %595 = vector.load %arg12[%594, %c0_338] : memref<128x128xf32, #tpu.memory_space<vmem>>, vector<8x128xf32>
    tpu.vector_store %arg12[%594, %c0_338], %589 {strides = array<i32>} : memref<128x128xf32, #tpu.memory_space<vmem>>, vector<8x128xf32>,
    %c16_i32 = arith.constant 16 : i32
    %c0_339 = arith.constant 0 : index
    %c0_340 = arith.constant 0 : index
    %596 = vector.load %arg10[%c0_339, %c0_340] : memref<8x128xf32, #tpu.memory_space<vmem>>, vector<8x128xf32>
    tpu.vector_store %arg10[%c0_339, %c0_340], %589 {strides = array<i32>} : memref<8x128xf32, #tpu.memory_space<vmem>>, vector<8x128xf32>,
    %c0_341 = arith.constant 0 : index
    %c0_342 = arith.constant 0 : index
    %597 = vector.load %arg12[%c0_341, %c0_342] : memref<128x128xf32, #tpu.memory_space<vmem>>, vector<128x128xf32>
    %598 = arith.truncf %597 : vector<128x128xf32> to vector<128x128xbf16>
    %c0_343 = arith.constant 0 : index
    %c0_344 = arith.constant 0 : index
    %599 = vector.load %arg7[%c0_343, %c0_344] : memref<128x128xbf16, #tpu.memory_space<vmem>>, vector<128x128xbf16>
    %cst_345 = arith.constant dense<0.000000e+00> : vector<128x128xf32>
    %600 = tpu.matmul %598, %599, %cst_345 {dimension_numbers = #tpu.dot_dimension_numbers<[1], [0], [0], [1], [0, 0, 1, 1], [], []>} : vector<128x128xbf16>, vector<128x128xbf16>, vector<128x128xf32> -> vector<128x128xf32>
    %c0_346 = arith.constant 0 : index
    %c0_347 = arith.constant 0 : index
    %601 = vector.load %arg8[%c0_346, %c0_347] : memref<1x128xf32, #tpu.memory_space<vmem>>, vector<1x128xf32>
    %602 = vector.broadcast %601 : vector<1x128xf32> to vector<128x128xf32>
    %603 = arith.addf %600, %602 : vector<128x128xf32>
    %c0_348 = arith.constant 0 : index
    %c0_349 = arith.constant 0 : index
    %604 = vector.load %arg9[%c0_348, %c0_349] : memref<128x128xf32, #tpu.memory_space<vmem>>, vector<128x128xf32>
    tpu.vector_store %arg9[%c0_348, %c0_349], %603 {strides = array<i32>} : memref<128x128xf32, #tpu.memory_space<vmem>>, vector<128x128xf32>,
    return
  }
  func.func @transform_0(%arg0: i32) -> (i32, i32, i32) {
    %c0_i32 = arith.constant 0 : i32
    %c0_i32_0 = arith.constant 0 : i32
    %c0_i32_1 = arith.constant 0 : i32
    %c0_i32_2 = arith.constant 0 : i32
    return %c0_i32, %c0_i32_0, %c0_i32_1 : i32, i32, i32
  }
  func.func @transform_1(%arg0: i32) -> (i32, i32) {
    %c0_i32 = arith.constant 0 : i32
    %c0_i32_0 = arith.constant 0 : i32
    %c0_i32_1 = arith.constant 0 : i32
    return %c0_i32, %c0_i32_0 : i32, i32
  }
  func.func @transform_2(%arg0: i32) -> (i32, i32) {
    %c0_i32 = arith.constant 0 : i32
    %c0_i32_0 = arith.constant 0 : i32
    %c0_i32_1 = arith.constant 0 : i32
    return %c0_i32, %c0_i32_0 : i32, i32
  }
  func.func @transform_3(%arg0: i32) -> (i32, i32) {
    %c0_i32 = arith.constant 0 : i32
    %c0_i32_0 = arith.constant 0 : i32
    %c0_i32_1 = arith.constant 0 : i32
    return %c0_i32, %c0_i32_0 : i32, i32
  }
  func.func @transform_4(%arg0: i32) -> (i32, i32) {
    %c0_i32 = arith.constant 0 : i32
    %c0_i32_0 = arith.constant 0 : i32
    %c0_i32_1 = arith.constant 0 : i32
    return %c0_i32, %c0_i32_0 : i32, i32
  }
  func.func @transform_5(%arg0: i32) -> (i32, i32) {
    %c0_i32 = arith.constant 0 : i32
    %c0_i32_0 = arith.constant 0 : i32
    %c0_i32_1 = arith.constant 0 : i32
    return %c0_i32, %c0_i32_0 : i32, i32
  }
  func.func @transform_6(%arg0: i32) -> (i32, i32) {
    %c0_i32 = arith.constant 0 : i32
    %c0_i32_0 = arith.constant 0 : i32
    %c0_i32_1 = arith.constant 0 : i32
    return %c0_i32, %c0_i32_0 : i32, i32
  }
  func.func @transform_7(%arg0: i32) -> (i32, i32) {
    %c0_i32 = arith.constant 0 : i32
    %c0_i32_0 = arith.constant 0 : i32
    %c0_i32_1 = arith.constant 0 : i32
    return %c0_i32, %c0_i32_0 : i32, i32
  }
  func.func @transform_8(%arg0: i32) -> (i32, i32) {
    %c0_i32 = arith.constant 0 : i32
    %c0_i32_0 = arith.constant 0 : i32
    %c0_i32_1 = arith.constant 0 : i32
    return %c0_i32, %c0_i32_0 : i32, i32
  }
  func.func @transform_9(%arg0: i32) -> (i32, i32) {
    %c0_i32 = arith.constant 0 : i32
    %c0_i32_0 = arith.constant 0 : i32
    %c0_i32_1 = arith.constant 0 : i32
    return %c0_i32, %c0_i32_0 : i32, i32
  }
}

</mosaic_0001>

<bundles_post_ra>
// kernel: tpu_custom_call.1
= control target key start
LH: loop header
LB: loop body
LE: loop exit
PB: predicated region body
PF: predicated region fallthrough
CT: control target
= control target key end

     0   :  { %15 = vsyncpa [#allocation5], 0  ;;  %s12530_s0 = inlined_call_operand.hbm [shape: bf16[16,8,128], index: 0, kind: input, shape index: {}]   ;;  %s12531_s1 = inlined_call_operand.hbm [shape: f32[8,128], index: 1, kind: input, shape index: {}]   ;;  %s12532_s2 = inlined_call_operand.hbm [shape: bf16[256,512], index: 2, kind: input, shape index: {}]   ;;  %s12533_s3 = inlined_call_operand.hbm [shape: f32[8,256], index: 3, kind: input, shape index: {}]   ;;  %s12534_s4 = inlined_call_operand.hbm [shape: f32[8,128], index: 4, kind: input, shape index: {}]   ;;  %s12535_s5 = inlined_call_operand.vmem [shape: f32[8,128], index: 5, kind: input, shape index: {}]   ;;  %s12536_s6 = inlined_call_operand.hbm [shape: bf16[128,128], index: 6, kind: input, shape index: {}]   ;;  %s12537_s7 = inlined_call_operand.vmem [shape: f32[1,128], index: 7, kind: input, shape index: {}]   ;;  %s12538_s8 = inlined_call_operand.hbm [shape: f32[128,128], index: 8, kind: output, shape index: {0}]   ;;  %s12539_s9 = inlined_call_operand.hbm [shape: f32[8,128], index: 9, kind: output, shape index: {1}]  }
   0x1   :  { %16 = vsyncpa [#allocation8], 0 }
   0x2   :  { %17 = vsyncpa [#allocation11], 0 }
   0x3   :  { %18 = vsyncpa [#allocation14], 0 }
   0x4   :  { %19 = vsyncpa [#allocation6], 0 }
   0x5   :  { %20 = vsyncpa [#allocation17], 0  ;;  %s10659_s30 = smov [#allocation7]   ;;  %s10660_s11 = smov [#allocation10]  }
   0x6   :  { %s39_s10 = sshll.u32 %s10659_s30, 4  ;;  %s61_s12 = sshll.u32 %s10660_s11, 4  ;;  %s40_s10 = int_to_ptr.vmem [resolvable:$true] %s39_s10  ;;  %s62_s12 = int_to_ptr.vmem [resolvable:$true] %s61_s12 }
   0x7   :  { %s10495_s13 = scalar_lea.vmem %s40_s10, 128  ;;  %p10500_p1 = scmp.lt.s32.totalorder %s40_s10, %s40_s10 }
   0x8   :  { %p10496_p0 = scmp.ne.s32.totalorder %s40_s10, %s10495_s13  ;;  %p10501_p2 = scmp.lt.s32.totalorder %s10495_s13, %s10495_s13 }
   0xa   :  { %p10502_p3 = por %p10501_p2, %p10500_p1 }
   0xc   :  { %p10503_p4 = pnand %p10502_p3, %p10496_p0 }
   0xe   :  { %10506 = shalt.err (!%p10503_p4)
}
   0xf   :  { %42 = dma.hbm_to_vmem [thread:$0]  %s12531_s1, 128, %s40_s10, [#allocation8]  }
  0x10   :  { %s10515_s16 = scalar_lea.vmem %s62_s12, 256  ;;  %p10520_p6 = scmp.lt.s32.totalorder %s62_s12, %s62_s12 }
  0x11   :  { %p10516_p5 = scmp.ne.s32.totalorder %s62_s12, %s10515_s16  ;;  %p10521_p7 = scmp.lt.s32.totalorder %s10515_s16, %s10515_s16 }
  0x13   :  { %p10522_p8 = por %p10521_p7, %p10520_p6 }
  0x15   :  { %p10523_p9 = pnand %p10522_p8, %p10516_p5 }
  0x17   :  { %10526 = shalt.err (!%p10523_p9)
}
  0x18   :  { %64 = dma.hbm_to_vmem [thread:$0]  %s12533_s3, 256, %s62_s12, [#allocation11]  }
  0x19   :  { %s10661_s19 = smov [#allocation4]  }
  0x1a   :  { %s26_s20 = sshll.u32 %s10661_s19, 4  ;;  %s27_s20 = int_to_ptr.vmem [resolvable:$true] %s26_s20 }
  0x1b   :  { %s10535_s21 = scalar_lea.vmem %s27_s20, 1024  ;;  %p10540_p11 = scmp.lt.s32.totalorder %s27_s20, %s27_s20 }
  0x1c   :  { %p10536_p10 = scmp.ne.s32.totalorder %s27_s20, %s10535_s21  ;;  %p10541_p12 = scmp.lt.s32.totalorder %s10535_s21, %s10535_s21 }
  0x1e   :  { %p10542_p13 = por %p10541_p12, %p10540_p11 }
  0x20   :  { %p10543_p0 = pnand %p10542_p13, %p10536_p10 }
  0x22   :  { %10546 = shalt.err (!%p10543_p0)
}
  0x23   :  { %s10662_s1 = smov 64   ;;  %s10663_s22 = smov 4  }
  0x24   :  { %32 = dma.hbm_to_vmem [thread:$0]  %s12530_s0, 1024, %s27_s20, [#allocation5], %s10662_s1, %s10662_s1, %s10663_s22  }
  0x25   :  { %s10664_s3 = smov [#allocation9]  }
  0x26   :  { %s48_s25 = sshll.u32 %s10664_s3, 4  ;;  %s49_s25 = int_to_ptr.vmem [resolvable:$true] %s48_s25 }
  0x27   :  { %s10555_s26 = scalar_lea.vmem %s49_s25, 8192  ;;  %p10560_p2 = scmp.lt.s32.totalorder %s49_s25, %s49_s25 }
  0x28   :  { %p10556_p1 = scmp.ne.s32.totalorder %s49_s25, %s10555_s26  ;;  %p10561_p3 = scmp.lt.s32.totalorder %s10555_s26, %s10555_s26 }
  0x2a   :  { %p10562_p4 = por %p10561_p3, %p10560_p2 }
  0x2c   :  { %p10563_p5 = pnand %p10562_p4, %p10556_p1 }
  0x2e   :  { %10566 = shalt.err (!%p10563_p5)
}
  0x2f   :  { %s10665_s27 = smov 256   ;;  %s10666_s28 = smov 16  }
  0x30   :  { %54 = dma.hbm_to_vmem [thread:$0]  %s12532_s2, 8192, %s49_s25, [#allocation8], %s10665_s27, %s10665_s27, %s10666_s28  }
  0x31   :  { %s10667_s10 = smov [#allocation12]   ;;  %s10668_s12 = smov [#allocation13]  }
  0x32   :  { %s71_s11 = sshll.u32 %s10667_s10, 4  ;;  %s82_s0 = sshll.u32 %s10668_s12, 4  ;;  %s72_s11 = int_to_ptr.vmem [resolvable:$true] %s71_s11  ;;  %s83_s0 = int_to_ptr.vmem [resolvable:$true] %s82_s0 }
  0x33   :  { %s10575_s13 = scalar_lea.vmem %s72_s11, 128  ;;  %p10580_p7 = scmp.lt.s32.totalorder %s72_s11, %s72_s11 }
  0x34   :  { %p10576_p6 = scmp.ne.s32.totalorder %s72_s11, %s10575_s13  ;;  %p10581_p8 = scmp.lt.s32.totalorder %s10575_s13, %s10575_s13 }
  0x36   :  { %p10582_p9 = por %p10581_p8, %p10580_p7 }
  0x38   :  { %p10583_p10 = pnand %p10582_p9, %p10576_p6 }
  0x3a   :  { %10586 = shalt.err (!%p10583_p10)
}
  0x3b   :  { %74 = dma.hbm_to_vmem [thread:$0]  %s12534_s4, 128, %s72_s11, [#allocation11]  }
  0x3c   :  { %s10595_s16 = scalar_lea.vmem %s83_s0, 1024  ;;  %p10600_p12 = scmp.lt.s32.totalorder %s83_s0, %s83_s0 }
  0x3d   :  { %p10596_p11 = scmp.ne.s32.totalorder %s83_s0, %s10595_s16  ;;  %p10601_p13 = scmp.lt.s32.totalorder %s10595_s16, %s10595_s16 }
  0x3f   :  { %p10602_p0 = por %p10601_p13, %p10600_p12 }
  0x41   :  { %p10603_p1 = pnand %p10602_p0, %p10596_p11 }
  0x43   :  { %10606 = shalt.err (!%p10603_p1)
}
  0x44   :  { %88 = dma.hbm_to_vmem [thread:$0]  %s12536_s6, 1024, %s83_s0, [#allocation14], %s10662_s1, %s10662_s1, %s10663_s22  }
  0x45   :  { %10647 = dma.done.wait [#allocation5], 1024  }
  0x46   :  { %10648 = vsyncadd [#allocation5], 4294966272 }
  0x47   :  { %10649 = dma.done.wait [#allocation8], 8320  }
  0x48   :  { %10650 = vsyncadd [#allocation8], 4294958976 }
  0x49   :  { %10651 = dma.done.wait [#allocation11], 384  }
  0x4a   :  { %10652 = vsyncadd [#allocation11], 4294966912 }
  0x4b   :  { %10653 = dma.done.wait [#allocation14], 1024  }
  0x4c   :  { %10654 = vsyncadd [#allocation14], 4294966272  ;;  %v10747_v0 = vld [vmem:[#allocation9 + $0xe4] ss:$16 sps:$4 sm:$0xff]   ;;  %v10749_v1 = vld [vmem:[#allocation9 + $0xe0] ss:$16 sps:$4 sm:$0xff]  }
  0x4d   :  { %508 = vmatprep.subr.bf16.mxu0 %v10747_v0  ;;  %v10752_v2 = vld [vmem:[#allocation9 + $0xc4] ss:$16 sps:$4 sm:$0xff]   ;;  %v10755_v3 = vld [vmem:[#allocation9 + $0xc0] ss:$16 sps:$4 sm:$0xff]   ;;  %v10766_v7 = vld [vmem:[#allocation9 + $0xec] ss:$16 sps:$4 sm:$0xff]  }
  0x4e   :  { %509 = vmatpush1.bf16.msra.mxu0 %v10749_v1  ;;  %v10758_v4 = vld [vmem:[#allocation9 + $0xa4] ss:$16 sps:$4 sm:$0xff]   ;;  %v10761_v5 = vld [vmem:[#allocation9 + $0xa0] ss:$16 sps:$4 sm:$0xff]   ;;  %v10768_v8 = vld [vmem:[#allocation9 + $0xe8] ss:$16 sps:$4 sm:$0xff]   ;;  %549 = vmatprep.subr.bf16.mxu1 %v10766_v7 }
  0x4f   :  { %510 = vmatprep.subr.bf16.mxu0 %v10752_v2  ;;  %v10764_v6 = vld [vmem:[#allocation9 + $0x84] ss:$16 sps:$4 sm:$0xff]   ;;  %v10771_v9 = vld [vmem:[#allocation9 + $0x80] ss:$16 sps:$4 sm:$0xff]   ;;  %550 = vmatpush1.bf16.msra.mxu1 %v10768_v8  ;;  %v10778_v11 = vld [vmem:[#allocation9 + $0xcc] ss:$16 sps:$4 sm:$0xff]  }
  0x50   :  { %v10775_v10 = vld [vmem:[#allocation9 + $0x64] ss:$16 sps:$4 sm:$0xff]   ;;  %v10780_v12 = vld [vmem:[#allocation9 + $0xc8] ss:$16 sps:$4 sm:$0xff]   ;;  %551 = vmatprep.subr.bf16.mxu1 %v10778_v11  ;;  %v10784_v13 = vld [vmem:[#allocation9 + $0x60] ss:$16 sps:$4 sm:$0xff]  }
  0x51   :  { %v10786_v14 = vld [vmem:[#allocation9 + $0x44] ss:$16 sps:$4 sm:$0xff]   ;;  %v10788_v15 = vld [vmem:[#allocation9 + $0xac] ss:$16 sps:$4 sm:$0xff]   ;;  %v10792_v16 = vld [vmem:[#allocation9 + $0xa8] ss:$16 sps:$4 sm:$0xff]  }
  0x52   :  { %511 = vmatpush1.bf16.msra.mxu0 %v10755_v3  ;;  %v10795_v17 = vld [vmem:[#allocation9 + $0x8c] ss:$16 sps:$4 sm:$0xff]   ;;  %v10798_v18 = vld [vmem:[#allocation9 + $0x40] ss:$16 sps:$4 sm:$0xff]   ;;  %v10801_v19 = vld [vmem:[#allocation9 + $0x24] ss:$16 sps:$4 sm:$0xff]  }
  0x53   :  { %512 = vmatprep.subr.bf16.mxu0 %v10758_v4  ;;  %552 = vmatpush1.bf16.msra.mxu1 %v10780_v12  ;;  %v10804_v20 = vld [vmem:[#allocation9 + $0x88] ss:$16 sps:$4 sm:$0xff]   ;;  %v10807_v21 = vld [vmem:[#allocation9 + $0x6c] ss:$16 sps:$4 sm:$0xff]   ;;  %v10810_v22 = vld [vmem:[#allocation9 + $0x20] ss:$16 sps:$4 sm:$0xff]  }
  0x54   :  { %553 = vmatprep.subr.bf16.mxu1 %v10788_v15  ;;  %v10812_v23 = vld [vmem:[#allocation9 + $0x4] ss:$16 sps:$4 sm:$0xff]   ;;  %v10816_v24 = vld [vmem:[#allocation9 + $0x68] ss:$16 sps:$4 sm:$0xff]   ;;  %v10819_v25 = vld [vmem:[#allocation9 + $0x4c] ss:$16 sps:$4 sm:$0xff]  }
  0x55   :  { %v10822_v26 = vld [vmem:[#allocation9] ss:$16 sps:$4 sm:$0xff]   ;;  %v10825_v27 = vld [vmem:[#allocation9 + $0x1e4] ss:$16 sps:$4 sm:$0xff]   ;;  %v10828_v28 = vld [vmem:[#allocation9 + $0x48] ss:$16 sps:$4 sm:$0xff]  }
  0x56   :  { %513 = vmatpush1.bf16.msra.mxu0 %v10761_v5  ;;  %v10831_v29 = vld [vmem:[#allocation9 + $0x2c] ss:$16 sps:$4 sm:$0xff]   ;;  %v10834_v30 = vld [vmem:[#allocation9 + $0x1e0] ss:$16 sps:$4 sm:$0xff]   ;;  %v10836_v31 = vld [vmem:[#allocation9 + $0x1c4] ss:$16 sps:$4 sm:$0xff]  }
  0x57   :  { %514 = vmatprep.subr.bf16.mxu0 %v10764_v6  ;;  %554 = vmatpush1.bf16.msra.mxu1 %v10792_v16  ;;  %v10840_v32 = vld [vmem:[#allocation9 + $0x28] ss:$16 sps:$4 sm:$0xff]   ;;  %v10843_v33 = vld [vmem:[#allocation9 + $0xc] ss:$16 sps:$4 sm:$0xff]   ;;  %v10845_v34 = vld [vmem:[#allocation9 + $0x1c0] ss:$16 sps:$4 sm:$0xff]  }
  0x58   :  { %555 = vmatprep.subr.bf16.mxu1 %v10795_v17  ;;  %v110_v35 = vld [vmem:[#allocation7] sm:$0xff]  ;;  %v10849_v38 = vld [vmem:[#allocation9 + $0x1a4] ss:$16 sps:$4 sm:$0xff]   ;;  %v10858_v41 = vld [vmem:[#allocation9 + $0x1a0] ss:$16 sps:$4 sm:$0xff]  }
  0x59   :  { %v111_v36 = vpack.c.bf16 %v110_v35, %v110_v35  ;;  %v114_v37 = vld [vmem:[#allocation4] sm:$0xf]  ;;  %v10855_v40 = vld [vmem:[#allocation9 + $0x1ec] ss:$16 sps:$4 sm:$0xff]   ;;  %v10861_v42 = vld [vmem:[#allocation9 + $0x184] ss:$16 sps:$4 sm:$0xff]  }
  0x5a   :  { %515 = vmatpush1.bf16.msra.mxu0 %v10771_v9  ;;  %v10852_v39 = vld [vmem:[#allocation9 + $0x8] ss:$16 sps:$4 sm:$0xff]   ;;  %115 = vst [vmem:[#allocation2] sm:$0xf] %v114_v37  ;;  %v10866_v44 = vld [vmem:[#allocation9 + $0x180] ss:$16 sps:$4 sm:$0xff]  }
  0x5b   :  { %516 = vmatprep.subr.bf16.mxu0 %v10775_v10  ;;  %556 = vmatpush1.bf16.msra.mxu1 %v10804_v20  ;;  %112 = vst [vmem:[#allocation2 + $0x4] sm:$0xf] %v111_v36  ;;  %v10864_v43 = vld [vmem:[#allocation9 + $0x1e8] ss:$16 sps:$4 sm:$0xff]   ;;  %v10869_v45 = vld [vmem:[#allocation9 + $0x1cc] ss:$16 sps:$4 sm:$0xff]  }
  0x5c   :  { %557 = vmatprep.subr.bf16.mxu1 %v10807_v21  ;;  %v10871_v46 = vld [vmem:[#allocation9 + $0x164] ss:$16 sps:$4 sm:$0xff]   ;;  %v10873_v47 = vld [vmem:[#allocation9 + $0x1c8] ss:$16 sps:$4 sm:$0xff]   ;;  %v10876_v48 = vld [vmem:[#allocation9 + $0x1ac] ss:$16 sps:$4 sm:$0xff]  }
  0x5d   :  { %v10880_v50 = vld [vmem:[#allocation9 + $0x160] ss:$16 sps:$4 sm:$0xff]   ;;  %v10883_v52 = vld [vmem:[#allocation9 + $0x144] ss:$16 sps:$4 sm:$0xff]   ;;  %v10885_v53 = vld [vmem:[#allocation9 + $0x1a8] ss:$16 sps:$4 sm:$0xff]  }
  0x5e   :  { %517 = vmatpush1.bf16.msra.mxu0 %v10784_v13  ;;  %v10888_v54 = vld [vmem:[#allocation9 + $0x18c] ss:$16 sps:$4 sm:$0xff]   ;;  %v10892_v55 = vld [vmem:[#allocation9 + $0x140] ss:$16 sps:$4 sm:$0xff]   ;;  %v10895_v56 = vld [vmem:[#allocation9 + $0x124] ss:$16 sps:$4 sm:$0xff]  }
  0x5f   :  { %518 = vmatprep.subr.bf16.mxu0 %v10786_v14  ;;  %558 = vmatpush1.bf16.msra.mxu1 %v10816_v24  ;;  %12746 = vst [vmem:[#allocation24_spill] sm:$0xff] %v10895_v56  ;;  %v10897_v57 = vld [vmem:[#allocation9 + $0x188] ss:$16 sps:$4 sm:$0xff]   ;;  %v10900_v58 = vld [vmem:[#allocation9 + $0x16c] ss:$16 sps:$4 sm:$0xff]  }
  0x60   :  { %559 = vmatprep.subr.bf16.mxu1 %v10819_v25  ;;  %v10904_v59 = vld [vmem:[#allocation9 + $0x120] ss:$16 sps:$4 sm:$0xff]   ;;  %v10907_v60 = vld [vmem:[#allocation9 + $0x104] ss:$16 sps:$4 sm:$0xff]   ;;  %v10909_v61 = vld [vmem:[#allocation9 + $0x168] ss:$16 sps:$4 sm:$0xff]  }
  0x61   :  { %12747 = vst [vmem:[#allocation25_spill] sm:$0xff] %v10904_v59  ;;  %v10912_v62 = vld [vmem:[#allocation9 + $0x14c] ss:$16 sps:$4 sm:$0xff]   ;;  %v10916_v63 = vld [vmem:[#allocation9 + $0x100] ss:$16 sps:$4 sm:$0xff]  }
  0x62   :  { %519 = vmatpush1.bf16.msra.mxu0 %v10798_v18  ;;  %v116_v49 = vld [vmem:[#allocation2] sm:$0xff]  ;;  %v10919_v35 = vld [vmem:[#allocation9 + $0x148] ss:$16 sps:$4 sm:$0xff]   ;;  %v10922_v36 = vld [vmem:[#allocation9 + $0x12c] ss:$16 sps:$4 sm:$0xff]  }
  0x63   :  { %520 = vmatprep.subr.bf16.mxu0 %v10801_v19  ;;  %560 = vmatpush1.bf16.msra.mxu1 %v10828_v28  ;;  %v8484_v51 = vcombine.high %v116_v49, %v116_v49  ;;  %v8483_v37 = vcombine.low %v116_v49, %v116_v49  ;;  %v10442_v49 = vld [vmem:[#allocation9 + $0xc8] ss:$16 sps:$4 sm:$0xff]  }
  0x64   :  { %561 = vmatprep.subr.bf16.mxu1 %v10831_v29 }
  0x65   :  { %540 = vmatprep.mubr.bf16.mxu0 %v8484_v51  ;;  %581 = vmatprep.mubr.bf16.mxu1 %v8484_v51  ;;  %v10927_v51 = vld [vmem:[#allocation9 + $0x128] ss:$16 sps:$4 sm:$0xff]  }
  0x66   :  { %521 = vmatpush1.bf16.msra.mxu0 %v10810_v22 }
  0x67   :  { %522 = vmatprep.subr.bf16.mxu0 %v10812_v23  ;;  %562 = vmatpush1.bf16.msra.mxu1 %v10840_v32 }
  0x68   :  { %563 = vmatprep.subr.bf16.mxu1 %v10843_v33 }
  0x6a   :  { %523 = vmatpush1.bf16.msra.mxu0 %v10822_v26 }
  0x6b   :  { %524 = vmatprep.subr.bf16.mxu0 %v10825_v27  ;;  %564 = vmatpush1.bf16.msra.mxu1 %v10852_v39 }
  0x6c   :  { %565 = vmatprep.subr.bf16.mxu1 %v10855_v40 }
  0x6e   :  { %525 = vmatpush2.bf16.msra.mxu0 %v10834_v30 }
  0x6f   :  { %526 = vmatprep.subr.bf16.mxu0 %v10836_v31  ;;  %566 = vmatpush2.bf16.msra.mxu1 %v10864_v43 }
  0x70   :  { %567 = vmatprep.subr.bf16.mxu1 %v10869_v45 }
  0x72   :  { %527 = vmatpush2.bf16.msra.mxu0 %v10845_v34 }
  0x73   :  { %528 = vmatprep.subr.bf16.mxu0 %v10849_v38  ;;  %568 = vmatpush2.bf16.msra.mxu1 %v10873_v47 }
  0x74   :  { %569 = vmatprep.subr.bf16.mxu1 %v10876_v48 }
  0x76   :  { %529 = vmatpush2.bf16.msra.mxu0 %v10858_v41 }
  0x77   :  { %530 = vmatprep.subr.bf16.mxu0 %v10861_v42  ;;  %570 = vmatpush2.bf16.msra.mxu1 %v10885_v53 }
  0x78   :  { %571 = vmatprep.subr.bf16.mxu1 %v10888_v54 }
  0x7a   :  { %531 = vmatpush2.bf16.msra.mxu0 %v10866_v44 }
  0x7b   :  { %532 = vmatprep.subr.bf16.mxu0 %v10871_v46  ;;  %572 = vmatpush2.bf16.msra.mxu1 %v10897_v57 }
  0x7c   :  { %573 = vmatprep.subr.bf16.mxu1 %v10900_v58 }
  0x7e   :  { %533 = vmatpush2.bf16.msra.mxu0 %v10880_v50 }
  0x7f   :  { %534 = vmatprep.subr.bf16.mxu0 %v10883_v52  ;;  %574 = vmatpush2.bf16.msra.mxu1 %v10909_v61 }
  0x80   :  { %575 = vmatprep.subr.bf16.mxu1 %v10912_v62 }
  0x82   :  { %535 = vmatpush2.bf16.msra.mxu0 %v10892_v55 }
  0x83   :  { %536 = vmatprep.subr.bf16.mxu0 %v10895_v56  ;;  %v10930_v56 = vld [vmem:[#allocation9 + $0x10c] ss:$16 sps:$4 sm:$0xff]   ;;  %576 = vmatpush2.bf16.msra.mxu1 %v10919_v35 }
  0x84   :  { %577 = vmatprep.subr.bf16.mxu1 %v10922_v36 }
  0x86   :  { %537 = vmatpush2.bf16.msra.mxu0 %v10904_v59  ;;  %v10935_v59 = vld [vmem:[#allocation9 + $0x108] ss:$16 sps:$4 sm:$0xff]  }
  0x87   :  { %538 = vmatprep.subr.bf16.mxu0 %v10907_v60  ;;  %578 = vmatpush2.bf16.msra.mxu1 %v10927_v51 }
  0x88   :  { %579 = vmatprep.subr.bf16.mxu1 %v10930_v56 }
  0x8a   :  { %539 = vmatpush2.bf16.msra.mxu0 %v10916_v63 }
  0x8b   :  { %1015 = vmatprep.subr.bf16.mxu0 %v10747_v0  ;;  %580 = vmatpush2.bf16.msra.mxu1 %v10935_v59  ;;  %v12748_v0 = vld [vmem:[#allocation24_spill] sm:$0xff] }
  0x8c   :  { %1056 = vmatprep.subr.bf16.mxu1 %v10766_v7 }
  0x8d   :  { %541 = vmatmul.mubr.bf16.vlgmr.msra.gmra.mxu0 %v8483_v37 }
  0x8e   :  { %1016 = vmatpush1.bf16.msra.mxu0 %v10749_v1  ;;  %582 = vmatmul.mubr.bf16.vlgmr.msra.gmra.mxu1 %v8483_v37  ;;  %v12749_v1 = vld [vmem:[#allocation25_spill] sm:$0xff] }
  0x8f   :  { %1017 = vmatprep.subr.bf16.mxu0 %v10752_v2  ;;  %1057 = vmatpush1.bf16.msra.mxu1 %v10768_v8  ;;  %v10434_v2 = vld [vmem:[#allocation9 + $0xe4] ss:$16 sps:$4 sm:$0xff]   ;;  %v10448_v37 = vld [vmem:[#allocation9 + $0x8c] ss:$16 sps:$4 sm:$0xff]  }
  0x90   :  { %1058 = vmatprep.subr.bf16.mxu1 %v10778_v11 }
  0x92   :  { %1018 = vmatpush1.bf16.msra.mxu0 %v10755_v3  ;;  %v10435_v3 = vld [vmem:[#allocation9 + $0xec] ss:$16 sps:$4 sm:$0xff]  }
  0x93   :  { %1019 = vmatprep.subr.bf16.mxu0 %v10758_v4  ;;  %1059 = vmatpush1.bf16.msra.mxu1 %v10780_v12  ;;  %v621_v4 = vld [vmem:[#allocation4 + $0x4] sm:$0xf] }
  0x94   :  { %1060 = vmatprep.subr.bf16.mxu1 %v10788_v15  ;;  %622 = vst [vmem:[#allocation2] sm:$0xf] %v621_v4  ;;  %v10452_v4 = vld [vmem:[#allocation9 + $0x6c] ss:$16 sps:$4 sm:$0xff]  }
  0x96   :  { %1020 = vmatpush1.bf16.msra.mxu0 %v10761_v5  ;;  %v11003_v5 = vld [vmem:[#allocation10] sm:$0xff] }
  0x97   :  { %1021 = vmatprep.subr.bf16.mxu0 %v10764_v6  ;;  %1061 = vmatpush1.bf16.msra.mxu1 %v10792_v16 }
  0x98   :  { %1062 = vmatprep.subr.bf16.mxu1 %v10795_v17 }
  0x9a   :  { %1022 = vmatpush1.bf16.msra.mxu0 %v10771_v9 }
  0x9b   :  { %1023 = vmatprep.subr.bf16.mxu0 %v10775_v10  ;;  %1063 = vmatpush1.bf16.msra.mxu1 %v10804_v20  ;;  %v11006_v10 = vld [vmem:[#allocation10 + $0x8] sm:$0xff] }
  0x9c   :  { %1064 = vmatprep.subr.bf16.mxu1 %v10807_v21 }
  0x9e   :  { %1024 = vmatpush1.bf16.msra.mxu0 %v10784_v13 }
  0x9f   :  { %1025 = vmatprep.subr.bf16.mxu0 %v10786_v14  ;;  %1065 = vmatpush1.bf16.msra.mxu1 %v10816_v24  ;;  %v11014_v24 = vld [vmem:[#allocation12] sm:$0xff] }
  0xa0   :  { %1066 = vmatprep.subr.bf16.mxu1 %v10819_v25 }
  0xa2   :  { %1026 = vmatpush1.bf16.msra.mxu0 %v10798_v18 }
  0xa3   :  { %1027 = vmatprep.subr.bf16.mxu0 %v10801_v19  ;;  %1067 = vmatpush1.bf16.msra.mxu1 %v10828_v28 }
  0xa4   :  { %1068 = vmatprep.subr.bf16.mxu1 %v10831_v29 }
  0xa6   :  { %1028 = vmatpush1.bf16.msra.mxu0 %v10810_v22  ;;  %v11012_v22 = vld [vmem:[%s12535_s5] sm:$0xff] }
  0xa7   :  { %1029 = vmatprep.subr.bf16.mxu0 %v10812_v23  ;;  %1069 = vmatpush1.bf16.msra.mxu1 %v10840_v32 }
  0xa8   :  { %1070 = vmatprep.subr.bf16.mxu1 %v10843_v33  ;;  %v10436_v33 = vld [vmem:[#allocation7] sm:$0xff] }
  0xaa   :  { %1030 = vmatpush1.bf16.msra.mxu0 %v10822_v26 }
  0xab   :  { %1031 = vmatprep.subr.bf16.mxu0 %v10825_v27  ;;  %1071 = vmatpush1.bf16.msra.mxu1 %v10852_v39 }
  0xac   :  { %1072 = vmatprep.subr.bf16.mxu1 %v10855_v40 }
  0xae   :  { %1032 = vmatpush2.bf16.msra.mxu0 %v10834_v30 }
  0xaf   :  { %1033 = vmatprep.subr.bf16.mxu0 %v10836_v31  ;;  %1073 = vmatpush2.bf16.msra.mxu1 %v10864_v43 }
  0xb0   :  { %1074 = vmatprep.subr.bf16.mxu1 %v10869_v45  ;;  %v10438_v45 = vld [vmem:[#allocation9 + $0xe8] ss:$16 sps:$4 sm:$0xff]  }
  0xb2   :  { %1034 = vmatpush2.bf16.msra.mxu0 %v10845_v34 }
  0xb3   :  { %1035 = vmatprep.subr.bf16.mxu0 %v10849_v38  ;;  %1075 = vmatpush2.bf16.msra.mxu1 %v10873_v47  ;;  %v10440_v47 = vld [vmem:[#allocation9 + $0xcc] ss:$16 sps:$4 sm:$0xff]  }
  0xb4   :  { %1076 = vmatprep.subr.bf16.mxu1 %v10876_v48  ;;  %v10441_v48 = vld [vmem:[#allocation9 + $0xc0] ss:$16 sps:$4 sm:$0xff]  }
  0xb6   :  { %1036 = vmatpush2.bf16.msra.mxu0 %v10858_v41 }
  0xb7   :  { %1037 = vmatprep.subr.bf16.mxu0 %v10861_v42  ;;  %1077 = vmatpush2.bf16.msra.mxu1 %v10885_v53  ;;  %v10445_v53 = vld [vmem:[#allocation9 + $0xa0] ss:$16 sps:$4 sm:$0xff]  }
  0xb8   :  { %1078 = vmatprep.subr.bf16.mxu1 %v10888_v54  ;;  %v10446_v54 = vld [vmem:[#allocation9 + $0xa8] ss:$16 sps:$4 sm:$0xff]  }
  0xba   :  { %1038 = vmatpush2.bf16.msra.mxu0 %v10866_v44  ;;  %v10437_v44 = vld [vmem:[#allocation9 + $0xe0] ss:$16 sps:$4 sm:$0xff]  }
  0xbb   :  { %1039 = vmatprep.subr.bf16.mxu0 %v10871_v46  ;;  %1079 = vmatpush2.bf16.msra.mxu1 %v10897_v57  ;;  %v10439_v46 = vld [vmem:[#allocation9 + $0xc4] ss:$16 sps:$4 sm:$0xff]  }
  0xbc   :  { %1080 = vmatprep.subr.bf16.mxu1 %v10900_v58 }
  0xbe   :  { %1040 = vmatpush2.bf16.msra.mxu0 %v10880_v50  ;;  %v10443_v50 = vld [vmem:[#allocation9 + $0xa4] ss:$16 sps:$4 sm:$0xff]  }
  0xbf   :  { %1041 = vmatprep.subr.bf16.mxu0 %v10883_v52  ;;  %1081 = vmatpush2.bf16.msra.mxu1 %v10909_v61  ;;  %v10444_v52 = vld [vmem:[#allocation9 + $0xac] ss:$16 sps:$4 sm:$0xff]  }
  0xc0   :  { %1082 = vmatprep.subr.bf16.mxu1 %v10912_v62 }
  0xc2   :  { %1042 = vmatpush2.bf16.msra.mxu0 %v10892_v55  ;;  %v10447_v55 = vld [vmem:[#allocation9 + $0x84] ss:$16 sps:$4 sm:$0xff]  }
  0xc3   :  { %1043 = vmatprep.subr.bf16.mxu0 %v12748_v0  ;;  %1083 = vmatpush2.bf16.msra.mxu1 %v10919_v35  ;;  %v10449_v0 = vld [vmem:[#allocation9 + $0x80] ss:$16 sps:$4 sm:$0xff]  }
  0xc4   :  { %1084 = vmatprep.subr.bf16.mxu1 %v10922_v36 }
  0xc6   :  { %1044 = vmatpush2.bf16.msra.mxu0 %v12749_v1 }
  0xc7   :  { %1045 = vmatprep.subr.bf16.mxu0 %v10907_v60  ;;  %1085 = vmatpush2.bf16.msra.mxu1 %v10927_v51 }
  0xc8   :  { %1086 = vmatprep.subr.bf16.mxu1 %v10930_v56 }
  0xca   :  { %1046 = vmatpush2.bf16.msra.mxu0 %v10916_v63 }
  0xcb   :  { %1523 = vmatprep.subr.bf16.mxu0 %v10434_v2  ;;  %1087 = vmatpush2.bf16.msra.mxu1 %v10935_v59  ;;  %v10450_v2 = vld [vmem:[#allocation9 + $0x88] ss:$16 sps:$4 sm:$0xff]  }
  0xcc   :  { %1564 = vmatprep.subr.bf16.mxu1 %v10435_v3  ;;  %v10451_v3 = vld [vmem:[#allocation9 + $0x64] ss:$16 sps:$4 sm:$0xff]  }
 0x14d   :  { %v542_v6 = vpop.f32.mrf.mxu0 }
 0x14e   :  { %v592_v7 = vadd.f32 %v11003_v5, %v542_v6  ;;  %v583_v14 = vpop.f32.mrf.mxu1  ;;  %v10453_v6 = vld [vmem:[#allocation9 + $0x60] ss:$16 sps:$4 sm:$0xff]  }
 0x14f   :  { %v544_v8 = vpop.f32.mrf.mxu0  ;;  %v607_v27 = vadd.f32 %v11014_v24, %v583_v14  ;;  %v10460_v14 = vld [vmem:[#allocation9 + $0x2c] ss:$16 sps:$4 sm:$0xff]  }
 0x150   :  { %v8549_v9 = vmul.f32 -1.442695, %v592_v7  ;;  %v593_v13 = vadd.f32 %v11006_v10, %v544_v8  ;;  %v585_v16 = vpop.f32.mrf.mxu1  ;;  %v10454_v7 = vld [vmem:[#allocation9 + $0x68] ss:$16 sps:$4 sm:$0xff]   ;;  %v10455_v8 = vld [vmem:[#allocation9 + $0x44] ss:$16 sps:$4 sm:$0xff]  }
 0x151   :  { %v546_v11 = vpop.f32.mrf.mxu0  ;;  %v609_v25 = vadd.f32 %v11012_v22, %v585_v16  ;;  %v10462_v16 = vld [vmem:[#allocation9 + $0x28] ss:$16 sps:$4 sm:$0xff]  }
 0x152   :  { %10274 = vpow2.f32 %v8549_v9  ;;  %v8550_v15 = vmul.f32 -1.442695, %v593_v13  ;;  %v587_v17 = vpop.f32.mrf.mxu1  ;;  %v10456_v9 = vld [vmem:[#allocation9 + $0x4c] ss:$16 sps:$4 sm:$0xff]   ;;  %v10457_v11 = vld [vmem:[#allocation9 + $0x40] ss:$16 sps:$4 sm:$0xff]  }
 0x153   :  { %v547_v12 = vpop.f32.mrf.mxu0  ;;  %v10459_v13 = vld [vmem:[#allocation9 + $0x24] ss:$16 sps:$4 sm:$0xff]  }
 0x154   :  { %10276 = vpow2.f32 %v8550_v15  ;;  %v588_v18 = vpop.f32.mrf.mxu1  ;;  %v10458_v12 = vld [vmem:[#allocation9 + $0x48] ss:$16 sps:$4 sm:$0xff]   ;;  %v10461_v15 = vld [vmem:[#allocation9 + $0x20] ss:$16 sps:$4 sm:$0xff]   ;;  %v10463_v17 = vld [vmem:[#allocation9 + $0x4] ss:$16 sps:$4 sm:$0xff]  }
 0x155   :  { %v10464_v18 = vld [vmem:[#allocation9 + $0xc] ss:$16 sps:$4 sm:$0xff]  }
 0x15f   :  { %v10275_v19 = vpop.eup %10274 }
 0x160   :  { %v600_v20 = vadd.f32 1.0, %v10275_v19  ;;  %v10465_v19 = vld [vmem:[#allocation9] ss:$16 sps:$4 sm:$0xff]  }
 0x161   :  { %v10277_v21 = vpop.eup %10276 }
 0x162   :  { %10278 = vrcp.f32 %v600_v20  ;;  %v601_v23 = vadd.f32 1.0, %v10277_v21  ;;  %v10466_v20 = vld [vmem:[#allocation9 + $0x8] ss:$16 sps:$4 sm:$0xff]   ;;  %v10467_v21 = vld [vmem:[#allocation9 + $0x1e4] ss:$16 sps:$4 sm:$0xff]  }
 0x164   :  { %10280 = vrcp.f32 %v601_v23  ;;  %v10468_v23 = vld [vmem:[#allocation9 + $0x1ec] ss:$16 sps:$4 sm:$0xff]  }
 0x16f   :  { %v10279_v26 = vpop.eup %10278 }
 0x170   :  { %v610_v28 = vmul.f32 %v10279_v26, %v609_v25  ;;  %v10469_v25 = vld [vmem:[#allocation9 + $0x1e0] ss:$16 sps:$4 sm:$0xff]   ;;  %v10470_v26 = vld [vmem:[#allocation9 + $0x1e8] ss:$16 sps:$4 sm:$0xff]  }
 0x171   :  { %v10281_v30 = vpop.eup %10280 }
 0x172   :  { %v611_v29 = vadd.f32 %v610_v28, %v607_v27  ;;  %v613_v31 = vsub.f32 1.0, %v10281_v30  ;;  %v615_v34 = vmul.f32 %v10436_v33, %v10281_v30  ;;  %v10471_v27 = vld [vmem:[#allocation9 + $0x1c4] ss:$16 sps:$4 sm:$0xff]   ;;  %v10472_v28 = vld [vmem:[#allocation9 + $0x1cc] ss:$16 sps:$4 sm:$0xff]  }
 0x173   :  { %v10474_v30 = vld [vmem:[#allocation9 + $0x1c8] ss:$16 sps:$4 sm:$0xff]   ;;  %v10477_v33 = vld [vmem:[#allocation9 + $0x1a0] ss:$16 sps:$4 sm:$0xff]  }
 0x174   :  { %10282 = vtanh.f32 %v611_v29  ;;  %v10473_v29 = vld [vmem:[#allocation9 + $0x1c0] ss:$16 sps:$4 sm:$0xff]  }
 0x181   :  { %v10283_v32 = vpop.eup %10282 }
 0x182   :  { %v614_v38 = vmul.f32 %v10283_v32, %v613_v31  ;;  %v10475_v31 = vld [vmem:[#allocation9 + $0x1a4] ss:$16 sps:$4 sm:$0xff]   ;;  %v10476_v32 = vld [vmem:[#allocation9 + $0x1ac] ss:$16 sps:$4 sm:$0xff]  }
 0x184   :  { %v11018_v39 = vadd.f32 %v615_v34, %v614_v38  ;;  %v10478_v34 = vld [vmem:[#allocation9 + $0x1a8] ss:$16 sps:$4 sm:$0xff]   ;;  %v10479_v38 = vld [vmem:[#allocation9 + $0x184] ss:$16 sps:$4 sm:$0xff]  }
 0x186   :  { %12750 = vst [vmem:[#allocation24_spill] sm:$0xff] %v11018_v39  ;;  %v617_v40 = vpack.c.bf16 %v11018_v39, %v11018_v39 }
 0x188   :  { %618 = vst [vmem:[#allocation2 + $0x4] sm:$0xf] %v617_v40  ;;  %v10480_v40 = vld [vmem:[#allocation9 + $0x18c] ss:$16 sps:$4 sm:$0xff]  }
 0x18f   :  { %v623_v41 = vld [vmem:[#allocation2] sm:$0xff] }
 0x190   :  { %v8552_v42 = vcombine.high %v623_v41, %v623_v41  ;;  %v8551_v43 = vcombine.low %v623_v41, %v623_v41  ;;  %v10481_v41 = vld [vmem:[#allocation9 + $0x180] ss:$16 sps:$4 sm:$0xff]  }
 0x192   :  { %1047 = vmatprep.mubr.bf16.mxu0 %v8552_v42  ;;  %1088 = vmatprep.mubr.bf16.mxu1 %v8552_v42  ;;  %v10482_v42 = vld [vmem:[#allocation9 + $0x164] ss:$16 sps:$4 sm:$0xff]  }
 0x193   :  { %1048 = vmatmul.mubr.bf16.vlgmr.msra.gmra.mxu0 %v8551_v43  ;;  %1089 = vmatmul.mubr.bf16.vlgmr.msra.gmra.mxu1 %v8551_v43  ;;  %v10483_v43 = vld [vmem:[#allocation9 + $0x160] ss:$16 sps:$4 sm:$0xff]  }
 0x194   :  { %1524 = vmatpush1.bf16.msra.mxu0 %v10437_v44  ;;  %1565 = vmatpush1.bf16.msra.mxu1 %v10438_v45  ;;  %v10484_v44 = vld [vmem:[#allocation9 + $0x144] ss:$16 sps:$4 sm:$0xff]   ;;  %v10485_v45 = vld [vmem:[#allocation9 + $0x140] ss:$16 sps:$4 sm:$0xff]  }
 0x195   :  { %1525 = vmatprep.subr.bf16.mxu0 %v10439_v46  ;;  %1566 = vmatprep.subr.bf16.mxu1 %v10440_v47  ;;  %v10486_v46 = vld [vmem:[#allocation9 + $0x124] ss:$16 sps:$4 sm:$0xff]  }
 0x198   :  { %1526 = vmatpush1.bf16.msra.mxu0 %v10441_v48  ;;  %1567 = vmatpush1.bf16.msra.mxu1 %v10442_v49 }
 0x199   :  { %1527 = vmatprep.subr.bf16.mxu0 %v10443_v50  ;;  %1568 = vmatprep.subr.bf16.mxu1 %v10444_v52 }
 0x19c   :  { %1528 = vmatpush1.bf16.msra.mxu0 %v10445_v53  ;;  %1569 = vmatpush1.bf16.msra.mxu1 %v10446_v54 }
 0x19d   :  { %1529 = vmatprep.subr.bf16.mxu0 %v10447_v55  ;;  %1570 = vmatprep.subr.bf16.mxu1 %v10448_v37 }
 0x1a0   :  { %1530 = vmatpush1.bf16.msra.mxu0 %v10449_v0  ;;  %1571 = vmatpush1.bf16.msra.mxu1 %v10450_v2 }
 0x1a1   :  { %1531 = vmatprep.subr.bf16.mxu0 %v10451_v3  ;;  %1572 = vmatprep.subr.bf16.mxu1 %v10452_v4 }
 0x1a4   :  { %1532 = vmatpush1.bf16.msra.mxu0 %v10453_v6  ;;  %1573 = vmatpush1.bf16.msra.mxu1 %v10454_v7 }
 0x1a5   :  { %1533 = vmatprep.subr.bf16.mxu0 %v10455_v8  ;;  %1574 = vmatprep.subr.bf16.mxu1 %v10456_v9 }
 0x1a8   :  { %1534 = vmatpush1.bf16.msra.mxu0 %v10457_v11  ;;  %1575 = vmatpush1.bf16.msra.mxu1 %v10458_v12 }
 0x1a9   :  { %1535 = vmatprep.subr.bf16.mxu0 %v10459_v13  ;;  %1576 = vmatprep.subr.bf16.mxu1 %v10460_v14  ;;  %v11043_v14 = vld [vmem:[#allocation9 + $0xe4] ss:$16 sps:$4 sm:$0xff]  }
 0x1aa   :  { %12752 = vst [vmem:[#allocation26_spill] sm:$0xff] %v11043_v14 }
 0x1ac   :  { %1536 = vmatpush1.bf16.msra.mxu0 %v10461_v15  ;;  %1577 = vmatpush1.bf16.msra.mxu1 %v10462_v16  ;;  %v11045_v15 = vld [vmem:[#allocation9 + $0xec] ss:$16 sps:$4 sm:$0xff]   ;;  %v11047_v16 = vld [vmem:[#allocation9 + $0xe0] ss:$16 sps:$4 sm:$0xff]  }
 0x1ad   :  { %1537 = vmatprep.subr.bf16.mxu0 %v10463_v17  ;;  %1578 = vmatprep.subr.bf16.mxu1 %v10464_v18  ;;  %12753 = vst [vmem:[#allocation27_spill] sm:$0xff] %v11045_v15  ;;  %v11049_v17 = vld [vmem:[#allocation9 + $0xe8] ss:$16 sps:$4 sm:$0xff]   ;;  %v11055_v18 = vld [vmem:[#allocation9 + $0xc4] ss:$16 sps:$4 sm:$0xff]  }
 0x1b0   :  { %1538 = vmatpush1.bf16.msra.mxu0 %v10465_v19  ;;  %1579 = vmatpush1.bf16.msra.mxu1 %v10466_v20  ;;  %v11057_v19 = vld [vmem:[#allocation9 + $0xcc] ss:$16 sps:$4 sm:$0xff]   ;;  %v11059_v20 = vld [vmem:[#allocation9 + $0xc0] ss:$16 sps:$4 sm:$0xff]  }
 0x1b1   :  { %1539 = vmatprep.subr.bf16.mxu0 %v10467_v21  ;;  %1580 = vmatprep.subr.bf16.mxu1 %v10468_v23  ;;  %v11061_v21 = vld [vmem:[#allocation9 + $0xc8] ss:$16 sps:$4 sm:$0xff]   ;;  %v11067_v23 = vld [vmem:[#allocation9 + $0xa4] ss:$16 sps:$4 sm:$0xff]  }
 0x1b4   :  { %1540 = vmatpush2.bf16.msra.mxu0 %v10469_v25  ;;  %1581 = vmatpush2.bf16.msra.mxu1 %v10470_v26  ;;  %v11069_v25 = vld [vmem:[#allocation9 + $0xac] ss:$16 sps:$4 sm:$0xff]   ;;  %v11071_v26 = vld [vmem:[#allocation9 + $0xa0] ss:$16 sps:$4 sm:$0xff]  }
 0x1b5   :  { %1541 = vmatprep.subr.bf16.mxu0 %v10471_v27  ;;  %1582 = vmatprep.subr.bf16.mxu1 %v10472_v28  ;;  %v11073_v27 = vld [vmem:[#allocation9 + $0xa8] ss:$16 sps:$4 sm:$0xff]   ;;  %v11079_v28 = vld [vmem:[#allocation9 + $0x84] ss:$16 sps:$4 sm:$0xff]  }
 0x1b8   :  { %1542 = vmatpush2.bf16.msra.mxu0 %v10473_v29  ;;  %1583 = vmatpush2.bf16.msra.mxu1 %v10474_v30  ;;  %v11081_v29 = vld [vmem:[#allocation9 + $0x8c] ss:$16 sps:$4 sm:$0xff]   ;;  %v11083_v30 = vld [vmem:[#allocation9 + $0x80] ss:$16 sps:$4 sm:$0xff]  }
 0x1b9   :  { %1543 = vmatprep.subr.bf16.mxu0 %v10475_v31  ;;  %1584 = vmatprep.subr.bf16.mxu1 %v10476_v32  ;;  %v11085_v31 = vld [vmem:[#allocation9 + $0x88] ss:$16 sps:$4 sm:$0xff]   ;;  %v11091_v32 = vld [vmem:[#allocation9 + $0x64] ss:$16 sps:$4 sm:$0xff]  }
 0x1bc   :  { %1544 = vmatpush2.bf16.msra.mxu0 %v10477_v33  ;;  %1585 = vmatpush2.bf16.msra.mxu1 %v10478_v34  ;;  %v11093_v33 = vld [vmem:[#allocation9 + $0x6c] ss:$16 sps:$4 sm:$0xff]   ;;  %v11095_v34 = vld [vmem:[#allocation9 + $0x60] ss:$16 sps:$4 sm:$0xff]  }
 0x1bd   :  { %1545 = vmatprep.subr.bf16.mxu0 %v10479_v38  ;;  %1586 = vmatprep.subr.bf16.mxu1 %v10480_v40  ;;  %v11097_v38 = vld [vmem:[#allocation9 + $0x68] ss:$16 sps:$4 sm:$0xff]   ;;  %v11103_v40 = vld [vmem:[#allocation9 + $0x44] ss:$16 sps:$4 sm:$0xff]  }
 0x1c0   :  { %1546 = vmatpush2.bf16.msra.mxu0 %v10481_v41  ;;  %1587 = vmatpush2.bf16.msra.mxu1 %v10897_v57  ;;  %v1129_v57 = vld [vmem:[#allocation4 + $0x8] sm:$0xf]  ;;  %v11105_v41 = vld [vmem:[#allocation9 + $0x4c] ss:$16 sps:$4 sm:$0xff]  }
 0x1c1   :  { %1547 = vmatprep.subr.bf16.mxu0 %v10482_v42  ;;  %1588 = vmatprep.subr.bf16.mxu1 %v10900_v58  ;;  %1130 = vst [vmem:[#allocation2] sm:$0xf] %v1129_v57  ;;  %v11107_v42 = vld [vmem:[#allocation9 + $0x40] ss:$16 sps:$4 sm:$0xff]   ;;  %v11121_v57 = vld [vmem:[#allocation9 + $0x28] ss:$16 sps:$4 sm:$0xff]  }
 0x1c4   :  { %1548 = vmatpush2.bf16.msra.mxu0 %v10483_v43  ;;  %1589 = vmatpush2.bf16.msra.mxu1 %v10909_v61  ;;  %v11109_v43 = vld [vmem:[#allocation9 + $0x48] ss:$16 sps:$4 sm:$0xff]  }
 0x1c5   :  { %1549 = vmatprep.subr.bf16.mxu0 %v10484_v44  ;;  %1590 = vmatprep.subr.bf16.mxu1 %v10912_v62  ;;  %v11115_v44 = vld [vmem:[#allocation9 + $0x24] ss:$16 sps:$4 sm:$0xff]  }
 0x1c8   :  { %1550 = vmatpush2.bf16.msra.mxu0 %v10485_v45  ;;  %1591 = vmatpush2.bf16.msra.mxu1 %v10919_v35  ;;  %v11117_v45 = vld [vmem:[#allocation9 + $0x2c] ss:$16 sps:$4 sm:$0xff]  }
 0x1c9   :  { %1551 = vmatprep.subr.bf16.mxu0 %v10486_v46  ;;  %1592 = vmatprep.subr.bf16.mxu1 %v10922_v36  ;;  %v11119_v46 = vld [vmem:[#allocation9 + $0x20] ss:$16 sps:$4 sm:$0xff]  }
 0x1cc   :  { %1552 = vmatpush2.bf16.msra.mxu0 %v12749_v1  ;;  %1593 = vmatpush2.bf16.msra.mxu1 %v10927_v51 }
 0x1cd   :  { %1553 = vmatprep.subr.bf16.mxu0 %v10907_v60  ;;  %1594 = vmatprep.subr.bf16.mxu1 %v10930_v56 }
 0x1d0   :  { %1554 = vmatpush2.bf16.msra.mxu0 %v10916_v63  ;;  %1595 = vmatpush2.bf16.msra.mxu1 %v10935_v59 }
 0x1d1   :  { %2031 = vmatprep.subr.bf16.mxu0 %v11043_v14  ;;  %2072 = vmatprep.subr.bf16.mxu1 %v11045_v15 }
 0x253   :  { %v1049_v58 = vpop.f32.mrf.mxu0  ;;  %v1090_v61 = vpop.f32.mrf.mxu1 }
 0x254   :  { %v1099_v62 = vadd.f32 %v1049_v58, %v11003_v5  ;;  %v1114_v55 = vadd.f32 %v1090_v61, %v11014_v24  ;;  %v11127_v58 = vld [vmem:[#allocation9 + $0x4] ss:$16 sps:$4 sm:$0xff]   ;;  %v11129_v61 = vld [vmem:[#allocation9 + $0xc] ss:$16 sps:$4 sm:$0xff]  }
 0x255   :  { %v1051_v35 = vpop.f32.mrf.mxu0  ;;  %v1092_v36 = vpop.f32.mrf.mxu1 }
 0x256   :  { %v8617_v47 = vmul.f32 -1.442695, %v1099_v62  ;;  %v1100_v56 = vadd.f32 %v1051_v35, %v11006_v10  ;;  %v1116_v53 = vadd.f32 %v1092_v36, %v11012_v22  ;;  %v11131_v62 = vld [vmem:[#allocation9] ss:$16 sps:$4 sm:$0xff]   ;;  %v11133_v35 = vld [vmem:[#allocation9 + $0x8] ss:$16 sps:$4 sm:$0xff]  }
 0x257   :  { %v1053_v1 = vpop.f32.mrf.mxu0  ;;  %v1094_v48 = vpop.f32.mrf.mxu1  ;;  %v11139_v36 = vld [vmem:[#allocation9 + $0x1e4] ss:$16 sps:$4 sm:$0xff]  }
 0x258   :  { %10284 = vpow2.f32 %v8617_v47  ;;  %v8618_v49 = vmul.f32 -1.442695, %v1100_v56  ;;  %v11141_v47 = vld [vmem:[#allocation9 + $0x1ec] ss:$16 sps:$4 sm:$0xff]   ;;  %v11143_v1 = vld [vmem:[#allocation9 + $0x1e0] ss:$16 sps:$4 sm:$0xff]  }
 0x259   :  { %v1054_v51 = vpop.f32.mrf.mxu0  ;;  %v1095_v60 = vpop.f32.mrf.mxu1  ;;  %v11145_v48 = vld [vmem:[#allocation9 + $0x1e8] ss:$16 sps:$4 sm:$0xff]   ;;  %v11155_v56 = vld [vmem:[#allocation9 + $0x1c0] ss:$16 sps:$4 sm:$0xff]  }
 0x25a   :  { %10286 = vpow2.f32 %v8618_v49  ;;  %v11151_v51 = vld [vmem:[#allocation9 + $0x1c4] ss:$16 sps:$4 sm:$0xff]   ;;  %v11153_v60 = vld [vmem:[#allocation9 + $0x1cc] ss:$16 sps:$4 sm:$0xff]   ;;  %v11157_v49 = vld [vmem:[#allocation9 + $0x1c8] ss:$16 sps:$4 sm:$0xff]  }
 0x265   :  { %v10285_v63 = vpop.eup %10284 }
 0x266   :  { %v1107_v59 = vadd.f32 1.0, %v10285_v63  ;;  %v11163_v63 = vld [vmem:[#allocation9 + $0x1a4] ss:$16 sps:$4 sm:$0xff]  }
 0x267   :  { %v10287_v50 = vpop.eup %10286 }
 0x268   :  { %10288 = vrcp.f32 %v1107_v59  ;;  %v1108_v52 = vadd.f32 1.0, %v10287_v50  ;;  %v11165_v59 = vld [vmem:[#allocation9 + $0x1ac] ss:$16 sps:$4 sm:$0xff]   ;;  %v11167_v50 = vld [vmem:[#allocation9 + $0x1a0] ss:$16 sps:$4 sm:$0xff]  }
 0x26a   :  { %10290 = vrcp.f32 %v1108_v52  ;;  %v11169_v52 = vld [vmem:[#allocation9 + $0x1a8] ss:$16 sps:$4 sm:$0xff]  }
 0x275   :  { %v10289_v54 = vpop.eup %10288 }
 0x276   :  { %v1117_v37 = vmul.f32 %v10289_v54, %v1116_v53  ;;  %v11175_v53 = vld [vmem:[#allocation9 + $0x184] ss:$16 sps:$4 sm:$0xff]   ;;  %v11177_v54 = vld [vmem:[#allocation9 + $0x18c] ss:$16 sps:$4 sm:$0xff]  }
 0x277   :  { %v10291_v2 = vpop.eup %10290  ;;  %12754 = vst [vmem:[#allocation28_spill] sm:$0xff] %v11175_v53  ;;  %12755 = vst [vmem:[#allocation29_spill] sm:$0xff] %v11177_v54 }
 0x278   :  { %v1118_v0 = vadd.f32 %v1117_v37, %v1114_v55  ;;  %v1120_v3 = vsub.f32 1.0, %v10291_v2  ;;  %v1122_v6 = vmul.f32 %v10291_v2, %v11018_v39  ;;  %v11179_v55 = vld [vmem:[#allocation9 + $0x180] ss:$16 sps:$4 sm:$0xff]   ;;  %v11181_v37 = vld [vmem:[#allocation9 + $0x188] ss:$16 sps:$4 sm:$0xff]  }
 0x279   :  { %12756 = vst [vmem:[#allocation30_spill] sm:$0xff] %v11179_v55  ;;  %12757 = vst [vmem:[#allocation31_spill] sm:$0xff] %v11181_v37  ;;  %v11189_v2 = vld [vmem:[#allocation9 + $0x16c] ss:$16 sps:$4 sm:$0xff]  }
 0x27a   :  { %10292 = vtanh.f32 %v1118_v0  ;;  %v11187_v0 = vld [vmem:[#allocation9 + $0x164] ss:$16 sps:$4 sm:$0xff]   ;;  %12759 = vst [vmem:[#allocation33_spill] sm:$0xff] %v11189_v2  ;;  %v11213_v39 = vld [vmem:[#allocation9 + $0x12c] ss:$16 sps:$4 sm:$0xff]  }
 0x27b   :  { %12758 = vst [vmem:[#allocation32_spill] sm:$0xff] %v11187_v0  ;;  %12767 = vst [vmem:[#allocation41_spill] sm:$0xff] %v11213_v39 }
 0x287   :  { %v10293_v4 = vpop.eup %10292 }
 0x288   :  { %v1121_v7 = vmul.f32 %v10293_v4, %v1120_v3  ;;  %v11191_v3 = vld [vmem:[#allocation9 + $0x160] ss:$16 sps:$4 sm:$0xff]   ;;  %v11193_v4 = vld [vmem:[#allocation9 + $0x168] ss:$16 sps:$4 sm:$0xff]  }
 0x289   :  { %12760 = vst [vmem:[#allocation34_spill] sm:$0xff] %v11191_v3  ;;  %12761 = vst [vmem:[#allocation35_spill] sm:$0xff] %v11193_v4 }
 0x28a   :  { %v11039_v8 = vadd.f32 %v1122_v6, %v1121_v7  ;;  %v11199_v6 = vld [vmem:[#allocation9 + $0x144] ss:$16 sps:$4 sm:$0xff]   ;;  %v11201_v7 = vld [vmem:[#allocation9 + $0x14c] ss:$16 sps:$4 sm:$0xff]  }
 0x28b   :  { %12762 = vst [vmem:[#allocation36_spill] sm:$0xff] %v11199_v6  ;;  %12763 = vst [vmem:[#allocation37_spill] sm:$0xff] %v11201_v7 }
 0x28c   :  { %12751 = vst [vmem:[#allocation25_spill] sm:$0xff] %v11039_v8  ;;  %v1124_v9 = vpack.c.bf16 %v11039_v8, %v11039_v8 }
 0x28e   :  { %1125 = vst [vmem:[#allocation2 + $0x4] sm:$0xf] %v1124_v9  ;;  %v11203_v9 = vld [vmem:[#allocation9 + $0x140] ss:$16 sps:$4 sm:$0xff]  }
 0x28f   :  { %12764 = vst [vmem:[#allocation38_spill] sm:$0xff] %v11203_v9 }
 0x295   :  { %v1131_v11 = vld [vmem:[#allocation2] sm:$0xff] }
 0x296   :  { %v8620_v12 = vcombine.high %v1131_v11, %v1131_v11  ;;  %v8619_v13 = vcombine.low %v1131_v11, %v1131_v11  ;;  %v11205_v11 = vld [vmem:[#allocation9 + $0x148] ss:$16 sps:$4 sm:$0xff]  }
 0x297   :  { %12765 = vst [vmem:[#allocation39_spill] sm:$0xff] %v11205_v11 }
 0x298   :  { %1555 = vmatprep.mubr.bf16.mxu0 %v8620_v12  ;;  %1596 = vmatprep.mubr.bf16.mxu1 %v8620_v12  ;;  %v1637_v12 = vld [vmem:[#allocation4 + $0xc] sm:$0xf] }
 0x299   :  { %1556 = vmatmul.mubr.bf16.vlgmr.msra.gmra.mxu0 %v8619_v13  ;;  %1597 = vmatmul.mubr.bf16.vlgmr.msra.gmra.mxu1 %v8619_v13  ;;  %1638 = vst [vmem:[#allocation2] sm:$0xf] %v1637_v12  ;;  %v11211_v13 = vld [vmem:[#allocation9 + $0x124] ss:$16 sps:$4 sm:$0xff]  }
 0x29a   :  { %2032 = vmatpush1.bf16.msra.mxu0 %v11047_v16  ;;  %2073 = vmatpush1.bf16.msra.mxu1 %v11049_v17  ;;  %12766 = vst [vmem:[#allocation40_spill] sm:$0xff] %v11211_v13  ;;  %v11223_v12 = vld [vmem:[#allocation9 + $0x104] ss:$16 sps:$4 sm:$0xff]  }
 0x29b   :  { %2033 = vmatprep.subr.bf16.mxu0 %v11055_v18  ;;  %2074 = vmatprep.subr.bf16.mxu1 %v11057_v19  ;;  %12770 = vst [vmem:[#allocation44_spill] sm:$0xff] %v11223_v12 }
 0x29e   :  { %2034 = vmatpush1.bf16.msra.mxu0 %v11059_v20  ;;  %2075 = vmatpush1.bf16.msra.mxu1 %v11061_v21 }
 0x29f   :  { %2035 = vmatprep.subr.bf16.mxu0 %v11067_v23  ;;  %2076 = vmatprep.subr.bf16.mxu1 %v11069_v25 }
 0x2a2   :  { %2036 = vmatpush1.bf16.msra.mxu0 %v11071_v26  ;;  %2077 = vmatpush1.bf16.msra.mxu1 %v11073_v27 }
 0x2a3   :  { %2037 = vmatprep.subr.bf16.mxu0 %v11079_v28  ;;  %2078 = vmatprep.subr.bf16.mxu1 %v11081_v29 }
 0x2a6   :  { %2038 = vmatpush1.bf16.msra.mxu0 %v11083_v30  ;;  %2079 = vmatpush1.bf16.msra.mxu1 %v11085_v31 }
 0x2a7   :  { %2039 = vmatprep.subr.bf16.mxu0 %v11091_v32  ;;  %2080 = vmatprep.subr.bf16.mxu1 %v11093_v33 }
 0x2aa   :  { %2040 = vmatpush1.bf16.msra.mxu0 %v11095_v34  ;;  %2081 = vmatpush1.bf16.msra.mxu1 %v11097_v38 }
 0x2ab   :  { %2041 = vmatprep.subr.bf16.mxu0 %v11103_v40  ;;  %2082 = vmatprep.subr.bf16.mxu1 %v11105_v41 }
 0x2ae   :  { %2042 = vmatpush1.bf16.msra.mxu0 %v11107_v42  ;;  %2083 = vmatpush1.bf16.msra.mxu1 %v11109_v43 }
 0x2af   :  { %2043 = vmatprep.subr.bf16.mxu0 %v11115_v44  ;;  %2084 = vmatprep.subr.bf16.mxu1 %v11117_v45 }
 0x2b2   :  { %2044 = vmatpush1.bf16.msra.mxu0 %v11119_v46  ;;  %2085 = vmatpush1.bf16.msra.mxu1 %v11121_v57 }
 0x2b3   :  { %2045 = vmatprep.subr.bf16.mxu0 %v11127_v58  ;;  %2086 = vmatprep.subr.bf16.mxu1 %v11129_v61 }
 0x2b6   :  { %2046 = vmatpush1.bf16.msra.mxu0 %v11131_v62  ;;  %2087 = vmatpush1.bf16.msra.mxu1 %v11133_v35 }
 0x2b7   :  { %2047 = vmatprep.subr.bf16.mxu0 %v11139_v36  ;;  %2088 = vmatprep.subr.bf16.mxu1 %v11141_v47 }
 0x2ba   :  { %2048 = vmatpush2.bf16.msra.mxu0 %v11143_v1  ;;  %2089 = vmatpush2.bf16.msra.mxu1 %v11145_v48 }
 0x2bb   :  { %2049 = vmatprep.subr.bf16.mxu0 %v11151_v51  ;;  %2090 = vmatprep.subr.bf16.mxu1 %v11153_v60 }
 0x2be   :  { %2050 = vmatpush2.bf16.msra.mxu0 %v11155_v56  ;;  %2091 = vmatpush2.bf16.msra.mxu1 %v11157_v49 }
 0x2bf   :  { %2051 = vmatprep.subr.bf16.mxu0 %v11163_v63  ;;  %2092 = vmatprep.subr.bf16.mxu1 %v11165_v59 }
 0x2c2   :  { %2052 = vmatpush2.bf16.msra.mxu0 %v11167_v50  ;;  %2093 = vmatpush2.bf16.msra.mxu1 %v11169_v52 }
 0x2c3   :  { %2053 = vmatprep.subr.bf16.mxu0 %v11175_v53  ;;  %2094 = vmatprep.subr.bf16.mxu1 %v11177_v54 }
 0x2c6   :  { %2054 = vmatpush2.bf16.msra.mxu0 %v11179_v55  ;;  %2095 = vmatpush2.bf16.msra.mxu1 %v11181_v37 }
 0x2c7   :  { %2055 = vmatprep.subr.bf16.mxu0 %v11187_v0  ;;  %2096 = vmatprep.subr.bf16.mxu1 %v11189_v2 }
 0x2ca   :  { %2056 = vmatpush2.bf16.msra.mxu0 %v11191_v3  ;;  %2097 = vmatpush2.bf16.msra.mxu1 %v11193_v4  ;;  %v11215_v4 = vld [vmem:[#allocation9 + $0x120] ss:$16 sps:$4 sm:$0xff]   ;;  %v11217_v3 = vld [vmem:[#allocation9 + $0x128] ss:$16 sps:$4 sm:$0xff]  }
 0x2cb   :  { %2057 = vmatprep.subr.bf16.mxu0 %v11199_v6  ;;  %2098 = vmatprep.subr.bf16.mxu1 %v11201_v7  ;;  %12768 = vst [vmem:[#allocation42_spill] sm:$0xff] %v11215_v4  ;;  %12769 = vst [vmem:[#allocation43_spill] sm:$0xff] %v11217_v3  ;;  %v11229_v7 = vld [vmem:[#allocation9 + $0x108] ss:$16 sps:$4 sm:$0xff]  }
 0x2cc   :  { %12773 = vst [vmem:[#allocation47_spill] sm:$0xff] %v11229_v7 }
 0x2ce   :  { %2058 = vmatpush2.bf16.msra.mxu0 %v11203_v9  ;;  %2099 = vmatpush2.bf16.msra.mxu1 %v11205_v11  ;;  %v11225_v9 = vld [vmem:[#allocation9 + $0x10c] ss:$16 sps:$4 sm:$0xff]   ;;  %v11227_v11 = vld [vmem:[#allocation9 + $0x100] ss:$16 sps:$4 sm:$0xff]  }
 0x2cf   :  { %2059 = vmatprep.subr.bf16.mxu0 %v11211_v13  ;;  %2100 = vmatprep.subr.bf16.mxu1 %v11213_v39  ;;  %12771 = vst [vmem:[#allocation45_spill] sm:$0xff] %v11225_v9  ;;  %12772 = vst [vmem:[#allocation46_spill] sm:$0xff] %v11227_v11 }
 0x2d2   :  { %2060 = vmatpush2.bf16.msra.mxu0 %v11215_v4  ;;  %2101 = vmatpush2.bf16.msra.mxu1 %v11217_v3 }
 0x2d3   :  { %2061 = vmatprep.subr.bf16.mxu0 %v11223_v12  ;;  %2102 = vmatprep.subr.bf16.mxu1 %v11225_v9 }
 0x2d6   :  { %2062 = vmatpush2.bf16.msra.mxu0 %v11227_v11  ;;  %2103 = vmatpush2.bf16.msra.mxu1 %v11229_v7 }
 0x2d7   :  { %2539 = vmatprep.subr.bf16.mxu0 %v11043_v14  ;;  %2580 = vmatprep.subr.bf16.mxu1 %v11045_v15 }
 0x359   :  { %v1557_v3 = vpop.f32.mrf.mxu0  ;;  %v1598_v4 = vpop.f32.mrf.mxu1 }
 0x35a   :  { %v1607_v39 = vadd.f32 %v1557_v3, %v11003_v5  ;;  %v1622_v3 = vadd.f32 %v1598_v4, %v11014_v24  ;;  %v12775_v24 = vld [vmem:[#allocation28_spill] sm:$0xff]  ;;  %v12778_v4 = vld [vmem:[#allocation31_spill] sm:$0xff] }
 0x35b   :  { %v1559_v13 = vpop.f32.mrf.mxu0  ;;  %v1600_v6 = vpop.f32.mrf.mxu1 }
 0x35c   :  { %v8685_v2 = vmul.f32 -1.442695, %v1607_v39  ;;  %v1608_v11 = vadd.f32 %v1559_v13, %v11006_v10  ;;  %v1624_v53 = vadd.f32 %v1600_v6, %v11012_v22  ;;  %v12780_v13 = vld [vmem:[#allocation33_spill] sm:$0xff] }
 0x35d   :  { %v1561_v0 = vpop.f32.mrf.mxu0  ;;  %v1602_v37 = vpop.f32.mrf.mxu1 }
 0x35e   :  { %10294 = vpow2.f32 %v8685_v2  ;;  %v8686_v55 = vmul.f32 -1.442695, %v1608_v11 }
 0x35f   :  { %v1562_v12 = vpop.f32.mrf.mxu0  ;;  %v1603_v9 = vpop.f32.mrf.mxu1 }
 0x360   :  { %10296 = vpow2.f32 %v8686_v55  ;;  %v12781_v12 = vld [vmem:[#allocation34_spill] sm:$0xff] }
 0x36b   :  { %v10295_v7 = vpop.eup %10294 }
 0x36c   :  { %v1615_v14 = vadd.f32 1.0, %v10295_v7  ;;  %v12779_v7 = vld [vmem:[#allocation32_spill] sm:$0xff] }
 0x36d   :  { %v10297_v15 = vpop.eup %10296 }
 0x36e   :  { %10298 = vrcp.f32 %v1615_v14  ;;  %v1616_v54 = vadd.f32 1.0, %v10297_v15 }
 0x370   :  { %10300 = vrcp.f32 %v1616_v54  ;;  %v12777_v54 = vld [vmem:[#allocation30_spill] sm:$0xff] }
 0x37b   :  { %v10299_v5 = vpop.eup %10298 }
 0x37c   :  { %v1625_v39 = vmul.f32 %v10299_v5, %v1624_v53  ;;  %v12776_v53 = vld [vmem:[#allocation29_spill] sm:$0xff]  ;;  %v12782_v5 = vld [vmem:[#allocation35_spill] sm:$0xff] }
 0x37d   :  { %v10301_v0 = vpop.eup %10300 }
 0x37e   :  { %v1626_v37 = vadd.f32 %v1625_v39, %v1622_v3  ;;  %v1628_v2 = vsub.f32 1.0, %v10301_v0  ;;  %v1630_v10 = vmul.f32 %v10301_v0, %v11039_v8  ;;  %v12783_v3 = vld [vmem:[#allocation36_spill] sm:$0xff]  ;;  %v12784_v39 = vld [vmem:[#allocation37_spill] sm:$0xff]  ;;  %v12786_v0 = vld [vmem:[#allocation39_spill] sm:$0xff] }
 0x37f   :  { %v12795_v8 = vld [vmem:[#allocation26_spill] sm:$0xff] }
 0x380   :  { %10302 = vtanh.f32 %v1626_v37  ;;  %v12785_v37 = vld [vmem:[#allocation38_spill] sm:$0xff] }
 0x38d   :  { %v10303_v9 = vpop.eup %10302 }
 0x38e   :  { %v1629_v55 = vmul.f32 %v10303_v9, %v1628_v2  ;;  %v12787_v2 = vld [vmem:[#allocation40_spill] sm:$0xff]  ;;  %v12788_v9 = vld [vmem:[#allocation41_spill] sm:$0xff] }
 0x390   :  { %v11242_v11 = vadd.f32 %v1630_v10, %v1629_v55  ;;  %v12789_v10 = vld [vmem:[#allocation42_spill] sm:$0xff]  ;;  %v12790_v55 = vld [vmem:[#allocation43_spill] sm:$0xff] }
 0x392   :  { %12774 = vst [vmem:[#allocation48_spill] sm:$0xff] %v11242_v11  ;;  %v1632_v14 = vpack.c.bf16 %v11242_v11, %v11242_v11 }
 0x394   :  { %1633 = vst [vmem:[#allocation2 + $0x4] sm:$0xf] %v1632_v14  ;;  %v12791_v14 = vld [vmem:[#allocation44_spill] sm:$0xff] }
 0x39b   :  { %v1639_v22 = vld [vmem:[#allocation2] sm:$0xff] }
 0x39c   :  { %v8688_v15 = vcombine.high %v1639_v22, %v1639_v22  ;;  %v8687_v6 = vcombine.low %v1639_v22, %v1639_v22  ;;  %v12792_v22 = vld [vmem:[#allocation45_spill] sm:$0xff] }
 0x39e   :  { %2063 = vmatprep.mubr.bf16.mxu0 %v8688_v15  ;;  %2104 = vmatprep.mubr.bf16.mxu1 %v8688_v15  ;;  %v12793_v15 = vld [vmem:[#allocation46_spill] sm:$0xff] }
 0x39f   :  { %2064 = vmatmul.mubr.bf16.vlgmr.msra.gmra.mxu0 %v8687_v6  ;;  %2105 = vmatmul.mubr.bf16.vlgmr.msra.gmra.mxu1 %v8687_v6  ;;  %v12794_v6 = vld [vmem:[#allocation47_spill] sm:$0xff] }
 0x3a0   :  { %2540 = vmatpush1.bf16.msra.mxu0 %v11047_v16  ;;  %2581 = vmatpush1.bf16.msra.mxu1 %v11049_v17 }
 0x3a1   :  { %2541 = vmatprep.subr.bf16.mxu0 %v11055_v18  ;;  %2582 = vmatprep.subr.bf16.mxu1 %v11057_v19 }
 0x3a4   :  { %2542 = vmatpush1.bf16.msra.mxu0 %v11059_v20  ;;  %2583 = vmatpush1.bf16.msra.mxu1 %v11061_v21 }
 0x3a5   :  { %2543 = vmatprep.subr.bf16.mxu0 %v11067_v23  ;;  %2584 = vmatprep.subr.bf16.mxu1 %v11069_v25 }
 0x3a8   :  { %2544 = vmatpush1.bf16.msra.mxu0 %v11071_v26  ;;  %2585 = vmatpush1.bf16.msra.mxu1 %v11073_v27 }
 0x3a9   :  { %2545 = vmatprep.subr.bf16.mxu0 %v11079_v28  ;;  %2586 = vmatprep.subr.bf16.mxu1 %v11081_v29 }
 0x3ac   :  { %2546 = vmatpush1.bf16.msra.mxu0 %v11083_v30  ;;  %2587 = vmatpush1.bf16.msra.mxu1 %v11085_v31 }
 0x3ad   :  { %2547 = vmatprep.subr.bf16.mxu0 %v11091_v32  ;;  %2588 = vmatprep.subr.bf16.mxu1 %v11093_v33 }
 0x3b0   :  { %2548 = vmatpush1.bf16.msra.mxu0 %v11095_v34  ;;  %2589 = vmatpush1.bf16.msra.mxu1 %v11097_v38 }
 0x3b1   :  { %2549 = vmatprep.subr.bf16.mxu0 %v11103_v40  ;;  %2590 = vmatprep.subr.bf16.mxu1 %v11105_v41 }
 0x3b4   :  { %2550 = vmatpush1.bf16.msra.mxu0 %v11107_v42  ;;  %2591 = vmatpush1.bf16.msra.mxu1 %v11109_v43 }
 0x3b5   :  { %2551 = vmatprep.subr.bf16.mxu0 %v11115_v44  ;;  %2592 = vmatprep.subr.bf16.mxu1 %v11117_v45 }
 0x3b8   :  { %2552 = vmatpush1.bf16.msra.mxu0 %v11119_v46  ;;  %2593 = vmatpush1.bf16.msra.mxu1 %v11121_v57 }
 0x3b9   :  { %2553 = vmatprep.subr.bf16.mxu0 %v11127_v58  ;;  %2594 = vmatprep.subr.bf16.mxu1 %v11129_v61 }
 0x3bc   :  { %2554 = vmatpush1.bf16.msra.mxu0 %v11131_v62  ;;  %2595 = vmatpush1.bf16.msra.mxu1 %v11133_v35 }
 0x3bd   :  { %2555 = vmatprep.subr.bf16.mxu0 %v11139_v36  ;;  %2596 = vmatprep.subr.bf16.mxu1 %v11141_v47 }
 0x3c0   :  { %2556 = vmatpush2.bf16.msra.mxu0 %v11143_v1  ;;  %2597 = vmatpush2.bf16.msra.mxu1 %v11145_v48 }
 0x3c1   :  { %2557 = vmatprep.subr.bf16.mxu0 %v11151_v51  ;;  %2598 = vmatprep.subr.bf16.mxu1 %v11153_v60 }
 0x3c4   :  { %2558 = vmatpush2.bf16.msra.mxu0 %v11155_v56  ;;  %2599 = vmatpush2.bf16.msra.mxu1 %v11157_v49 }
 0x3c5   :  { %2559 = vmatprep.subr.bf16.mxu0 %v11163_v63  ;;  %2600 = vmatprep.subr.bf16.mxu1 %v11165_v59 }
 0x3c8   :  { %2560 = vmatpush2.bf16.msra.mxu0 %v11167_v50  ;;  %2601 = vmatpush2.bf16.msra.mxu1 %v11169_v52 }
 0x3c9   :  { %2561 = vmatprep.subr.bf16.mxu0 %v12775_v24  ;;  %2602 = vmatprep.subr.bf16.mxu1 %v12776_v53 }
 0x3cc   :  { %2562 = vmatpush2.bf16.msra.mxu0 %v12777_v54  ;;  %2603 = vmatpush2.bf16.msra.mxu1 %v12778_v4 }
 0x3cd   :  { %2563 = vmatprep.subr.bf16.mxu0 %v12779_v7  ;;  %2604 = vmatprep.subr.bf16.mxu1 %v12780_v13 }
 0x3d0   :  { %2564 = vmatpush2.bf16.msra.mxu0 %v12781_v12  ;;  %2605 = vmatpush2.bf16.msra.mxu1 %v12782_v5 }
 0x3d1   :  { %2565 = vmatprep.subr.bf16.mxu0 %v12783_v3  ;;  %2606 = vmatprep.subr.bf16.mxu1 %v12784_v39 }
 0x3d4   :  { %2566 = vmatpush2.bf16.msra.mxu0 %v12785_v37  ;;  %2607 = vmatpush2.bf16.msra.mxu1 %v12786_v0  ;;  %v12796_v37 = vld [vmem:[#allocation27_spill] sm:$0xff]  ;;  %v2145_v0 = vld [vmem:[#allocation4 + $0x10] sm:$0xf] }
 0x3d5   :  { %2567 = vmatprep.subr.bf16.mxu0 %v12787_v2  ;;  %2608 = vmatprep.subr.bf16.mxu1 %v12788_v9  ;;  %2146 = vst [vmem:[#allocation2] sm:$0xf] %v2145_v0  ;;  %v11310_v2 = vld [vmem:[#allocation10] sm:$0xff] }
 0x3d6   :  { %12797 = vst [vmem:[#allocation28_spill] sm:$0xff] %v11310_v2 }
 0x3d8   :  { %2568 = vmatpush2.bf16.msra.mxu0 %v12789_v10  ;;  %2609 = vmatpush2.bf16.msra.mxu1 %v12790_v55 }
 0x3d9   :  { %2569 = vmatprep.subr.bf16.mxu0 %v12791_v14  ;;  %2610 = vmatprep.subr.bf16.mxu1 %v12792_v22  ;;  %v11313_v22 = vld [vmem:[#allocation10 + $0x8] sm:$0xff] }
 0x3da   :  { %12798 = vst [vmem:[#allocation29_spill] sm:$0xff] %v11313_v22 }
 0x3dc   :  { %2570 = vmatpush2.bf16.msra.mxu0 %v12793_v15  ;;  %2611 = vmatpush2.bf16.msra.mxu1 %v12794_v6 }
 0x3dd   :  { %3047 = vmatprep.subr.bf16.mxu0 %v12795_v8  ;;  %3088 = vmatprep.subr.bf16.mxu1 %v12796_v37 }
 0x45f   :  { %v2065_v9 = vpop.f32.mrf.mxu0  ;;  %v2106_v10 = vpop.f32.mrf.mxu1 }
 0x460   :  { %v2115_v55 = vadd.f32 %v11310_v2, %v2065_v9  ;;  %v11319_v9 = vld [vmem:[%s12535_s5] sm:$0xff] }
 0x461   :  { %v2067_v39 = vpop.f32.mrf.mxu0  ;;  %v2108_v14 = vpop.f32.mrf.mxu1  ;;  %12799 = vst [vmem:[#allocation30_spill] sm:$0xff] %v11319_v9  ;;  %v11321_v2 = vld [vmem:[#allocation12] sm:$0xff] }
 0x462   :  { %v8753_v3 = vmul.f32 -1.442695, %v2115_v55  ;;  %v2116_v37 = vadd.f32 %v11313_v22, %v2067_v39 }
 0x463   :  { %v2069_v15 = vpop.f32.mrf.mxu0  ;;  %v2110_v5 = vpop.f32.mrf.mxu1 }
 0x464   :  { %10304 = vpow2.f32 %v8753_v3  ;;  %v8754_v12 = vmul.f32 -1.442695, %v2116_v37  ;;  %v2132_v5 = vadd.f32 %v11319_v9, %v2108_v14  ;;  %v2130_v15 = vadd.f32 %v11321_v2, %v2106_v10 }
 0x465   :  { %v2070_v6 = vpop.f32.mrf.mxu0  ;;  %v2111_v8 = vpop.f32.mrf.mxu1 }
 0x466   :  { %10306 = vpow2.f32 %v8754_v12 }
 0x471   :  { %v10305_v0 = vpop.eup %10304 }
 0x472   :  { %v2123_v13 = vadd.f32 1.0, %v10305_v0 }
 0x473   :  { %v10307_v7 = vpop.eup %10306 }
 0x474   :  { %10308 = vrcp.f32 %v2123_v13  ;;  %v2124_v55 = vadd.f32 1.0, %v10307_v7 }
 0x476   :  { %10310 = vrcp.f32 %v2124_v55 }
 0x481   :  { %v10309_v3 = vpop.eup %10308 }
 0x482   :  { %v2133_v39 = vmul.f32 %v10309_v3, %v2132_v5 }
 0x483   :  { %v10311_v6 = vpop.eup %10310 }
 0x484   :  { %v2134_v12 = vadd.f32 %v2133_v39, %v2130_v15  ;;  %v2136_v13 = vsub.f32 1.0, %v10311_v6  ;;  %v2138_v37 = vmul.f32 %v10311_v6, %v11242_v11  ;;  %v11401_v39 = vld [vmem:[#allocation9 + $0xe4] ss:$16 sps:$4 sm:$0xff]   ;;  %v11405_v6 = vld [vmem:[#allocation9 + $0xe0] ss:$16 sps:$4 sm:$0xff]  }
 0x485   :  { %v11571_v11 = vld [vmem:[#allocation9 + $0x12c] ss:$16 sps:$4 sm:$0xff]  }
 0x486   :  { %10312 = vtanh.f32 %v2134_v12  ;;  %v11403_v12 = vld [vmem:[#allocation9 + $0xec] ss:$16 sps:$4 sm:$0xff]  }
 0x493   :  { %v10313_v8 = vpop.eup %10312 }
 0x494   :  { %v2137_v0 = vmul.f32 %v10313_v8, %v2136_v13  ;;  %v11407_v13 = vld [vmem:[#allocation9 + $0xe8] ss:$16 sps:$4 sm:$0xff]   ;;  %v11413_v8 = vld [vmem:[#allocation9 + $0xc4] ss:$16 sps:$4 sm:$0xff]  }
 0x496   :  { %v11326_v22 = vadd.f32 %v2138_v37, %v2137_v0  ;;  %v11415_v37 = vld [vmem:[#allocation9 + $0xcc] ss:$16 sps:$4 sm:$0xff]   ;;  %v11417_v0 = vld [vmem:[#allocation9 + $0xc0] ss:$16 sps:$4 sm:$0xff]  }
 0x498   :  { %12800 = vst [vmem:[#allocation26_spill] sm:$0xff] %v11326_v22  ;;  %v2140_v7 = vpack.c.bf16 %v11326_v22, %v11326_v22 }
 0x49a   :  { %2141 = vst [vmem:[#allocation2 + $0x4] sm:$0xf] %v2140_v7  ;;  %v11419_v7 = vld [vmem:[#allocation9 + $0xc8] ss:$16 sps:$4 sm:$0xff]  }
 0x4a1   :  { %v2147_v14 = vld [vmem:[#allocation2] sm:$0xff] }
 0x4a2   :  { %v8756_v9 = vcombine.high %v2147_v14, %v2147_v14  ;;  %v8755_v4 = vcombine.low %v2147_v14, %v2147_v14  ;;  %v11425_v14 = vld [vmem:[#allocation9 + $0xa4] ss:$16 sps:$4 sm:$0xff]  }
 0x4a4   :  { %2571 = vmatprep.mubr.bf16.mxu0 %v8756_v9  ;;  %2612 = vmatprep.mubr.bf16.mxu1 %v8756_v9 }
 0x4a5   :  { %2572 = vmatmul.mubr.bf16.vlgmr.msra.gmra.mxu0 %v8755_v4  ;;  %2613 = vmatmul.mubr.bf16.vlgmr.msra.gmra.mxu1 %v8755_v4 }
 0x4a6   :  { %3048 = vmatpush1.bf16.msra.mxu0 %v11047_v16  ;;  %3089 = vmatpush1.bf16.msra.mxu1 %v11049_v17  ;;  %v12801_v16 = vld [vmem:[#allocation31_spill] sm:$0xff]  ;;  %v12802_v17 = vld [vmem:[#allocation32_spill] sm:$0xff] }
 0x4a7   :  { %3049 = vmatprep.subr.bf16.mxu0 %v11055_v18  ;;  %3090 = vmatprep.subr.bf16.mxu1 %v11057_v19  ;;  %v12803_v18 = vld [vmem:[#allocation33_spill] sm:$0xff]  ;;  %v12804_v19 = vld [vmem:[#allocation34_spill] sm:$0xff]  ;;  %12822 = vst [vmem:[#allocation31_spill] sm:$0xff] %v11401_v39  ;;  %12823 = vst [vmem:[#allocation32_spill] sm:$0xff] %v11403_v12 }
 0x4aa   :  { %3050 = vmatpush1.bf16.msra.mxu0 %v11059_v20  ;;  %3091 = vmatpush1.bf16.msra.mxu1 %v11061_v21  ;;  %v12805_v20 = vld [vmem:[#allocation35_spill] sm:$0xff]  ;;  %v12806_v21 = vld [vmem:[#allocation36_spill] sm:$0xff] }
 0x4ab   :  { %3051 = vmatprep.subr.bf16.mxu0 %v11067_v23  ;;  %3092 = vmatprep.subr.bf16.mxu1 %v11069_v25  ;;  %v12807_v23 = vld [vmem:[#allocation37_spill] sm:$0xff]  ;;  %v12808_v25 = vld [vmem:[#allocation38_spill] sm:$0xff] }
 0x4ae   :  { %3052 = vmatpush1.bf16.msra.mxu0 %v11071_v26  ;;  %3093 = vmatpush1.bf16.msra.mxu1 %v11073_v27  ;;  %v12809_v26 = vld [vmem:[#allocation39_spill] sm:$0xff]  ;;  %v12810_v27 = vld [vmem:[#allocation40_spill] sm:$0xff] }
 0x4af   :  { %3053 = vmatprep.subr.bf16.mxu0 %v11079_v28  ;;  %3094 = vmatprep.subr.bf16.mxu1 %v11081_v29  ;;  %v12811_v28 = vld [vmem:[#allocation41_spill] sm:$0xff]  ;;  %v12812_v29 = vld [vmem:[#allocation42_spill] sm:$0xff] }
 0x4b2   :  { %3054 = vmatpush1.bf16.msra.mxu0 %v11083_v30  ;;  %3095 = vmatpush1.bf16.msra.mxu1 %v11085_v31  ;;  %v12813_v30 = vld [vmem:[#allocation43_spill] sm:$0xff]  ;;  %v12814_v31 = vld [vmem:[#allocation44_spill] sm:$0xff] }
 0x4b3   :  { %3055 = vmatprep.subr.bf16.mxu0 %v11091_v32  ;;  %3096 = vmatprep.subr.bf16.mxu1 %v11093_v33  ;;  %v12815_v32 = vld [vmem:[#allocation45_spill] sm:$0xff]  ;;  %v12816_v33 = vld [vmem:[#allocation46_spill] sm:$0xff] }
 0x4b4   :  { %12837 = vst [vmem:[#allocation46_spill] sm:$0xff] %v11571_v11 }
 0x4b6   :  { %3056 = vmatpush1.bf16.msra.mxu0 %v11095_v34  ;;  %3097 = vmatpush1.bf16.msra.mxu1 %v11097_v38  ;;  %v12817_v34 = vld [vmem:[#allocation47_spill] sm:$0xff]  ;;  %v2653_v38 = vld [vmem:[#allocation4 + $0x14] sm:$0xf] }
 0x4b7   :  { %3057 = vmatprep.subr.bf16.mxu0 %v11103_v40  ;;  %3098 = vmatprep.subr.bf16.mxu1 %v11105_v41  ;;  %2654 = vst [vmem:[#allocation2] sm:$0xf] %v2653_v38  ;;  %v11477_v38 = vld [vmem:[#allocation9 + $0x20] ss:$16 sps:$4 sm:$0xff]  }
 0x4ba   :  { %3058 = vmatpush1.bf16.msra.mxu0 %v11107_v42  ;;  %3099 = vmatpush1.bf16.msra.mxu1 %v11109_v43  ;;  %v12818_v42 = vld [vmem:[#allocation28_spill] sm:$0xff] }
 0x4bb   :  { %3059 = vmatprep.subr.bf16.mxu0 %v11115_v44  ;;  %3100 = vmatprep.subr.bf16.mxu1 %v11117_v45 }
 0x4be   :  { %3060 = vmatpush1.bf16.msra.mxu0 %v11119_v46  ;;  %3101 = vmatpush1.bf16.msra.mxu1 %v11121_v57 }
 0x4bf   :  { %3061 = vmatprep.subr.bf16.mxu0 %v11127_v58  ;;  %3102 = vmatprep.subr.bf16.mxu1 %v11129_v61 }
 0x4c2   :  { %3062 = vmatpush1.bf16.msra.mxu0 %v11131_v62  ;;  %3103 = vmatpush1.bf16.msra.mxu1 %v11133_v35  ;;  %v12819_v35 = vld [vmem:[#allocation29_spill] sm:$0xff] }
 0x4c3   :  { %3063 = vmatprep.subr.bf16.mxu0 %v11139_v36  ;;  %3104 = vmatprep.subr.bf16.mxu1 %v11141_v47 }
 0x4c6   :  { %3064 = vmatpush2.bf16.msra.mxu0 %v11143_v1  ;;  %3105 = vmatpush2.bf16.msra.mxu1 %v11145_v48 }
 0x4c7   :  { %3065 = vmatprep.subr.bf16.mxu0 %v11151_v51  ;;  %3106 = vmatprep.subr.bf16.mxu1 %v11153_v60 }
 0x4ca   :  { %3066 = vmatpush2.bf16.msra.mxu0 %v11155_v56  ;;  %3107 = vmatpush2.bf16.msra.mxu1 %v11157_v49  ;;  %v12820_v56 = vld [vmem:[#allocation30_spill] sm:$0xff] }
 0x4cb   :  { %3067 = vmatprep.subr.bf16.mxu0 %v11163_v63  ;;  %3108 = vmatprep.subr.bf16.mxu1 %v11165_v59 }
 0x4ce   :  { %3068 = vmatpush2.bf16.msra.mxu0 %v11167_v50  ;;  %3109 = vmatpush2.bf16.msra.mxu1 %v11169_v52 }
 0x4cf   :  { %3069 = vmatprep.subr.bf16.mxu0 %v12775_v24  ;;  %3110 = vmatprep.subr.bf16.mxu1 %v12776_v53 }
 0x4d2   :  { %3070 = vmatpush2.bf16.msra.mxu0 %v12777_v54  ;;  %3111 = vmatpush2.bf16.msra.mxu1 %v12801_v16  ;;  %v11427_v16 = vld [vmem:[#allocation9 + $0xac] ss:$16 sps:$4 sm:$0xff]  }
 0x4d3   :  { %3071 = vmatprep.subr.bf16.mxu0 %v12802_v17  ;;  %3112 = vmatprep.subr.bf16.mxu1 %v12803_v18  ;;  %v11429_v17 = vld [vmem:[#allocation9 + $0xa0] ss:$16 sps:$4 sm:$0xff]   ;;  %v11431_v18 = vld [vmem:[#allocation9 + $0xa8] ss:$16 sps:$4 sm:$0xff]  }
 0x4d6   :  { %3072 = vmatpush2.bf16.msra.mxu0 %v12804_v19  ;;  %3113 = vmatpush2.bf16.msra.mxu1 %v12805_v20  ;;  %v11437_v19 = vld [vmem:[#allocation9 + $0x84] ss:$16 sps:$4 sm:$0xff]   ;;  %v11439_v20 = vld [vmem:[#allocation9 + $0x8c] ss:$16 sps:$4 sm:$0xff]  }
 0x4d7   :  { %3073 = vmatprep.subr.bf16.mxu0 %v12806_v21  ;;  %3114 = vmatprep.subr.bf16.mxu1 %v12807_v23  ;;  %v11441_v21 = vld [vmem:[#allocation9 + $0x80] ss:$16 sps:$4 sm:$0xff]   ;;  %v11443_v23 = vld [vmem:[#allocation9 + $0x88] ss:$16 sps:$4 sm:$0xff]  }
 0x4da   :  { %3074 = vmatpush2.bf16.msra.mxu0 %v12808_v25  ;;  %3115 = vmatpush2.bf16.msra.mxu1 %v12809_v26  ;;  %v11449_v25 = vld [vmem:[#allocation9 + $0x64] ss:$16 sps:$4 sm:$0xff]   ;;  %v11451_v26 = vld [vmem:[#allocation9 + $0x6c] ss:$16 sps:$4 sm:$0xff]  }
 0x4db   :  { %3075 = vmatprep.subr.bf16.mxu0 %v12810_v27  ;;  %3116 = vmatprep.subr.bf16.mxu1 %v12811_v28  ;;  %v11453_v27 = vld [vmem:[#allocation9 + $0x60] ss:$16 sps:$4 sm:$0xff]   ;;  %v11455_v28 = vld [vmem:[#allocation9 + $0x68] ss:$16 sps:$4 sm:$0xff]  }
 0x4de   :  { %3076 = vmatpush2.bf16.msra.mxu0 %v12812_v29  ;;  %3117 = vmatpush2.bf16.msra.mxu1 %v12813_v30  ;;  %v11461_v29 = vld [vmem:[#allocation9 + $0x44] ss:$16 sps:$4 sm:$0xff]   ;;  %v11463_v30 = vld [vmem:[#allocation9 + $0x4c] ss:$16 sps:$4 sm:$0xff]  }
 0x4df   :  { %3077 = vmatprep.subr.bf16.mxu0 %v12814_v31  ;;  %3118 = vmatprep.subr.bf16.mxu1 %v12815_v32  ;;  %v11465_v31 = vld [vmem:[#allocation9 + $0x40] ss:$16 sps:$4 sm:$0xff]   ;;  %v11467_v32 = vld [vmem:[#allocation9 + $0x48] ss:$16 sps:$4 sm:$0xff]  }
 0x4e2   :  { %3078 = vmatpush2.bf16.msra.mxu0 %v12816_v33  ;;  %3119 = vmatpush2.bf16.msra.mxu1 %v12817_v34  ;;  %v11473_v33 = vld [vmem:[#allocation9 + $0x24] ss:$16 sps:$4 sm:$0xff]   ;;  %v11475_v34 = vld [vmem:[#allocation9 + $0x2c] ss:$16 sps:$4 sm:$0xff]  }
 0x4e3   :  { %3555 = vmatprep.subr.bf16.mxu0 %v11401_v39  ;;  %3596 = vmatprep.subr.bf16.mxu1 %v11403_v12 }
 0x565   :  { %v2573_v40 = vpop.f32.mrf.mxu0  ;;  %v2614_v41 = vpop.f32.mrf.mxu1 }
 0x566   :  { %v2623_v43 = vadd.f32 %v2573_v40, %v12818_v42  ;;  %v2638_v59 = vadd.f32 %v2614_v41, %v11321_v2  ;;  %v11479_v40 = vld [vmem:[#allocation9 + $0x28] ss:$16 sps:$4 sm:$0xff]   ;;  %v11485_v41 = vld [vmem:[#allocation9 + $0x4] ss:$16 sps:$4 sm:$0xff]  }
 0x567   :  { %v2575_v44 = vpop.f32.mrf.mxu0  ;;  %v2616_v45 = vpop.f32.mrf.mxu1 }
 0x568   :  { %v8821_v46 = vmul.f32 -1.442695, %v2623_v43  ;;  %v2624_v36 = vadd.f32 %v2575_v44, %v12819_v35  ;;  %v2640_v49 = vadd.f32 %v2616_v45, %v12820_v56  ;;  %v11487_v43 = vld [vmem:[#allocation9 + $0xc] ss:$16 sps:$4 sm:$0xff]   ;;  %v11489_v44 = vld [vmem:[#allocation9] ss:$16 sps:$4 sm:$0xff]  }
 0x569   :  { %v2577_v57 = vpop.f32.mrf.mxu0  ;;  %v2618_v58 = vpop.f32.mrf.mxu1  ;;  %v11491_v45 = vld [vmem:[#allocation9 + $0x8] ss:$16 sps:$4 sm:$0xff]  }
 0x56a   :  { %10314 = vpow2.f32 %v8821_v46  ;;  %v8822_v47 = vmul.f32 -1.442695, %v2624_v36  ;;  %v11497_v46 = vld [vmem:[#allocation9 + $0x1e4] ss:$16 sps:$4 sm:$0xff]   ;;  %v11499_v57 = vld [vmem:[#allocation9 + $0x1ec] ss:$16 sps:$4 sm:$0xff]  }
 0x56b   :  { %v2578_v61 = vpop.f32.mrf.mxu0  ;;  %v2619_v62 = vpop.f32.mrf.mxu1  ;;  %v11501_v58 = vld [vmem:[#allocation9 + $0x1e0] ss:$16 sps:$4 sm:$0xff]   ;;  %v11511_v36 = vld [vmem:[#allocation9 + $0x1cc] ss:$16 sps:$4 sm:$0xff]  }
 0x56c   :  { %10316 = vpow2.f32 %v8822_v47  ;;  %v11503_v61 = vld [vmem:[#allocation9 + $0x1e8] ss:$16 sps:$4 sm:$0xff]   ;;  %v11509_v62 = vld [vmem:[#allocation9 + $0x1c4] ss:$16 sps:$4 sm:$0xff]   ;;  %v11513_v47 = vld [vmem:[#allocation9 + $0x1c0] ss:$16 sps:$4 sm:$0xff]  }
 0x577   :  { %v10315_v1 = vpop.eup %10314 }
 0x578   :  { %v2631_v48 = vadd.f32 1.0, %v10315_v1  ;;  %v11515_v1 = vld [vmem:[#allocation9 + $0x1c8] ss:$16 sps:$4 sm:$0xff]  }
 0x579   :  { %v10317_v51 = vpop.eup %10316 }
 0x57a   :  { %10318 = vrcp.f32 %v2631_v48  ;;  %v2632_v60 = vadd.f32 1.0, %v10317_v51  ;;  %v11521_v48 = vld [vmem:[#allocation9 + $0x1a4] ss:$16 sps:$4 sm:$0xff]   ;;  %v11523_v51 = vld [vmem:[#allocation9 + $0x1ac] ss:$16 sps:$4 sm:$0xff]  }
 0x57c   :  { %10320 = vrcp.f32 %v2632_v60  ;;  %v11525_v60 = vld [vmem:[#allocation9 + $0x1a0] ss:$16 sps:$4 sm:$0xff]  }
 0x587   :  { %v10319_v63 = vpop.eup %10318 }
 0x588   :  { %v2641_v50 = vmul.f32 %v10319_v63, %v2640_v49  ;;  %v11527_v49 = vld [vmem:[#allocation9 + $0x1a8] ss:$16 sps:$4 sm:$0xff]   ;;  %v11533_v63 = vld [vmem:[#allocation9 + $0x184] ss:$16 sps:$4 sm:$0xff]  }
 0x589   :  { %v10321_v24 = vpop.eup %10320  ;;  %12824 = vst [vmem:[#allocation33_spill] sm:$0xff] %v11533_v63 }
 0x58a   :  { %v2642_v52 = vadd.f32 %v2641_v50, %v2638_v59  ;;  %v2644_v53 = vsub.f32 1.0, %v10321_v24  ;;  %v2646_v4 = vmul.f32 %v10321_v24, %v11326_v22  ;;  %v11535_v59 = vld [vmem:[#allocation9 + $0x18c] ss:$16 sps:$4 sm:$0xff]   ;;  %v11537_v50 = vld [vmem:[#allocation9 + $0x180] ss:$16 sps:$4 sm:$0xff]  }
 0x58b   :  { %12825 = vst [vmem:[#allocation34_spill] sm:$0xff] %v11535_v59  ;;  %12826 = vst [vmem:[#allocation35_spill] sm:$0xff] %v11537_v50  ;;  %v11545_v24 = vld [vmem:[#allocation9 + $0x164] ss:$16 sps:$4 sm:$0xff]  }
 0x58c   :  { %10322 = vtanh.f32 %v2642_v52  ;;  %v11539_v52 = vld [vmem:[#allocation9 + $0x188] ss:$16 sps:$4 sm:$0xff]   ;;  %12828 = vst [vmem:[#allocation37_spill] sm:$0xff] %v11545_v24  ;;  %v11569_v22 = vld [vmem:[#allocation9 + $0x124] ss:$16 sps:$4 sm:$0xff]  }
 0x58d   :  { %12827 = vst [vmem:[#allocation36_spill] sm:$0xff] %v11539_v52  ;;  %12836 = vst [vmem:[#allocation45_spill] sm:$0xff] %v11569_v22 }
 0x599   :  { %v10323_v54 = vpop.eup %10322 }
 0x59a   :  { %v2645_v10 = vmul.f32 %v10323_v54, %v2644_v53  ;;  %v11547_v53 = vld [vmem:[#allocation9 + $0x16c] ss:$16 sps:$4 sm:$0xff]   ;;  %v11549_v54 = vld [vmem:[#allocation9 + $0x160] ss:$16 sps:$4 sm:$0xff]  }
 0x59b   :  { %12829 = vst [vmem:[#allocation38_spill] sm:$0xff] %v11547_v53  ;;  %12830 = vst [vmem:[#allocation39_spill] sm:$0xff] %v11549_v54 }
 0x59c   :  { %v11397_v9 = vadd.f32 %v2646_v4, %v2645_v10  ;;  %v11551_v4 = vld [vmem:[#allocation9 + $0x168] ss:$16 sps:$4 sm:$0xff]   ;;  %v11557_v10 = vld [vmem:[#allocation9 + $0x144] ss:$16 sps:$4 sm:$0xff]  }
 0x59d   :  { %12831 = vst [vmem:[#allocation40_spill] sm:$0xff] %v11551_v4  ;;  %12832 = vst [vmem:[#allocation41_spill] sm:$0xff] %v11557_v10 }
 0x59e   :  { %12821 = vst [vmem:[#allocation27_spill] sm:$0xff] %v11397_v9  ;;  %v2648_v55 = vpack.c.bf16 %v11397_v9, %v11397_v9 }
 0x5a0   :  { %2649 = vst [vmem:[#allocation2 + $0x4] sm:$0xf] %v2648_v55  ;;  %v11559_v55 = vld [vmem:[#allocation9 + $0x14c] ss:$16 sps:$4 sm:$0xff]  }
 0x5a1   :  { %12833 = vst [vmem:[#allocation42_spill] sm:$0xff] %v11559_v55 }
 0x5a7   :  { %v2655_v5 = vld [vmem:[#allocation2] sm:$0xff] }
 0x5a8   :  { %v8824_v3 = vcombine.high %v2655_v5, %v2655_v5  ;;  %v8823_v15 = vcombine.low %v2655_v5, %v2655_v5  ;;  %v11561_v5 = vld [vmem:[#allocation9 + $0x140] ss:$16 sps:$4 sm:$0xff]  }
 0x5a9   :  { %12834 = vst [vmem:[#allocation43_spill] sm:$0xff] %v11561_v5 }
 0x5aa   :  { %3079 = vmatprep.mubr.bf16.mxu0 %v8824_v3  ;;  %3120 = vmatprep.mubr.bf16.mxu1 %v8824_v3  ;;  %v11563_v3 = vld [vmem:[#allocation9 + $0x148] ss:$16 sps:$4 sm:$0xff]  }
 0x5ab   :  { %3080 = vmatmul.mubr.bf16.vlgmr.msra.gmra.mxu0 %v8823_v15  ;;  %3121 = vmatmul.mubr.bf16.vlgmr.msra.gmra.mxu1 %v8823_v15  ;;  %12835 = vst [vmem:[#allocation44_spill] sm:$0xff] %v11563_v3  ;;  %v3161_v15 = vld [vmem:[#allocation4 + $0x18] sm:$0xf] }
 0x5ac   :  { %3556 = vmatpush1.bf16.msra.mxu0 %v11405_v6  ;;  %3597 = vmatpush1.bf16.msra.mxu1 %v11407_v13  ;;  %3162 = vst [vmem:[#allocation2] sm:$0xf] %v3161_v15  ;;  %v11581_v15 = vld [vmem:[#allocation9 + $0x104] ss:$16 sps:$4 sm:$0xff]  }
 0x5ad   :  { %3557 = vmatprep.subr.bf16.mxu0 %v11413_v8  ;;  %3598 = vmatprep.subr.bf16.mxu1 %v11415_v37  ;;  %12840 = vst [vmem:[#allocation29_spill] sm:$0xff] %v11581_v15 }
 0x5b0   :  { %3558 = vmatpush1.bf16.msra.mxu0 %v11417_v0  ;;  %3599 = vmatpush1.bf16.msra.mxu1 %v11419_v7 }
 0x5b1   :  { %3559 = vmatprep.subr.bf16.mxu0 %v11425_v14  ;;  %3600 = vmatprep.subr.bf16.mxu1 %v11427_v16 }
 0x5b4   :  { %3560 = vmatpush1.bf16.msra.mxu0 %v11429_v17  ;;  %3601 = vmatpush1.bf16.msra.mxu1 %v11431_v18 }
 0x5b5   :  { %3561 = vmatprep.subr.bf16.mxu0 %v11437_v19  ;;  %3602 = vmatprep.subr.bf16.mxu1 %v11439_v20 }
 0x5b8   :  { %3562 = vmatpush1.bf16.msra.mxu0 %v11441_v21  ;;  %3603 = vmatpush1.bf16.msra.mxu1 %v11443_v23 }
 0x5b9   :  { %3563 = vmatprep.subr.bf16.mxu0 %v11449_v25  ;;  %3604 = vmatprep.subr.bf16.mxu1 %v11451_v26 }
 0x5bc   :  { %3564 = vmatpush1.bf16.msra.mxu0 %v11453_v27  ;;  %3605 = vmatpush1.bf16.msra.mxu1 %v11455_v28 }
 0x5bd   :  { %3565 = vmatprep.subr.bf16.mxu0 %v11461_v29  ;;  %3606 = vmatprep.subr.bf16.mxu1 %v11463_v30 }
 0x5c0   :  { %3566 = vmatpush1.bf16.msra.mxu0 %v11465_v31  ;;  %3607 = vmatpush1.bf16.msra.mxu1 %v11467_v32 }
 0x5c1   :  { %3567 = vmatprep.subr.bf16.mxu0 %v11473_v33  ;;  %3608 = vmatprep.subr.bf16.mxu1 %v11475_v34 }
 0x5c4   :  { %3568 = vmatpush1.bf16.msra.mxu0 %v11477_v38  ;;  %3609 = vmatpush1.bf16.msra.mxu1 %v11479_v40 }
 0x5c5   :  { %3569 = vmatprep.subr.bf16.mxu0 %v11485_v41  ;;  %3610 = vmatprep.subr.bf16.mxu1 %v11487_v43 }
 0x5c8   :  { %3570 = vmatpush1.bf16.msra.mxu0 %v11489_v44  ;;  %3611 = vmatpush1.bf16.msra.mxu1 %v11491_v45 }
 0x5c9   :  { %3571 = vmatprep.subr.bf16.mxu0 %v11497_v46  ;;  %3612 = vmatprep.subr.bf16.mxu1 %v11499_v57 }
 0x5cc   :  { %3572 = vmatpush2.bf16.msra.mxu0 %v11501_v58  ;;  %3613 = vmatpush2.bf16.msra.mxu1 %v11503_v61 }
 0x5cd   :  { %3573 = vmatprep.subr.bf16.mxu0 %v11509_v62  ;;  %3614 = vmatprep.subr.bf16.mxu1 %v11511_v36 }
 0x5d0   :  { %3574 = vmatpush2.bf16.msra.mxu0 %v11513_v47  ;;  %3615 = vmatpush2.bf16.msra.mxu1 %v11515_v1 }
 0x5d1   :  { %3575 = vmatprep.subr.bf16.mxu0 %v11521_v48  ;;  %3616 = vmatprep.subr.bf16.mxu1 %v11523_v51 }
 0x5d4   :  { %3576 = vmatpush2.bf16.msra.mxu0 %v11525_v60  ;;  %3617 = vmatpush2.bf16.msra.mxu1 %v11527_v49 }
 0x5d5   :  { %3577 = vmatprep.subr.bf16.mxu0 %v11533_v63  ;;  %3618 = vmatprep.subr.bf16.mxu1 %v11535_v59 }
 0x5d8   :  { %3578 = vmatpush2.bf16.msra.mxu0 %v11537_v50  ;;  %3619 = vmatpush2.bf16.msra.mxu1 %v11539_v52 }
 0x5d9   :  { %3579 = vmatprep.subr.bf16.mxu0 %v11545_v24  ;;  %3620 = vmatprep.subr.bf16.mxu1 %v11547_v53 }
 0x5dc   :  { %3580 = vmatpush2.bf16.msra.mxu0 %v11549_v54  ;;  %3621 = vmatpush2.bf16.msra.mxu1 %v11551_v4  ;;  %v11573_v4 = vld [vmem:[#allocation9 + $0x120] ss:$16 sps:$4 sm:$0xff]   ;;  %v11575_v54 = vld [vmem:[#allocation9 + $0x128] ss:$16 sps:$4 sm:$0xff]  }
 0x5dd   :  { %3581 = vmatprep.subr.bf16.mxu0 %v11557_v10  ;;  %3622 = vmatprep.subr.bf16.mxu1 %v11559_v55  ;;  %12838 = vst [vmem:[#allocation47_spill] sm:$0xff] %v11573_v4  ;;  %12839 = vst [vmem:[#allocation28_spill] sm:$0xff] %v11575_v54  ;;  %v11587_v55 = vld [vmem:[#allocation9 + $0x108] ss:$16 sps:$4 sm:$0xff]  }
 0x5de   :  { %12843 = vst [vmem:[#allocation50_spill] sm:$0xff] %v11587_v55 }
 0x5e0   :  { %3582 = vmatpush2.bf16.msra.mxu0 %v11561_v5  ;;  %3623 = vmatpush2.bf16.msra.mxu1 %v11563_v3  ;;  %v11583_v5 = vld [vmem:[#allocation9 + $0x10c] ss:$16 sps:$4 sm:$0xff]   ;;  %v11585_v3 = vld [vmem:[#allocation9 + $0x100] ss:$16 sps:$4 sm:$0xff]  }
 0x5e1   :  { %3583 = vmatprep.subr.bf16.mxu0 %v11569_v22  ;;  %3624 = vmatprep.subr.bf16.mxu1 %v11571_v11  ;;  %12841 = vst [vmem:[#allocation30_spill] sm:$0xff] %v11583_v5  ;;  %12842 = vst [vmem:[#allocation49_spill] sm:$0xff] %v11585_v3 }
 0x5e4   :  { %3584 = vmatpush2.bf16.msra.mxu0 %v11573_v4  ;;  %3625 = vmatpush2.bf16.msra.mxu1 %v11575_v54 }
 0x5e5   :  { %3585 = vmatprep.subr.bf16.mxu0 %v11581_v15  ;;  %3626 = vmatprep.subr.bf16.mxu1 %v11583_v5 }
 0x5e8   :  { %3586 = vmatpush2.bf16.msra.mxu0 %v11585_v3  ;;  %3627 = vmatpush2.bf16.msra.mxu1 %v11587_v55 }
 0x5e9   :  { %4063 = vmatprep.subr.bf16.mxu0 %v11401_v39  ;;  %4104 = vmatprep.subr.bf16.mxu1 %v11403_v12 }
 0x66b   :  { %v3081_v54 = vpop.f32.mrf.mxu0  ;;  %v3122_v4 = vpop.f32.mrf.mxu1 }
 0x66c   :  { %v3131_v11 = vadd.f32 %v3081_v54, %v12818_v42  ;;  %v3146_v54 = vadd.f32 %v3122_v4, %v11321_v2  ;;  %v12845_v2 = vld [vmem:[#allocation33_spill] sm:$0xff]  ;;  %v12848_v4 = vld [vmem:[#allocation36_spill] sm:$0xff] }
 0x66d   :  { %v3083_v22 = vpop.f32.mrf.mxu0  ;;  %v3124_v10 = vpop.f32.mrf.mxu1 }
 0x66e   :  { %v8889_v53 = vmul.f32 -1.442695, %v3131_v11  ;;  %v3132_v3 = vadd.f32 %v3083_v22, %v12819_v35  ;;  %v3148_v63 = vadd.f32 %v3124_v10, %v12820_v56 }
 0x66f   :  { %v3085_v24 = vpop.f32.mrf.mxu0  ;;  %v3126_v52 = vpop.f32.mrf.mxu1 }
 0x670   :  { %10324 = vpow2.f32 %v8889_v53  ;;  %v8890_v50 = vmul.f32 -1.442695, %v3132_v3  ;;  %v12850_v3 = vld [vmem:[#allocation38_spill] sm:$0xff] }
 0x671   :  { %v3086_v15 = vpop.f32.mrf.mxu0  ;;  %v3127_v5 = vpop.f32.mrf.mxu1 }
 0x672   :  { %10326 = vpow2.f32 %v8890_v50  ;;  %v12851_v15 = vld [vmem:[#allocation39_spill] sm:$0xff] }
 0x67d   :  { %v10325_v55 = vpop.eup %10324 }
 0x67e   :  { %v3139_v39 = vadd.f32 1.0, %v10325_v55  ;;  %v12849_v55 = vld [vmem:[#allocation37_spill] sm:$0xff] }
 0x67f   :  { %v10327_v12 = vpop.eup %10326 }
 0x680   :  { %10328 = vrcp.f32 %v3139_v39  ;;  %v3140_v59 = vadd.f32 1.0, %v10327_v12 }
 0x682   :  { %10330 = vrcp.f32 %v3140_v59  ;;  %v12847_v59 = vld [vmem:[#allocation35_spill] sm:$0xff] }
 0x68d   :  { %v10329_v42 = vpop.eup %10328 }
 0x68e   :  { %v3149_v11 = vmul.f32 %v10329_v42, %v3148_v63  ;;  %v12846_v63 = vld [vmem:[#allocation34_spill] sm:$0xff]  ;;  %v12852_v42 = vld [vmem:[#allocation40_spill] sm:$0xff] }
 0x68f   :  { %v10331_v24 = vpop.eup %10330 }
 0x690   :  { %v3150_v52 = vadd.f32 %v3149_v11, %v3146_v54  ;;  %v3152_v53 = vsub.f32 1.0, %v10331_v24  ;;  %v3154_v22 = vmul.f32 %v10331_v24, %v11397_v9  ;;  %v12853_v54 = vld [vmem:[#allocation41_spill] sm:$0xff]  ;;  %v12854_v11 = vld [vmem:[#allocation42_spill] sm:$0xff]  ;;  %v12856_v24 = vld [vmem:[#allocation44_spill] sm:$0xff] }
 0x691   :  { %v12865_v9 = vld [vmem:[#allocation31_spill] sm:$0xff] }
 0x692   :  { %10332 = vtanh.f32 %v3150_v52  ;;  %v12855_v52 = vld [vmem:[#allocation43_spill] sm:$0xff] }
 0x69f   :  { %v10333_v5 = vpop.eup %10332 }
 0x6a0   :  { %v3153_v35 = vmul.f32 %v10333_v5, %v3152_v53  ;;  %v12857_v53 = vld [vmem:[#allocation45_spill] sm:$0xff]  ;;  %v12858_v5 = vld [vmem:[#allocation46_spill] sm:$0xff] }
 0x6a2   :  { %v11600_v50 = vadd.f32 %v3154_v22, %v3153_v35  ;;  %v12859_v22 = vld [vmem:[#allocation47_spill] sm:$0xff]  ;;  %v12860_v35 = vld [vmem:[#allocation28_spill] sm:$0xff] }
 0x6a4   :  { %12844 = vst [vmem:[#allocation51_spill] sm:$0xff] %v11600_v50  ;;  %v3156_v39 = vpack.c.bf16 %v11600_v50, %v11600_v50 }
 0x6a6   :  { %3157 = vst [vmem:[#allocation2 + $0x4] sm:$0xf] %v3156_v39  ;;  %v12861_v39 = vld [vmem:[#allocation29_spill] sm:$0xff] }
 0x6ad   :  { %v3163_v56 = vld [vmem:[#allocation2] sm:$0xff] }
 0x6ae   :  { %v8892_v12 = vcombine.high %v3163_v56, %v3163_v56  ;;  %v8891_v10 = vcombine.low %v3163_v56, %v3163_v56  ;;  %v12862_v56 = vld [vmem:[#allocation30_spill] sm:$0xff] }
 0x6b0   :  { %3587 = vmatprep.mubr.bf16.mxu0 %v8892_v12  ;;  %3628 = vmatprep.mubr.bf16.mxu1 %v8892_v12  ;;  %v12863_v12 = vld [vmem:[#allocation49_spill] sm:$0xff] }
 0x6b1   :  { %3588 = vmatmul.mubr.bf16.vlgmr.msra.gmra.mxu0 %v8891_v10  ;;  %3629 = vmatmul.mubr.bf16.vlgmr.msra.gmra.mxu1 %v8891_v10  ;;  %v12864_v10 = vld [vmem:[#allocation50_spill] sm:$0xff] }
 0x6b2   :  { %4064 = vmatpush1.bf16.msra.mxu0 %v11405_v6  ;;  %4105 = vmatpush1.bf16.msra.mxu1 %v11407_v13 }
 0x6b3   :  { %4065 = vmatprep.subr.bf16.mxu0 %v11413_v8  ;;  %4106 = vmatprep.subr.bf16.mxu1 %v11415_v37 }
 0x6b6   :  { %4066 = vmatpush1.bf16.msra.mxu0 %v11417_v0  ;;  %4107 = vmatpush1.bf16.msra.mxu1 %v11419_v7 }
 0x6b7   :  { %4067 = vmatprep.subr.bf16.mxu0 %v11425_v14  ;;  %4108 = vmatprep.subr.bf16.mxu1 %v11427_v16 }
 0x6ba   :  { %4068 = vmatpush1.bf16.msra.mxu0 %v11429_v17  ;;  %4109 = vmatpush1.bf16.msra.mxu1 %v11431_v18 }
 0x6bb   :  { %4069 = vmatprep.subr.bf16.mxu0 %v11437_v19  ;;  %4110 = vmatprep.subr.bf16.mxu1 %v11439_v20 }
 0x6be   :  { %4070 = vmatpush1.bf16.msra.mxu0 %v11441_v21  ;;  %4111 = vmatpush1.bf16.msra.mxu1 %v11443_v23 }
 0x6bf   :  { %4071 = vmatprep.subr.bf16.mxu0 %v11449_v25  ;;  %4112 = vmatprep.subr.bf16.mxu1 %v11451_v26 }
 0x6c2   :  { %4072 = vmatpush1.bf16.msra.mxu0 %v11453_v27  ;;  %4113 = vmatpush1.bf16.msra.mxu1 %v11455_v28 }
 0x6c3   :  { %4073 = vmatprep.subr.bf16.mxu0 %v11461_v29  ;;  %4114 = vmatprep.subr.bf16.mxu1 %v11463_v30 }
 0x6c6   :  { %4074 = vmatpush1.bf16.msra.mxu0 %v11465_v31  ;;  %4115 = vmatpush1.bf16.msra.mxu1 %v11467_v32 }
 0x6c7   :  { %4075 = vmatprep.subr.bf16.mxu0 %v11473_v33  ;;  %4116 = vmatprep.subr.bf16.mxu1 %v11475_v34 }
 0x6ca   :  { %4076 = vmatpush1.bf16.msra.mxu0 %v11477_v38  ;;  %4117 = vmatpush1.bf16.msra.mxu1 %v11479_v40 }
 0x6cb   :  { %4077 = vmatprep.subr.bf16.mxu0 %v11485_v41  ;;  %4118 = vmatprep.subr.bf16.mxu1 %v11487_v43 }
 0x6ce   :  { %4078 = vmatpush1.bf16.msra.mxu0 %v11489_v44  ;;  %4119 = vmatpush1.bf16.msra.mxu1 %v11491_v45 }
 0x6cf   :  { %4079 = vmatprep.subr.bf16.mxu0 %v11497_v46  ;;  %4120 = vmatprep.subr.bf16.mxu1 %v11499_v57 }
 0x6d2   :  { %4080 = vmatpush2.bf16.msra.mxu0 %v11501_v58  ;;  %4121 = vmatpush2.bf16.msra.mxu1 %v11503_v61 }
 0x6d3   :  { %4081 = vmatprep.subr.bf16.mxu0 %v11509_v62  ;;  %4122 = vmatprep.subr.bf16.mxu1 %v11511_v36 }
 0x6d6   :  { %4082 = vmatpush2.bf16.msra.mxu0 %v11513_v47  ;;  %4123 = vmatpush2.bf16.msra.mxu1 %v11515_v1 }
 0x6d7   :  { %4083 = vmatprep.subr.bf16.mxu0 %v11521_v48  ;;  %4124 = vmatprep.subr.bf16.mxu1 %v11523_v51 }
 0x6da   :  { %4084 = vmatpush2.bf16.msra.mxu0 %v11525_v60  ;;  %4125 = vmatpush2.bf16.msra.mxu1 %v11527_v49 }
 0x6db   :  { %4085 = vmatprep.subr.bf16.mxu0 %v12845_v2  ;;  %4126 = vmatprep.subr.bf16.mxu1 %v12846_v63 }
 0x6de   :  { %4086 = vmatpush2.bf16.msra.mxu0 %v12847_v59  ;;  %4127 = vmatpush2.bf16.msra.mxu1 %v12848_v4 }
 0x6df   :  { %4087 = vmatprep.subr.bf16.mxu0 %v12849_v55  ;;  %4128 = vmatprep.subr.bf16.mxu1 %v12850_v3 }
 0x6e2   :  { %4088 = vmatpush2.bf16.msra.mxu0 %v12851_v15  ;;  %4129 = vmatpush2.bf16.msra.mxu1 %v12852_v42 }
 0x6e3   :  { %4089 = vmatprep.subr.bf16.mxu0 %v12853_v54  ;;  %4130 = vmatprep.subr.bf16.mxu1 %v12854_v11 }
 0x6e6   :  { %4090 = vmatpush2.bf16.msra.mxu0 %v12855_v52  ;;  %4131 = vmatpush2.bf16.msra.mxu1 %v12856_v24  ;;  %v12866_v52 = vld [vmem:[#allocation32_spill] sm:$0xff]  ;;  %v3669_v24 = vld [vmem:[#allocation4 + $0x1c] sm:$0xf] }
 0x6e7   :  { %4091 = vmatprep.subr.bf16.mxu0 %v12857_v53  ;;  %4132 = vmatprep.subr.bf16.mxu1 %v12858_v5  ;;  %3670 = vst [vmem:[#allocation2] sm:$0xf] %v3669_v24  ;;  %v11668_v53 = vld [vmem:[#allocation10] sm:$0xff] }
 0x6e8   :  { %12867 = vst [vmem:[#allocation33_spill] sm:$0xff] %v11668_v53 }
 0x6ea   :  { %4092 = vmatpush2.bf16.msra.mxu0 %v12859_v22  ;;  %4133 = vmatpush2.bf16.msra.mxu1 %v12860_v35 }
 0x6eb   :  { %4093 = vmatprep.subr.bf16.mxu0 %v12861_v39  ;;  %4134 = vmatprep.subr.bf16.mxu1 %v12862_v56  ;;  %v11671_v56 = vld [vmem:[#allocation10 + $0x8] sm:$0xff] }
 0x6ec   :  { %12868 = vst [vmem:[#allocation34_spill] sm:$0xff] %v11671_v56 }
 0x6ee   :  { %4094 = vmatpush2.bf16.msra.mxu0 %v12863_v12  ;;  %4135 = vmatpush2.bf16.msra.mxu1 %v12864_v10 }
 0x6ef   :  { %4571 = vmatprep.subr.bf16.mxu0 %v12865_v9  ;;  %4612 = vmatprep.subr.bf16.mxu1 %v12866_v52 }
 0x771   :  { %v3589_v5 = vpop.f32.mrf.mxu0  ;;  %v3630_v22 = vpop.f32.mrf.mxu1 }
 0x772   :  { %v3639_v35 = vadd.f32 %v11668_v53, %v3589_v5  ;;  %v11677_v5 = vld [vmem:[%s12535_s5] sm:$0xff] }
 0x773   :  { %v3591_v11 = vpop.f32.mrf.mxu0  ;;  %v3632_v39 = vpop.f32.mrf.mxu1  ;;  %12869 = vst [vmem:[#allocation35_spill] sm:$0xff] %v11677_v5  ;;  %v11679_v53 = vld [vmem:[#allocation12] sm:$0xff] }
 0x774   :  { %v8957_v54 = vmul.f32 -1.442695, %v3639_v35  ;;  %v3640_v52 = vadd.f32 %v11671_v56, %v3591_v11 }
 0x775   :  { %v3593_v12 = vpop.f32.mrf.mxu0  ;;  %v3634_v42 = vpop.f32.mrf.mxu1 }
 0x776   :  { %10334 = vpow2.f32 %v8957_v54  ;;  %v8958_v15 = vmul.f32 -1.442695, %v3640_v52  ;;  %v3656_v42 = vadd.f32 %v11677_v5, %v3632_v39  ;;  %v3654_v12 = vadd.f32 %v11679_v53, %v3630_v22 }
 0x777   :  { %v3594_v10 = vpop.f32.mrf.mxu0  ;;  %v3635_v9 = vpop.f32.mrf.mxu1 }
 0x778   :  { %10336 = vpow2.f32 %v8958_v15 }
 0x783   :  { %v10335_v24 = vpop.eup %10334 }
 0x784   :  { %v3647_v3 = vadd.f32 1.0, %v10335_v24 }
 0x785   :  { %v10337_v55 = vpop.eup %10336 }
 0x786   :  { %10338 = vrcp.f32 %v3647_v3  ;;  %v3648_v35 = vadd.f32 1.0, %v10337_v55 }
 0x788   :  { %10340 = vrcp.f32 %v3648_v35 }
 0x793   :  { %v10339_v54 = vpop.eup %10338 }
 0x794   :  { %v3657_v11 = vmul.f32 %v10339_v54, %v3656_v42 }
 0x795   :  { %v10341_v10 = vpop.eup %10340 }
 0x796   :  { %v3658_v15 = vadd.f32 %v3657_v11, %v3654_v12  ;;  %v3660_v3 = vsub.f32 1.0, %v10341_v10  ;;  %v3662_v52 = vmul.f32 %v10341_v10, %v11600_v50  ;;  %v11759_v11 = vld [vmem:[#allocation9 + $0xe4] ss:$16 sps:$4 sm:$0xff]   ;;  %v11763_v10 = vld [vmem:[#allocation9 + $0xe0] ss:$16 sps:$4 sm:$0xff]  }
 0x797   :  { %v11929_v50 = vld [vmem:[#allocation9 + $0x124] ss:$16 sps:$4 sm:$0xff]  }
 0x798   :  { %10342 = vtanh.f32 %v3658_v15  ;;  %v11761_v15 = vld [vmem:[#allocation9 + $0xec] ss:$16 sps:$4 sm:$0xff]  }
 0x7a5   :  { %v10343_v9 = vpop.eup %10342 }
 0x7a6   :  { %v3661_v24 = vmul.f32 %v10343_v9, %v3660_v3  ;;  %v11765_v3 = vld [vmem:[#allocation9 + $0xe8] ss:$16 sps:$4 sm:$0xff]   ;;  %v11771_v9 = vld [vmem:[#allocation9 + $0xc4] ss:$16 sps:$4 sm:$0xff]  }
 0x7a8   :  { %v11684_v56 = vadd.f32 %v3662_v52, %v3661_v24  ;;  %v11773_v52 = vld [vmem:[#allocation9 + $0xcc] ss:$16 sps:$4 sm:$0xff]   ;;  %v11775_v24 = vld [vmem:[#allocation9 + $0xc0] ss:$16 sps:$4 sm:$0xff]  }
 0x7aa   :  { %12870 = vst [vmem:[#allocation31_spill] sm:$0xff] %v11684_v56  ;;  %v3664_v55 = vpack.c.bf16 %v11684_v56, %v11684_v56 }
 0x7ac   :  { %3665 = vst [vmem:[#allocation2 + $0x4] sm:$0xf] %v3664_v55  ;;  %v11777_v55 = vld [vmem:[#allocation9 + $0xc8] ss:$16 sps:$4 sm:$0xff]  }
 0x7b3   :  { %v3671_v39 = vld [vmem:[#allocation2] sm:$0xff] }
 0x7b4   :  { %v8960_v5 = vcombine.high %v3671_v39, %v3671_v39  ;;  %v8959_v4 = vcombine.low %v3671_v39, %v3671_v39  ;;  %v11783_v39 = vld [vmem:[#allocation9 + $0xa4] ss:$16 sps:$4 sm:$0xff]  }
 0x7b6   :  { %4095 = vmatprep.mubr.bf16.mxu0 %v8960_v5  ;;  %4136 = vmatprep.mubr.bf16.mxu1 %v8960_v5 }
 0x7b7   :  { %4096 = vmatmul.mubr.bf16.vlgmr.msra.gmra.mxu0 %v8959_v4  ;;  %4137 = vmatmul.mubr.bf16.vlgmr.msra.gmra.mxu1 %v8959_v4 }
 0x7b8   :  { %4572 = vmatpush1.bf16.msra.mxu0 %v11405_v6  ;;  %4613 = vmatpush1.bf16.msra.mxu1 %v11407_v13  ;;  %v12871_v6 = vld [vmem:[#allocation36_spill] sm:$0xff]  ;;  %v12872_v13 = vld [vmem:[#allocation37_spill] sm:$0xff] }
 0x7b9   :  { %4573 = vmatprep.subr.bf16.mxu0 %v11413_v8  ;;  %4614 = vmatprep.subr.bf16.mxu1 %v11415_v37  ;;  %v12873_v8 = vld [vmem:[#allocation38_spill] sm:$0xff]  ;;  %v12874_v37 = vld [vmem:[#allocation39_spill] sm:$0xff]  ;;  %12892 = vst [vmem:[#allocation36_spill] sm:$0xff] %v11759_v11  ;;  %12893 = vst [vmem:[#allocation37_spill] sm:$0xff] %v11761_v15 }
 0x7bc   :  { %4574 = vmatpush1.bf16.msra.mxu0 %v11417_v0  ;;  %4615 = vmatpush1.bf16.msra.mxu1 %v11419_v7  ;;  %v12875_v0 = vld [vmem:[#allocation40_spill] sm:$0xff]  ;;  %v12876_v7 = vld [vmem:[#allocation41_spill] sm:$0xff] }
 0x7bd   :  { %4575 = vmatprep.subr.bf16.mxu0 %v11425_v14  ;;  %4616 = vmatprep.subr.bf16.mxu1 %v11427_v16  ;;  %v12877_v14 = vld [vmem:[#allocation42_spill] sm:$0xff]  ;;  %v12878_v16 = vld [vmem:[#allocation43_spill] sm:$0xff] }
 0x7c0   :  { %4576 = vmatpush1.bf16.msra.mxu0 %v11429_v17  ;;  %4617 = vmatpush1.bf16.msra.mxu1 %v11431_v18  ;;  %v12879_v17 = vld [vmem:[#allocation44_spill] sm:$0xff]  ;;  %v12880_v18 = vld [vmem:[#allocation45_spill] sm:$0xff] }
 0x7c1   :  { %4577 = vmatprep.subr.bf16.mxu0 %v11437_v19  ;;  %4618 = vmatprep.subr.bf16.mxu1 %v11439_v20  ;;  %v12881_v19 = vld [vmem:[#allocation46_spill] sm:$0xff]  ;;  %v12882_v20 = vld [vmem:[#allocation47_spill] sm:$0xff] }
 0x7c4   :  { %4578 = vmatpush1.bf16.msra.mxu0 %v11441_v21  ;;  %4619 = vmatpush1.bf16.msra.mxu1 %v11443_v23  ;;  %v12883_v21 = vld [vmem:[#allocation28_spill] sm:$0xff]  ;;  %v12884_v23 = vld [vmem:[#allocation29_spill] sm:$0xff] }
 0x7c5   :  { %4579 = vmatprep.subr.bf16.mxu0 %v11449_v25  ;;  %4620 = vmatprep.subr.bf16.mxu1 %v11451_v26  ;;  %v12885_v25 = vld [vmem:[#allocation30_spill] sm:$0xff]  ;;  %v12886_v26 = vld [vmem:[#allocation49_spill] sm:$0xff] }
 0x7c6   :  { %12907 = vst [vmem:[#allocation49_spill] sm:$0xff] %v11929_v50 }
 0x7c8   :  { %4580 = vmatpush1.bf16.msra.mxu0 %v11453_v27  ;;  %4621 = vmatpush1.bf16.msra.mxu1 %v11455_v28  ;;  %v12887_v27 = vld [vmem:[#allocation50_spill] sm:$0xff]  ;;  %v4177_v28 = vld [vmem:[#allocation4 + $0x20] sm:$0xf] }
 0x7c9   :  { %4581 = vmatprep.subr.bf16.mxu0 %v11461_v29  ;;  %4622 = vmatprep.subr.bf16.mxu1 %v11463_v30  ;;  %4178 = vst [vmem:[#allocation2] sm:$0xf] %v4177_v28  ;;  %v11835_v28 = vld [vmem:[#allocation9 + $0x20] ss:$16 sps:$4 sm:$0xff]  }
 0x7cc   :  { %4582 = vmatpush1.bf16.msra.mxu0 %v11465_v31  ;;  %4623 = vmatpush1.bf16.msra.mxu1 %v11467_v32  ;;  %v12888_v31 = vld [vmem:[#allocation33_spill] sm:$0xff] }
 0x7cd   :  { %4583 = vmatprep.subr.bf16.mxu0 %v11473_v33  ;;  %4624 = vmatprep.subr.bf16.mxu1 %v11475_v34 }
 0x7d0   :  { %4584 = vmatpush1.bf16.msra.mxu0 %v11477_v38  ;;  %4625 = vmatpush1.bf16.msra.mxu1 %v11479_v40 }
 0x7d1   :  { %4585 = vmatprep.subr.bf16.mxu0 %v11485_v41  ;;  %4626 = vmatprep.subr.bf16.mxu1 %v11487_v43 }
 0x7d4   :  { %4586 = vmatpush1.bf16.msra.mxu0 %v11489_v44  ;;  %4627 = vmatpush1.bf16.msra.mxu1 %v11491_v45  ;;  %v12889_v45 = vld [vmem:[#allocation34_spill] sm:$0xff] }
 0x7d5   :  { %4587 = vmatprep.subr.bf16.mxu0 %v11497_v46  ;;  %4628 = vmatprep.subr.bf16.mxu1 %v11499_v57 }
 0x7d8   :  { %4588 = vmatpush2.bf16.msra.mxu0 %v11501_v58  ;;  %4629 = vmatpush2.bf16.msra.mxu1 %v11503_v61 }
 0x7d9   :  { %4589 = vmatprep.subr.bf16.mxu0 %v11509_v62  ;;  %4630 = vmatprep.subr.bf16.mxu1 %v11511_v36 }
 0x7dc   :  { %4590 = vmatpush2.bf16.msra.mxu0 %v11513_v47  ;;  %4631 = vmatpush2.bf16.msra.mxu1 %v11515_v1  ;;  %v12890_v47 = vld [vmem:[#allocation35_spill] sm:$0xff] }
 0x7dd   :  { %4591 = vmatprep.subr.bf16.mxu0 %v11521_v48  ;;  %4632 = vmatprep.subr.bf16.mxu1 %v11523_v51 }
 0x7e0   :  { %4592 = vmatpush2.bf16.msra.mxu0 %v11525_v60  ;;  %4633 = vmatpush2.bf16.msra.mxu1 %v11527_v49 }
 0x7e1   :  { %4593 = vmatprep.subr.bf16.mxu0 %v12845_v2  ;;  %4634 = vmatprep.subr.bf16.mxu1 %v12846_v63 }
 0x7e4   :  { %4594 = vmatpush2.bf16.msra.mxu0 %v12847_v59  ;;  %4635 = vmatpush2.bf16.msra.mxu1 %v12871_v6  ;;  %v11785_v6 = vld [vmem:[#allocation9 + $0xac] ss:$16 sps:$4 sm:$0xff]  }
 0x7e5   :  { %4595 = vmatprep.subr.bf16.mxu0 %v12872_v13  ;;  %4636 = vmatprep.subr.bf16.mxu1 %v12873_v8  ;;  %v11787_v13 = vld [vmem:[#allocation9 + $0xa0] ss:$16 sps:$4 sm:$0xff]   ;;  %v11789_v8 = vld [vmem:[#allocation9 + $0xa8] ss:$16 sps:$4 sm:$0xff]  }
 0x7e8   :  { %4596 = vmatpush2.bf16.msra.mxu0 %v12874_v37  ;;  %4637 = vmatpush2.bf16.msra.mxu1 %v12875_v0  ;;  %v11795_v37 = vld [vmem:[#allocation9 + $0x84] ss:$16 sps:$4 sm:$0xff]   ;;  %v11797_v0 = vld [vmem:[#allocation9 + $0x8c] ss:$16 sps:$4 sm:$0xff]  }
 0x7e9   :  { %4597 = vmatprep.subr.bf16.mxu0 %v12876_v7  ;;  %4638 = vmatprep.subr.bf16.mxu1 %v12877_v14  ;;  %v11799_v7 = vld [vmem:[#allocation9 + $0x80] ss:$16 sps:$4 sm:$0xff]   ;;  %v11801_v14 = vld [vmem:[#allocation9 + $0x88] ss:$16 sps:$4 sm:$0xff]  }
 0x7ec   :  { %4598 = vmatpush2.bf16.msra.mxu0 %v12878_v16  ;;  %4639 = vmatpush2.bf16.msra.mxu1 %v12879_v17  ;;  %v11807_v16 = vld [vmem:[#allocation9 + $0x64] ss:$16 sps:$4 sm:$0xff]   ;;  %v11809_v17 = vld [vmem:[#allocation9 + $0x6c] ss:$16 sps:$4 sm:$0xff]  }
 0x7ed   :  { %4599 = vmatprep.subr.bf16.mxu0 %v12880_v18  ;;  %4640 = vmatprep.subr.bf16.mxu1 %v12881_v19  ;;  %v11811_v18 = vld [vmem:[#allocation9 + $0x60] ss:$16 sps:$4 sm:$0xff]   ;;  %v11813_v19 = vld [vmem:[#allocation9 + $0x68] ss:$16 sps:$4 sm:$0xff]  }
 0x7f0   :  { %4600 = vmatpush2.bf16.msra.mxu0 %v12882_v20  ;;  %4641 = vmatpush2.bf16.msra.mxu1 %v12883_v21  ;;  %v11819_v20 = vld [vmem:[#allocation9 + $0x44] ss:$16 sps:$4 sm:$0xff]   ;;  %v11821_v21 = vld [vmem:[#allocation9 + $0x4c] ss:$16 sps:$4 sm:$0xff]  }
 0x7f1   :  { %4601 = vmatprep.subr.bf16.mxu0 %v12884_v23  ;;  %4642 = vmatprep.subr.bf16.mxu1 %v12885_v25  ;;  %v11823_v23 = vld [vmem:[#allocation9 + $0x40] ss:$16 sps:$4 sm:$0xff]   ;;  %v11825_v25 = vld [vmem:[#allocation9 + $0x48] ss:$16 sps:$4 sm:$0xff]  }
 0x7f4   :  { %4602 = vmatpush2.bf16.msra.mxu0 %v12886_v26  ;;  %4643 = vmatpush2.bf16.msra.mxu1 %v12887_v27  ;;  %v11831_v26 = vld [vmem:[#allocation9 + $0x24] ss:$16 sps:$4 sm:$0xff]   ;;  %v11833_v27 = vld [vmem:[#allocation9 + $0x2c] ss:$16 sps:$4 sm:$0xff]  }
 0x7f5   :  { %5079 = vmatprep.subr.bf16.mxu0 %v11759_v11  ;;  %5120 = vmatprep.subr.bf16.mxu1 %v11761_v15 }
 0x877   :  { %v4097_v29 = vpop.f32.mrf.mxu0  ;;  %v4138_v30 = vpop.f32.mrf.mxu1 }
 0x878   :  { %v4147_v32 = vadd.f32 %v4097_v29, %v12888_v31  ;;  %v4162_v51 = vadd.f32 %v4138_v30, %v11679_v53  ;;  %v11837_v29 = vld [vmem:[#allocation9 + $0x28] ss:$16 sps:$4 sm:$0xff]   ;;  %v11843_v30 = vld [vmem:[#allocation9 + $0x4] ss:$16 sps:$4 sm:$0xff]  }
 0x879   :  { %v4099_v33 = vpop.f32.mrf.mxu0  ;;  %v4140_v34 = vpop.f32.mrf.mxu1 }
 0x87a   :  { %v9025_v38 = vmul.f32 -1.442695, %v4147_v32  ;;  %v4148_v46 = vadd.f32 %v4099_v33, %v12889_v45  ;;  %v4164_v1 = vadd.f32 %v4140_v34, %v12890_v47  ;;  %v11845_v32 = vld [vmem:[#allocation9 + $0xc] ss:$16 sps:$4 sm:$0xff]   ;;  %v11847_v33 = vld [vmem:[#allocation9] ss:$16 sps:$4 sm:$0xff]  }
 0x87b   :  { %v4101_v40 = vpop.f32.mrf.mxu0  ;;  %v4142_v41 = vpop.f32.mrf.mxu1  ;;  %v11849_v34 = vld [vmem:[#allocation9 + $0x8] ss:$16 sps:$4 sm:$0xff]  }
 0x87c   :  { %10344 = vpow2.f32 %v9025_v38  ;;  %v9026_v57 = vmul.f32 -1.442695, %v4148_v46  ;;  %v11855_v38 = vld [vmem:[#allocation9 + $0x1e4] ss:$16 sps:$4 sm:$0xff]   ;;  %v11857_v40 = vld [vmem:[#allocation9 + $0x1ec] ss:$16 sps:$4 sm:$0xff]  }
 0x87d   :  { %v4102_v43 = vpop.f32.mrf.mxu0  ;;  %v4143_v44 = vpop.f32.mrf.mxu1  ;;  %v11859_v41 = vld [vmem:[#allocation9 + $0x1e0] ss:$16 sps:$4 sm:$0xff]   ;;  %v11869_v46 = vld [vmem:[#allocation9 + $0x1cc] ss:$16 sps:$4 sm:$0xff]  }
 0x87e   :  { %10346 = vpow2.f32 %v9026_v57  ;;  %v11861_v43 = vld [vmem:[#allocation9 + $0x1e8] ss:$16 sps:$4 sm:$0xff]   ;;  %v11867_v44 = vld [vmem:[#allocation9 + $0x1c4] ss:$16 sps:$4 sm:$0xff]   ;;  %v11871_v57 = vld [vmem:[#allocation9 + $0x1c0] ss:$16 sps:$4 sm:$0xff]  }
 0x889   :  { %v10345_v58 = vpop.eup %10344 }
 0x88a   :  { %v4155_v61 = vadd.f32 1.0, %v10345_v58  ;;  %v11873_v58 = vld [vmem:[#allocation9 + $0x1c8] ss:$16 sps:$4 sm:$0xff]  }
 0x88b   :  { %v10347_v62 = vpop.eup %10346 }
 0x88c   :  { %10348 = vrcp.f32 %v4155_v61  ;;  %v4156_v36 = vadd.f32 1.0, %v10347_v62  ;;  %v11879_v61 = vld [vmem:[#allocation9 + $0x1a4] ss:$16 sps:$4 sm:$0xff]   ;;  %v11881_v62 = vld [vmem:[#allocation9 + $0x1ac] ss:$16 sps:$4 sm:$0xff]  }
 0x88e   :  { %10350 = vrcp.f32 %v4156_v36  ;;  %v11883_v36 = vld [vmem:[#allocation9 + $0x1a0] ss:$16 sps:$4 sm:$0xff]  }
 0x899   :  { %v10349_v48 = vpop.eup %10348 }
 0x89a   :  { %v4165_v60 = vmul.f32 %v10349_v48, %v4164_v1  ;;  %v11885_v1 = vld [vmem:[#allocation9 + $0x1a8] ss:$16 sps:$4 sm:$0xff]   ;;  %v11891_v48 = vld [vmem:[#allocation9 + $0x184] ss:$16 sps:$4 sm:$0xff]  }
 0x89b   :  { %v10351_v2 = vpop.eup %10350  ;;  %12894 = vst [vmem:[#allocation38_spill] sm:$0xff] %v11891_v48 }
 0x89c   :  { %v4166_v49 = vadd.f32 %v4165_v60, %v4162_v51  ;;  %v4168_v63 = vsub.f32 1.0, %v10351_v2  ;;  %v4170_v4 = vmul.f32 %v10351_v2, %v11684_v56  ;;  %v11893_v51 = vld [vmem:[#allocation9 + $0x18c] ss:$16 sps:$4 sm:$0xff]   ;;  %v11895_v60 = vld [vmem:[#allocation9 + $0x180] ss:$16 sps:$4 sm:$0xff]  }
 0x89d   :  { %12895 = vst [vmem:[#allocation39_spill] sm:$0xff] %v11893_v51  ;;  %12896 = vst [vmem:[#allocation40_spill] sm:$0xff] %v11895_v60  ;;  %v11903_v2 = vld [vmem:[#allocation9 + $0x164] ss:$16 sps:$4 sm:$0xff]   ;;  %v11927_v56 = vld [vmem:[#allocation9 + $0x120] ss:$16 sps:$4 sm:$0xff]  }
 0x89e   :  { %10352 = vtanh.f32 %v4166_v49  ;;  %v11897_v49 = vld [vmem:[#allocation9 + $0x188] ss:$16 sps:$4 sm:$0xff]   ;;  %12898 = vst [vmem:[#allocation42_spill] sm:$0xff] %v11903_v2  ;;  %12906 = vst [vmem:[#allocation30_spill] sm:$0xff] %v11927_v56 }
 0x89f   :  { %12897 = vst [vmem:[#allocation41_spill] sm:$0xff] %v11897_v49 }
 0x8ab   :  { %v10353_v59 = vpop.eup %10352 }
 0x8ac   :  { %v4169_v22 = vmul.f32 %v10353_v59, %v4168_v63  ;;  %v11905_v63 = vld [vmem:[#allocation9 + $0x16c] ss:$16 sps:$4 sm:$0xff]   ;;  %v11907_v59 = vld [vmem:[#allocation9 + $0x160] ss:$16 sps:$4 sm:$0xff]  }
 0x8ad   :  { %12899 = vst [vmem:[#allocation43_spill] sm:$0xff] %v11905_v63  ;;  %12900 = vst [vmem:[#allocation44_spill] sm:$0xff] %v11907_v59 }
 0x8ae   :  { %v11755_v5 = vadd.f32 %v4170_v4, %v4169_v22  ;;  %v11909_v4 = vld [vmem:[#allocation9 + $0x168] ss:$16 sps:$4 sm:$0xff]   ;;  %v11915_v22 = vld [vmem:[#allocation9 + $0x144] ss:$16 sps:$4 sm:$0xff]  }
 0x8af   :  { %12901 = vst [vmem:[#allocation45_spill] sm:$0xff] %v11909_v4  ;;  %12902 = vst [vmem:[#allocation46_spill] sm:$0xff] %v11915_v22 }
 0x8b0   :  { %12891 = vst [vmem:[#allocation32_spill] sm:$0xff] %v11755_v5  ;;  %v4172_v35 = vpack.c.bf16 %v11755_v5, %v11755_v5 }
 0x8b2   :  { %4173 = vst [vmem:[#allocation2 + $0x4] sm:$0xf] %v4172_v35  ;;  %v11917_v35 = vld [vmem:[#allocation9 + $0x14c] ss:$16 sps:$4 sm:$0xff]  }
 0x8b3   :  { %12903 = vst [vmem:[#allocation47_spill] sm:$0xff] %v11917_v35 }
 0x8b9   :  { %v4179_v42 = vld [vmem:[#allocation2] sm:$0xff] }
 0x8ba   :  { %v9028_v54 = vcombine.high %v4179_v42, %v4179_v42  ;;  %v9027_v12 = vcombine.low %v4179_v42, %v4179_v42  ;;  %v11919_v42 = vld [vmem:[#allocation9 + $0x140] ss:$16 sps:$4 sm:$0xff]  }
 0x8bb   :  { %12904 = vst [vmem:[#allocation28_spill] sm:$0xff] %v11919_v42 }
 0x8bc   :  { %4603 = vmatprep.mubr.bf16.mxu0 %v9028_v54  ;;  %4644 = vmatprep.mubr.bf16.mxu1 %v9028_v54  ;;  %v11921_v54 = vld [vmem:[#allocation9 + $0x148] ss:$16 sps:$4 sm:$0xff]  }
 0x8bd   :  { %4604 = vmatmul.mubr.bf16.vlgmr.msra.gmra.mxu0 %v9027_v12  ;;  %4645 = vmatmul.mubr.bf16.vlgmr.msra.gmra.mxu1 %v9027_v12  ;;  %12905 = vst [vmem:[#allocation29_spill] sm:$0xff] %v11921_v54  ;;  %v4685_v12 = vld [vmem:[#allocation4 + $0x24] sm:$0xf] }
 0x8be   :  { %5080 = vmatpush1.bf16.msra.mxu0 %v11763_v10  ;;  %5121 = vmatpush1.bf16.msra.mxu1 %v11765_v3  ;;  %4686 = vst [vmem:[#allocation2] sm:$0xf] %v4685_v12 }
 0x8bf   :  { %5081 = vmatprep.subr.bf16.mxu0 %v11771_v9  ;;  %5122 = vmatprep.subr.bf16.mxu1 %v11773_v52 }
 0x8c2   :  { %5082 = vmatpush1.bf16.msra.mxu0 %v11775_v24  ;;  %5123 = vmatpush1.bf16.msra.mxu1 %v11777_v55 }
 0x8c3   :  { %5083 = vmatprep.subr.bf16.mxu0 %v11783_v39  ;;  %5124 = vmatprep.subr.bf16.mxu1 %v11785_v6 }
 0x8c6   :  { %5084 = vmatpush1.bf16.msra.mxu0 %v11787_v13  ;;  %5125 = vmatpush1.bf16.msra.mxu1 %v11789_v8 }
 0x8c7   :  { %5085 = vmatprep.subr.bf16.mxu0 %v11795_v37  ;;  %5126 = vmatprep.subr.bf16.mxu1 %v11797_v0 }
 0x8ca   :  { %5086 = vmatpush1.bf16.msra.mxu0 %v11799_v7  ;;  %5127 = vmatpush1.bf16.msra.mxu1 %v11801_v14 }
 0x8cb   :  { %5087 = vmatprep.subr.bf16.mxu0 %v11807_v16  ;;  %5128 = vmatprep.subr.bf16.mxu1 %v11809_v17 }
 0x8ce   :  { %5088 = vmatpush1.bf16.msra.mxu0 %v11811_v18  ;;  %5129 = vmatpush1.bf16.msra.mxu1 %v11813_v19 }
 0x8cf   :  { %5089 = vmatprep.subr.bf16.mxu0 %v11819_v20  ;;  %5130 = vmatprep.subr.bf16.mxu1 %v11821_v21 }
 0x8d2   :  { %5090 = vmatpush1.bf16.msra.mxu0 %v11823_v23  ;;  %5131 = vmatpush1.bf16.msra.mxu1 %v11825_v25 }
 0x8d3   :  { %5091 = vmatprep.subr.bf16.mxu0 %v11831_v26  ;;  %5132 = vmatprep.subr.bf16.mxu1 %v11833_v27 }
 0x8d6   :  { %5092 = vmatpush1.bf16.msra.mxu0 %v11835_v28  ;;  %5133 = vmatpush1.bf16.msra.mxu1 %v11837_v29 }
 0x8d7   :  { %5093 = vmatprep.subr.bf16.mxu0 %v11843_v30  ;;  %5134 = vmatprep.subr.bf16.mxu1 %v11845_v32 }
 0x8da   :  { %5094 = vmatpush1.bf16.msra.mxu0 %v11847_v33  ;;  %5135 = vmatpush1.bf16.msra.mxu1 %v11849_v34 }
 0x8db   :  { %5095 = vmatprep.subr.bf16.mxu0 %v11855_v38  ;;  %5136 = vmatprep.subr.bf16.mxu1 %v11857_v40 }
 0x8de   :  { %5096 = vmatpush2.bf16.msra.mxu0 %v11859_v41  ;;  %5137 = vmatpush2.bf16.msra.mxu1 %v11861_v43 }
 0x8df   :  { %5097 = vmatprep.subr.bf16.mxu0 %v11867_v44  ;;  %5138 = vmatprep.subr.bf16.mxu1 %v11869_v46 }
 0x8e2   :  { %5098 = vmatpush2.bf16.msra.mxu0 %v11871_v57  ;;  %5139 = vmatpush2.bf16.msra.mxu1 %v11873_v58 }
 0x8e3   :  { %5099 = vmatprep.subr.bf16.mxu0 %v11879_v61  ;;  %5140 = vmatprep.subr.bf16.mxu1 %v11881_v62 }
 0x8e6   :  { %5100 = vmatpush2.bf16.msra.mxu0 %v11883_v36  ;;  %5141 = vmatpush2.bf16.msra.mxu1 %v11885_v1 }
 0x8e7   :  { %5101 = vmatprep.subr.bf16.mxu0 %v11891_v48  ;;  %5142 = vmatprep.subr.bf16.mxu1 %v11893_v51 }
 0x8ea   :  { %5102 = vmatpush2.bf16.msra.mxu0 %v11895_v60  ;;  %5143 = vmatpush2.bf16.msra.mxu1 %v11897_v49 }
 0x8eb   :  { %5103 = vmatprep.subr.bf16.mxu0 %v11903_v2  ;;  %5144 = vmatprep.subr.bf16.mxu1 %v11905_v63  ;;  %v11935_v63 = vld [vmem:[#allocation9 + $0x104] ss:$16 sps:$4 sm:$0xff]  }
 0x8ec   :  { %12910 = vst [vmem:[#allocation34_spill] sm:$0xff] %v11935_v63 }
 0x8ee   :  { %5104 = vmatpush2.bf16.msra.mxu0 %v11907_v59  ;;  %5145 = vmatpush2.bf16.msra.mxu1 %v11909_v4  ;;  %v11931_v4 = vld [vmem:[#allocation9 + $0x128] ss:$16 sps:$4 sm:$0xff]   ;;  %v11933_v59 = vld [vmem:[#allocation9 + $0x12c] ss:$16 sps:$4 sm:$0xff]  }
 0x8ef   :  { %5105 = vmatprep.subr.bf16.mxu0 %v11915_v22  ;;  %5146 = vmatprep.subr.bf16.mxu1 %v11917_v35  ;;  %12908 = vst [vmem:[#allocation50_spill] sm:$0xff] %v11931_v4  ;;  %12909 = vst [vmem:[#allocation33_spill] sm:$0xff] %v11933_v59  ;;  %v11938_v22 = vld [vmem:[#allocation9 + $0x10c] ss:$16 sps:$4 sm:$0xff]  }
 0x8f0   :  { %12911 = vst [vmem:[#allocation35_spill] sm:$0xff] %v11938_v22 }
 0x8f2   :  { %5106 = vmatpush2.bf16.msra.mxu0 %v11919_v42  ;;  %5147 = vmatpush2.bf16.msra.mxu1 %v11921_v54  ;;  %v11943_v54 = vld [vmem:[#allocation9 + $0x100] ss:$16 sps:$4 sm:$0xff]   ;;  %v11945_v42 = vld [vmem:[#allocation9 + $0x108] ss:$16 sps:$4 sm:$0xff]  }
 0x8f3   :  { %5107 = vmatprep.subr.bf16.mxu0 %v11929_v50  ;;  %5148 = vmatprep.subr.bf16.mxu1 %v11933_v59  ;;  %12912 = vst [vmem:[#allocation52_spill] sm:$0xff] %v11943_v54  ;;  %12913 = vst [vmem:[#allocation53_spill] sm:$0xff] %v11945_v42 }
 0x8f6   :  { %5108 = vmatpush2.bf16.msra.mxu0 %v11927_v56  ;;  %5149 = vmatpush2.bf16.msra.mxu1 %v11931_v4 }
 0x8f7   :  { %5109 = vmatprep.subr.bf16.mxu0 %v11935_v63  ;;  %5150 = vmatprep.subr.bf16.mxu1 %v11938_v22 }
 0x8fa   :  { %5110 = vmatpush2.bf16.msra.mxu0 %v11943_v54  ;;  %5151 = vmatpush2.bf16.msra.mxu1 %v11945_v42 }
 0x8fb   :  { %5587 = vmatprep.subr.bf16.mxu0 %v11759_v11  ;;  %5628 = vmatprep.subr.bf16.mxu1 %v11761_v15 }
 0x97d   :  { %v4605_v12 = vpop.f32.mrf.mxu0  ;;  %v4646_v56 = vpop.f32.mrf.mxu1 }
 0x97e   :  { %v4655_v4 = vadd.f32 %v4605_v12, %v12888_v31  ;;  %v4670_v12 = vadd.f32 %v4646_v56, %v11679_v53  ;;  %v12915_v53 = vld [vmem:[#allocation38_spill] sm:$0xff]  ;;  %v12916_v56 = vld [vmem:[#allocation39_spill] sm:$0xff] }
 0x97f   :  { %v4607_v59 = vpop.f32.mrf.mxu0  ;;  %v4648_v50 = vpop.f32.mrf.mxu1 }
 0x980   :  { %v9093_v35 = vmul.f32 -1.442695, %v4655_v4  ;;  %v4656_v54 = vadd.f32 %v4607_v59, %v12889_v45  ;;  %v4672_v48 = vadd.f32 %v4648_v50, %v12890_v47 }
 0x981   :  { %v4609_v2 = vpop.f32.mrf.mxu0  ;;  %v4650_v49 = vpop.f32.mrf.mxu1 }
 0x982   :  { %10354 = vpow2.f32 %v9093_v35  ;;  %v9094_v60 = vmul.f32 -1.442695, %v4656_v54  ;;  %v12919_v35 = vld [vmem:[#allocation42_spill] sm:$0xff]  ;;  %v12921_v54 = vld [vmem:[#allocation44_spill] sm:$0xff] }
 0x983   :  { %v4610_v63 = vpop.f32.mrf.mxu0  ;;  %v4651_v22 = vpop.f32.mrf.mxu1 }
 0x984   :  { %10356 = vpow2.f32 %v9094_v60 }
 0x98f   :  { %v10355_v42 = vpop.eup %10354 }
 0x990   :  { %v4663_v11 = vadd.f32 1.0, %v10355_v42  ;;  %v12920_v42 = vld [vmem:[#allocation43_spill] sm:$0xff] }
 0x991   :  { %v10357_v15 = vpop.eup %10356 }
 0x992   :  { %10358 = vrcp.f32 %v4663_v11  ;;  %v4664_v51 = vadd.f32 1.0, %v10357_v15 }
 0x994   :  { %10360 = vrcp.f32 %v4664_v51  ;;  %v12918_v51 = vld [vmem:[#allocation41_spill] sm:$0xff] }
 0x99f   :  { %v10359_v31 = vpop.eup %10358 }
 0x9a0   :  { %v4673_v2 = vmul.f32 %v10359_v31, %v4672_v48  ;;  %v12917_v48 = vld [vmem:[#allocation40_spill] sm:$0xff]  ;;  %v12922_v31 = vld [vmem:[#allocation45_spill] sm:$0xff] }
 0x9a1   :  { %v10361_v63 = vpop.eup %10360 }
 0x9a2   :  { %v4674_v49 = vadd.f32 %v4673_v2, %v4670_v12  ;;  %v4676_v4 = vsub.f32 1.0, %v10361_v63  ;;  %v4678_v45 = vmul.f32 %v10361_v63, %v11755_v5  ;;  %v12923_v12 = vld [vmem:[#allocation46_spill] sm:$0xff]  ;;  %v12924_v2 = vld [vmem:[#allocation47_spill] sm:$0xff]  ;;  %v12926_v63 = vld [vmem:[#allocation29_spill] sm:$0xff] }
 0x9a3   :  { %v12935_v5 = vld [vmem:[#allocation36_spill] sm:$0xff] }
 0x9a4   :  { %10362 = vtanh.f32 %v4674_v49  ;;  %v12925_v49 = vld [vmem:[#allocation28_spill] sm:$0xff] }
 0x9b1   :  { %v10363_v22 = vpop.eup %10362 }
 0x9b2   :  { %v4677_v60 = vmul.f32 %v10363_v22, %v4676_v4  ;;  %v12927_v4 = vld [vmem:[#allocation49_spill] sm:$0xff] }
 0x9b3   :  { %v12928_v22 = vld [vmem:[#allocation33_spill] sm:$0xff] }
 0x9b4   :  { %v11958_v59 = vadd.f32 %v4678_v45, %v4677_v60  ;;  %v12929_v45 = vld [vmem:[#allocation30_spill] sm:$0xff] }
 0x9b5   :  { %v12930_v60 = vld [vmem:[#allocation50_spill] sm:$0xff] }
 0x9b6   :  { %12914 = vst [vmem:[#allocation54_spill] sm:$0xff] %v11958_v59  ;;  %v4680_v11 = vpack.c.bf16 %v11958_v59, %v11958_v59 }
 0x9b8   :  { %4681 = vst [vmem:[#allocation2 + $0x4] sm:$0xf] %v4680_v11  ;;  %v12931_v11 = vld [vmem:[#allocation34_spill] sm:$0xff] }
 0x9bf   :  { %v4687_v50 = vld [vmem:[#allocation2] sm:$0xff] }
 0x9c0   :  { %v9096_v47 = vcombine.high %v4687_v50, %v4687_v50  ;;  %v9095_v15 = vcombine.low %v4687_v50, %v4687_v50  ;;  %v12932_v50 = vld [vmem:[#allocation35_spill] sm:$0xff] }
 0x9c2   :  { %5111 = vmatprep.mubr.bf16.mxu0 %v9096_v47  ;;  %5152 = vmatprep.mubr.bf16.mxu1 %v9096_v47  ;;  %v12933_v47 = vld [vmem:[#allocation52_spill] sm:$0xff] }
 0x9c3   :  { %5112 = vmatmul.mubr.bf16.vlgmr.msra.gmra.mxu0 %v9095_v15  ;;  %5153 = vmatmul.mubr.bf16.vlgmr.msra.gmra.mxu1 %v9095_v15  ;;  %v12934_v15 = vld [vmem:[#allocation53_spill] sm:$0xff] }
 0x9c4   :  { %5588 = vmatpush1.bf16.msra.mxu0 %v11763_v10  ;;  %5629 = vmatpush1.bf16.msra.mxu1 %v11765_v3 }
 0x9c5   :  { %5589 = vmatprep.subr.bf16.mxu0 %v11771_v9  ;;  %5630 = vmatprep.subr.bf16.mxu1 %v11773_v52 }
 0x9c8   :  { %5590 = vmatpush1.bf16.msra.mxu0 %v11775_v24  ;;  %5631 = vmatpush1.bf16.msra.mxu1 %v11777_v55 }
 0x9c9   :  { %5591 = vmatprep.subr.bf16.mxu0 %v11783_v39  ;;  %5632 = vmatprep.subr.bf16.mxu1 %v11785_v6 }
 0x9cc   :  { %5592 = vmatpush1.bf16.msra.mxu0 %v11787_v13  ;;  %5633 = vmatpush1.bf16.msra.mxu1 %v11789_v8 }
 0x9cd   :  { %5593 = vmatprep.subr.bf16.mxu0 %v11795_v37  ;;  %5634 = vmatprep.subr.bf16.mxu1 %v11797_v0 }
 0x9d0   :  { %5594 = vmatpush1.bf16.msra.mxu0 %v11799_v7  ;;  %5635 = vmatpush1.bf16.msra.mxu1 %v11801_v14 }
 0x9d1   :  { %5595 = vmatprep.subr.bf16.mxu0 %v11807_v16  ;;  %5636 = vmatprep.subr.bf16.mxu1 %v11809_v17 }
 0x9d4   :  { %5596 = vmatpush1.bf16.msra.mxu0 %v11811_v18  ;;  %5637 = vmatpush1.bf16.msra.mxu1 %v11813_v19 }
 0x9d5   :  { %5597 = vmatprep.subr.bf16.mxu0 %v11819_v20  ;;  %5638 = vmatprep.subr.bf16.mxu1 %v11821_v21 }
 0x9d8   :  { %5598 = vmatpush1.bf16.msra.mxu0 %v11823_v23  ;;  %5639 = vmatpush1.bf16.msra.mxu1 %v11825_v25 }
 0x9d9   :  { %5599 = vmatprep.subr.bf16.mxu0 %v11831_v26  ;;  %5640 = vmatprep.subr.bf16.mxu1 %v11833_v27 }
 0x9dc   :  { %5600 = vmatpush1.bf16.msra.mxu0 %v11835_v28  ;;  %5641 = vmatpush1.bf16.msra.mxu1 %v11837_v29 }
 0x9dd   :  { %5601 = vmatprep.subr.bf16.mxu0 %v11843_v30  ;;  %5642 = vmatprep.subr.bf16.mxu1 %v11845_v32 }
 0x9e0   :  { %5602 = vmatpush1.bf16.msra.mxu0 %v11847_v33  ;;  %5643 = vmatpush1.bf16.msra.mxu1 %v11849_v34 }
 0x9e1   :  { %5603 = vmatprep.subr.bf16.mxu0 %v11855_v38  ;;  %5644 = vmatprep.subr.bf16.mxu1 %v11857_v40 }
 0x9e4   :  { %5604 = vmatpush2.bf16.msra.mxu0 %v11859_v41  ;;  %5645 = vmatpush2.bf16.msra.mxu1 %v11861_v43 }
 0x9e5   :  { %5605 = vmatprep.subr.bf16.mxu0 %v11867_v44  ;;  %5646 = vmatprep.subr.bf16.mxu1 %v11869_v46 }
 0x9e8   :  { %5606 = vmatpush2.bf16.msra.mxu0 %v11871_v57  ;;  %5647 = vmatpush2.bf16.msra.mxu1 %v11873_v58 }
 0x9e9   :  { %5607 = vmatprep.subr.bf16.mxu0 %v11879_v61  ;;  %5648 = vmatprep.subr.bf16.mxu1 %v11881_v62 }
 0x9ec   :  { %5608 = vmatpush2.bf16.msra.mxu0 %v11883_v36  ;;  %5649 = vmatpush2.bf16.msra.mxu1 %v11885_v1 }
 0x9ed   :  { %5609 = vmatprep.subr.bf16.mxu0 %v12915_v53  ;;  %5650 = vmatprep.subr.bf16.mxu1 %v12916_v56 }
 0x9f0   :  { %5610 = vmatpush2.bf16.msra.mxu0 %v12917_v48  ;;  %5651 = vmatpush2.bf16.msra.mxu1 %v12918_v51 }
 0x9f1   :  { %5611 = vmatprep.subr.bf16.mxu0 %v12919_v35  ;;  %5652 = vmatprep.subr.bf16.mxu1 %v12920_v42 }
 0x9f4   :  { %5612 = vmatpush2.bf16.msra.mxu0 %v12921_v54  ;;  %5653 = vmatpush2.bf16.msra.mxu1 %v12922_v31 }
 0x9f5   :  { %5613 = vmatprep.subr.bf16.mxu0 %v12923_v12  ;;  %5654 = vmatprep.subr.bf16.mxu1 %v12924_v2 }
 0x9f8   :  { %5614 = vmatpush2.bf16.msra.mxu0 %v12925_v49  ;;  %5655 = vmatpush2.bf16.msra.mxu1 %v12926_v63  ;;  %v12936_v49 = vld [vmem:[#allocation37_spill] sm:$0xff]  ;;  %v5193_v63 = vld [vmem:[#allocation4 + $0x28] sm:$0xf] }
 0x9f9   :  { %5615 = vmatprep.subr.bf16.mxu0 %v12927_v4  ;;  %5656 = vmatprep.subr.bf16.mxu1 %v12928_v22  ;;  %5194 = vst [vmem:[#allocation2] sm:$0xf] %v5193_v63  ;;  %v12026_v4 = vld [vmem:[#allocation10] sm:$0xff] }
 0x9fa   :  { %12937 = vst [vmem:[#allocation38_spill] sm:$0xff] %v12026_v4 }
 0x9fc   :  { %5616 = vmatpush2.bf16.msra.mxu0 %v12929_v45  ;;  %5657 = vmatpush2.bf16.msra.mxu1 %v12930_v60 }
 0x9fd   :  { %5617 = vmatprep.subr.bf16.mxu0 %v12931_v11  ;;  %5658 = vmatprep.subr.bf16.mxu1 %v12932_v50  ;;  %v12029_v50 = vld [vmem:[#allocation10 + $0x8] sm:$0xff] }
 0x9fe   :  { %12938 = vst [vmem:[#allocation39_spill] sm:$0xff] %v12029_v50 }
 0xa00   :  { %5618 = vmatpush2.bf16.msra.mxu0 %v12933_v47  ;;  %5659 = vmatpush2.bf16.msra.mxu1 %v12934_v15 }
 0xa01   :  { %6095 = vmatprep.subr.bf16.mxu0 %v12935_v5  ;;  %6136 = vmatprep.subr.bf16.mxu1 %v12936_v49 }
 0xa83   :  { %v5113_v22 = vpop.f32.mrf.mxu0  ;;  %v5154_v45 = vpop.f32.mrf.mxu1 }
 0xa84   :  { %v5163_v60 = vadd.f32 %v12026_v4, %v5113_v22  ;;  %v12035_v22 = vld [vmem:[%s12535_s5] sm:$0xff] }
 0xa85   :  { %v5115_v2 = vpop.f32.mrf.mxu0  ;;  %v5156_v11 = vpop.f32.mrf.mxu1  ;;  %12939 = vst [vmem:[#allocation40_spill] sm:$0xff] %v12035_v22  ;;  %v12037_v4 = vld [vmem:[#allocation12] sm:$0xff] }
 0xa86   :  { %v9161_v12 = vmul.f32 -1.442695, %v5163_v60  ;;  %v5164_v49 = vadd.f32 %v12029_v50, %v5115_v2 }
 0xa87   :  { %v5117_v47 = vpop.f32.mrf.mxu0  ;;  %v5158_v31 = vpop.f32.mrf.mxu1 }
 0xa88   :  { %10364 = vpow2.f32 %v9161_v12  ;;  %v9162_v54 = vmul.f32 -1.442695, %v5164_v49  ;;  %v5180_v31 = vadd.f32 %v12035_v22, %v5156_v11  ;;  %v5178_v47 = vadd.f32 %v12037_v4, %v5154_v45 }
 0xa89   :  { %v5118_v15 = vpop.f32.mrf.mxu0  ;;  %v5159_v5 = vpop.f32.mrf.mxu1 }
 0xa8a   :  { %10366 = vpow2.f32 %v9162_v54 }
 0xa95   :  { %v10365_v63 = vpop.eup %10364 }
 0xa96   :  { %v5171_v42 = vadd.f32 1.0, %v10365_v63 }
 0xa97   :  { %v10367_v35 = vpop.eup %10366 }
 0xa98   :  { %10368 = vrcp.f32 %v5171_v42  ;;  %v5172_v60 = vadd.f32 1.0, %v10367_v35 }
 0xa9a   :  { %10370 = vrcp.f32 %v5172_v60 }
 0xaa5   :  { %v10369_v12 = vpop.eup %10368 }
 0xaa6   :  { %v5181_v2 = vmul.f32 %v10369_v12, %v5180_v31 }
 0xaa7   :  { %v10371_v15 = vpop.eup %10370 }
 0xaa8   :  { %v5182_v54 = vadd.f32 %v5181_v2, %v5178_v47  ;;  %v5184_v42 = vsub.f32 1.0, %v10371_v15  ;;  %v5186_v49 = vmul.f32 %v10371_v15, %v11958_v59  ;;  %v12117_v2 = vld [vmem:[#allocation9 + $0xe4] ss:$16 sps:$4 sm:$0xff]   ;;  %v12121_v15 = vld [vmem:[#allocation9 + $0xe0] ss:$16 sps:$4 sm:$0xff]  }
 0xaa9   :  { %v12287_v59 = vld [vmem:[#allocation9 + $0x124] ss:$16 sps:$4 sm:$0xff]  }
 0xaaa   :  { %10372 = vtanh.f32 %v5182_v54  ;;  %v12119_v54 = vld [vmem:[#allocation9 + $0xec] ss:$16 sps:$4 sm:$0xff]  }
 0xab7   :  { %v10373_v5 = vpop.eup %10372 }
 0xab8   :  { %v5185_v63 = vmul.f32 %v10373_v5, %v5184_v42  ;;  %v12123_v42 = vld [vmem:[#allocation9 + $0xe8] ss:$16 sps:$4 sm:$0xff]   ;;  %v12129_v5 = vld [vmem:[#allocation9 + $0xc4] ss:$16 sps:$4 sm:$0xff]  }
 0xaba   :  { %v12042_v50 = vadd.f32 %v5186_v49, %v5185_v63  ;;  %v12131_v49 = vld [vmem:[#allocation9 + $0xcc] ss:$16 sps:$4 sm:$0xff]   ;;  %v12133_v63 = vld [vmem:[#allocation9 + $0xc0] ss:$16 sps:$4 sm:$0xff]  }
 0xabc   :  { %12940 = vst [vmem:[#allocation36_spill] sm:$0xff] %v12042_v50  ;;  %v5188_v35 = vpack.c.bf16 %v12042_v50, %v12042_v50 }
 0xabe   :  { %5189 = vst [vmem:[#allocation2 + $0x4] sm:$0xf] %v5188_v35  ;;  %v12135_v35 = vld [vmem:[#allocation9 + $0xc8] ss:$16 sps:$4 sm:$0xff]  }
 0xac5   :  { %v5195_v11 = vld [vmem:[#allocation2] sm:$0xff] }
 0xac6   :  { %v9164_v22 = vcombine.high %v5195_v11, %v5195_v11  ;;  %v9163_v51 = vcombine.low %v5195_v11, %v5195_v11  ;;  %v12141_v11 = vld [vmem:[#allocation9 + $0xa4] ss:$16 sps:$4 sm:$0xff]  }
 0xac8   :  { %5619 = vmatprep.mubr.bf16.mxu0 %v9164_v22  ;;  %5660 = vmatprep.mubr.bf16.mxu1 %v9164_v22 }
 0xac9   :  { %5620 = vmatmul.mubr.bf16.vlgmr.msra.gmra.mxu0 %v9163_v51  ;;  %5661 = vmatmul.mubr.bf16.vlgmr.msra.gmra.mxu1 %v9163_v51 }
 0xaca   :  { %6096 = vmatpush1.bf16.msra.mxu0 %v11763_v10  ;;  %6137 = vmatpush1.bf16.msra.mxu1 %v11765_v3  ;;  %v12941_v10 = vld [vmem:[#allocation41_spill] sm:$0xff]  ;;  %v12942_v3 = vld [vmem:[#allocation42_spill] sm:$0xff] }
 0xacb   :  { %6097 = vmatprep.subr.bf16.mxu0 %v11771_v9  ;;  %6138 = vmatprep.subr.bf16.mxu1 %v11773_v52  ;;  %v12943_v9 = vld [vmem:[#allocation43_spill] sm:$0xff]  ;;  %v12944_v52 = vld [vmem:[#allocation44_spill] sm:$0xff]  ;;  %12962 = vst [vmem:[#allocation41_spill] sm:$0xff] %v12117_v2  ;;  %12963 = vst [vmem:[#allocation42_spill] sm:$0xff] %v12119_v54 }
 0xace   :  { %6098 = vmatpush1.bf16.msra.mxu0 %v11775_v24  ;;  %6139 = vmatpush1.bf16.msra.mxu1 %v11777_v55  ;;  %v12945_v24 = vld [vmem:[#allocation45_spill] sm:$0xff]  ;;  %v12946_v55 = vld [vmem:[#allocation46_spill] sm:$0xff] }
 0xacf   :  { %6099 = vmatprep.subr.bf16.mxu0 %v11783_v39  ;;  %6140 = vmatprep.subr.bf16.mxu1 %v11785_v6  ;;  %v12947_v39 = vld [vmem:[#allocation47_spill] sm:$0xff]  ;;  %v12948_v6 = vld [vmem:[#allocation28_spill] sm:$0xff] }
 0xad2   :  { %6100 = vmatpush1.bf16.msra.mxu0 %v11787_v13  ;;  %6141 = vmatpush1.bf16.msra.mxu1 %v11789_v8  ;;  %v12949_v13 = vld [vmem:[#allocation29_spill] sm:$0xff] }
 0xad3   :  { %6101 = vmatprep.subr.bf16.mxu0 %v11795_v37  ;;  %6142 = vmatprep.subr.bf16.mxu1 %v11797_v0  ;;  %v12950_v8 = vld [vmem:[#allocation49_spill] sm:$0xff]  ;;  %v12952_v0 = vld [vmem:[#allocation30_spill] sm:$0xff] }
 0xad4   :  { %v12951_v37 = vld [vmem:[#allocation33_spill] sm:$0xff] }
 0xad6   :  { %6102 = vmatpush1.bf16.msra.mxu0 %v11799_v7  ;;  %6143 = vmatpush1.bf16.msra.mxu1 %v11801_v14  ;;  %v12953_v7 = vld [vmem:[#allocation50_spill] sm:$0xff] }
 0xad7   :  { %6103 = vmatprep.subr.bf16.mxu0 %v11807_v16  ;;  %6144 = vmatprep.subr.bf16.mxu1 %v11809_v17  ;;  %v12954_v14 = vld [vmem:[#allocation34_spill] sm:$0xff]  ;;  %v12955_v16 = vld [vmem:[#allocation35_spill] sm:$0xff]  ;;  %v12956_v17 = vld [vmem:[#allocation52_spill] sm:$0xff] }
 0xad8   :  { %12977 = vst [vmem:[#allocation52_spill] sm:$0xff] %v12287_v59 }
 0xada   :  { %6104 = vmatpush1.bf16.msra.mxu0 %v11811_v18  ;;  %6145 = vmatpush1.bf16.msra.mxu1 %v11813_v19  ;;  %v12957_v18 = vld [vmem:[#allocation53_spill] sm:$0xff]  ;;  %v5701_v19 = vld [vmem:[#allocation4 + $0x2c] sm:$0xf] }
 0xadb   :  { %6105 = vmatprep.subr.bf16.mxu0 %v11819_v20  ;;  %6146 = vmatprep.subr.bf16.mxu1 %v11821_v21  ;;  %5702 = vst [vmem:[#allocation2] sm:$0xf] %v5701_v19  ;;  %v12193_v19 = vld [vmem:[#allocation9 + $0x20] ss:$16 sps:$4 sm:$0xff]  }
 0xade   :  { %6106 = vmatpush1.bf16.msra.mxu0 %v11823_v23  ;;  %6147 = vmatpush1.bf16.msra.mxu1 %v11825_v25  ;;  %v12958_v23 = vld [vmem:[#allocation38_spill] sm:$0xff] }
 0xadf   :  { %6107 = vmatprep.subr.bf16.mxu0 %v11831_v26  ;;  %6148 = vmatprep.subr.bf16.mxu1 %v11833_v27 }
 0xae2   :  { %6108 = vmatpush1.bf16.msra.mxu0 %v11835_v28  ;;  %6149 = vmatpush1.bf16.msra.mxu1 %v11837_v29 }
 0xae3   :  { %6109 = vmatprep.subr.bf16.mxu0 %v11843_v30  ;;  %6150 = vmatprep.subr.bf16.mxu1 %v11845_v32 }
 0xae6   :  { %6110 = vmatpush1.bf16.msra.mxu0 %v11847_v33  ;;  %6151 = vmatpush1.bf16.msra.mxu1 %v11849_v34  ;;  %v12959_v34 = vld [vmem:[#allocation39_spill] sm:$0xff] }
 0xae7   :  { %6111 = vmatprep.subr.bf16.mxu0 %v11855_v38  ;;  %6152 = vmatprep.subr.bf16.mxu1 %v11857_v40 }
 0xaea   :  { %6112 = vmatpush2.bf16.msra.mxu0 %v11859_v41  ;;  %6153 = vmatpush2.bf16.msra.mxu1 %v11861_v43 }
 0xaeb   :  { %6113 = vmatprep.subr.bf16.mxu0 %v11867_v44  ;;  %6154 = vmatprep.subr.bf16.mxu1 %v11869_v46 }
 0xaee   :  { %6114 = vmatpush2.bf16.msra.mxu0 %v11871_v57  ;;  %6155 = vmatpush2.bf16.msra.mxu1 %v11873_v58  ;;  %v12960_v57 = vld [vmem:[#allocation40_spill] sm:$0xff] }
 0xaef   :  { %6115 = vmatprep.subr.bf16.mxu0 %v11879_v61  ;;  %6156 = vmatprep.subr.bf16.mxu1 %v11881_v62 }
 0xaf2   :  { %6116 = vmatpush2.bf16.msra.mxu0 %v11883_v36  ;;  %6157 = vmatpush2.bf16.msra.mxu1 %v11885_v1 }
 0xaf3   :  { %6117 = vmatprep.subr.bf16.mxu0 %v12915_v53  ;;  %6158 = vmatprep.subr.bf16.mxu1 %v12916_v56 }
 0xaf6   :  { %6118 = vmatpush2.bf16.msra.mxu0 %v12917_v48  ;;  %6159 = vmatpush2.bf16.msra.mxu1 %v12941_v10  ;;  %v12143_v10 = vld [vmem:[#allocation9 + $0xac] ss:$16 sps:$4 sm:$0xff]  }
 0xaf7   :  { %6119 = vmatprep.subr.bf16.mxu0 %v12942_v3  ;;  %6160 = vmatprep.subr.bf16.mxu1 %v12943_v9  ;;  %v12145_v3 = vld [vmem:[#allocation9 + $0xa0] ss:$16 sps:$4 sm:$0xff]   ;;  %v12147_v9 = vld [vmem:[#allocation9 + $0xa8] ss:$16 sps:$4 sm:$0xff]  }
 0xafa   :  { %6120 = vmatpush2.bf16.msra.mxu0 %v12944_v52  ;;  %6161 = vmatpush2.bf16.msra.mxu1 %v12945_v24  ;;  %v12153_v52 = vld [vmem:[#allocation9 + $0x84] ss:$16 sps:$4 sm:$0xff]   ;;  %v12155_v24 = vld [vmem:[#allocation9 + $0x8c] ss:$16 sps:$4 sm:$0xff]  }
 0xafb   :  { %6121 = vmatprep.subr.bf16.mxu0 %v12946_v55  ;;  %6162 = vmatprep.subr.bf16.mxu1 %v12947_v39  ;;  %v12157_v55 = vld [vmem:[#allocation9 + $0x80] ss:$16 sps:$4 sm:$0xff]   ;;  %v12159_v39 = vld [vmem:[#allocation9 + $0x88] ss:$16 sps:$4 sm:$0xff]  }
 0xafe   :  { %6122 = vmatpush2.bf16.msra.mxu0 %v12948_v6  ;;  %6163 = vmatpush2.bf16.msra.mxu1 %v12949_v13  ;;  %v12165_v6 = vld [vmem:[#allocation9 + $0x64] ss:$16 sps:$4 sm:$0xff]   ;;  %v12167_v13 = vld [vmem:[#allocation9 + $0x6c] ss:$16 sps:$4 sm:$0xff]  }
 0xaff   :  { %6123 = vmatprep.subr.bf16.mxu0 %v12950_v8  ;;  %6164 = vmatprep.subr.bf16.mxu1 %v12951_v37  ;;  %v12169_v8 = vld [vmem:[#allocation9 + $0x60] ss:$16 sps:$4 sm:$0xff]   ;;  %v12171_v37 = vld [vmem:[#allocation9 + $0x68] ss:$16 sps:$4 sm:$0xff]  }
 0xb02   :  { %6124 = vmatpush2.bf16.msra.mxu0 %v12952_v0  ;;  %6165 = vmatpush2.bf16.msra.mxu1 %v12953_v7  ;;  %v12177_v0 = vld [vmem:[#allocation9 + $0x44] ss:$16 sps:$4 sm:$0xff]   ;;  %v12179_v7 = vld [vmem:[#allocation9 + $0x4c] ss:$16 sps:$4 sm:$0xff]  }
 0xb03   :  { %6125 = vmatprep.subr.bf16.mxu0 %v12954_v14  ;;  %6166 = vmatprep.subr.bf16.mxu1 %v12955_v16  ;;  %v12181_v14 = vld [vmem:[#allocation9 + $0x40] ss:$16 sps:$4 sm:$0xff]   ;;  %v12183_v16 = vld [vmem:[#allocation9 + $0x48] ss:$16 sps:$4 sm:$0xff]  }
 0xb06   :  { %6126 = vmatpush2.bf16.msra.mxu0 %v12956_v17  ;;  %6167 = vmatpush2.bf16.msra.mxu1 %v12957_v18  ;;  %v12189_v17 = vld [vmem:[#allocation9 + $0x24] ss:$16 sps:$4 sm:$0xff]   ;;  %v12191_v18 = vld [vmem:[#allocation9 + $0x2c] ss:$16 sps:$4 sm:$0xff]  }
 0xb07   :  { %6603 = vmatprep.subr.bf16.mxu0 %v12117_v2  ;;  %6644 = vmatprep.subr.bf16.mxu1 %v12119_v54 }
 0xb89   :  { %v5621_v20 = vpop.f32.mrf.mxu0  ;;  %v5662_v21 = vpop.f32.mrf.mxu1 }
 0xb8a   :  { %v5671_v25 = vadd.f32 %v5621_v20, %v12958_v23  ;;  %v5686_v62 = vadd.f32 %v5662_v21, %v12037_v4  ;;  %v12195_v20 = vld [vmem:[#allocation9 + $0x28] ss:$16 sps:$4 sm:$0xff]   ;;  %v12201_v21 = vld [vmem:[#allocation9 + $0x4] ss:$16 sps:$4 sm:$0xff]  }
 0xb8b   :  { %v5623_v26 = vpop.f32.mrf.mxu0  ;;  %v5664_v27 = vpop.f32.mrf.mxu1 }
 0xb8c   :  { %v9229_v28 = vmul.f32 -1.442695, %v5671_v25  ;;  %v5672_v38 = vadd.f32 %v5623_v26, %v12959_v34  ;;  %v5688_v58 = vadd.f32 %v5664_v27, %v12960_v57  ;;  %v12203_v25 = vld [vmem:[#allocation9 + $0xc] ss:$16 sps:$4 sm:$0xff]   ;;  %v12205_v26 = vld [vmem:[#allocation9] ss:$16 sps:$4 sm:$0xff]  }
 0xb8d   :  { %v5625_v29 = vpop.f32.mrf.mxu0  ;;  %v5666_v30 = vpop.f32.mrf.mxu1  ;;  %v12207_v27 = vld [vmem:[#allocation9 + $0x8] ss:$16 sps:$4 sm:$0xff]  }
 0xb8e   :  { %10374 = vpow2.f32 %v9229_v28  ;;  %v9230_v40 = vmul.f32 -1.442695, %v5672_v38  ;;  %v12213_v28 = vld [vmem:[#allocation9 + $0x1e4] ss:$16 sps:$4 sm:$0xff]   ;;  %v12215_v29 = vld [vmem:[#allocation9 + $0x1ec] ss:$16 sps:$4 sm:$0xff]  }
 0xb8f   :  { %v5626_v32 = vpop.f32.mrf.mxu0  ;;  %v5667_v33 = vpop.f32.mrf.mxu1  ;;  %v12217_v30 = vld [vmem:[#allocation9 + $0x1e0] ss:$16 sps:$4 sm:$0xff]   ;;  %v12227_v38 = vld [vmem:[#allocation9 + $0x1cc] ss:$16 sps:$4 sm:$0xff]  }
 0xb90   :  { %10376 = vpow2.f32 %v9230_v40  ;;  %v12219_v32 = vld [vmem:[#allocation9 + $0x1e8] ss:$16 sps:$4 sm:$0xff]   ;;  %v12225_v33 = vld [vmem:[#allocation9 + $0x1c4] ss:$16 sps:$4 sm:$0xff]   ;;  %v12229_v40 = vld [vmem:[#allocation9 + $0x1c0] ss:$16 sps:$4 sm:$0xff]  }
 0xb9b   :  { %v10375_v41 = vpop.eup %10374 }
 0xb9c   :  { %v5679_v43 = vadd.f32 1.0, %v10375_v41  ;;  %v12231_v41 = vld [vmem:[#allocation9 + $0x1c8] ss:$16 sps:$4 sm:$0xff]  }
 0xb9d   :  { %v10377_v44 = vpop.eup %10376 }
 0xb9e   :  { %10378 = vrcp.f32 %v5679_v43  ;;  %v5680_v46 = vadd.f32 1.0, %v10377_v44  ;;  %v12237_v43 = vld [vmem:[#allocation9 + $0x1a4] ss:$16 sps:$4 sm:$0xff]   ;;  %v12239_v44 = vld [vmem:[#allocation9 + $0x1ac] ss:$16 sps:$4 sm:$0xff]  }
 0xba0   :  { %10380 = vrcp.f32 %v5680_v46  ;;  %v12241_v46 = vld [vmem:[#allocation9 + $0x1a0] ss:$16 sps:$4 sm:$0xff]  }
 0xbab   :  { %v10379_v61 = vpop.eup %10378 }
 0xbac   :  { %v5689_v36 = vmul.f32 %v10379_v61, %v5688_v58  ;;  %v12243_v58 = vld [vmem:[#allocation9 + $0x1a8] ss:$16 sps:$4 sm:$0xff]   ;;  %v12249_v61 = vld [vmem:[#allocation9 + $0x184] ss:$16 sps:$4 sm:$0xff]  }
 0xbad   :  { %v10381_v53 = vpop.eup %10380  ;;  %12964 = vst [vmem:[#allocation43_spill] sm:$0xff] %v12249_v61 }
 0xbae   :  { %v5690_v1 = vadd.f32 %v5689_v36, %v5686_v62  ;;  %v5692_v56 = vsub.f32 1.0, %v10381_v53  ;;  %v5694_v51 = vmul.f32 %v10381_v53, %v12042_v50  ;;  %v12251_v62 = vld [vmem:[#allocation9 + $0x18c] ss:$16 sps:$4 sm:$0xff]   ;;  %v12253_v36 = vld [vmem:[#allocation9 + $0x180] ss:$16 sps:$4 sm:$0xff]  }
 0xbaf   :  { %12965 = vst [vmem:[#allocation44_spill] sm:$0xff] %v12251_v62  ;;  %12966 = vst [vmem:[#allocation45_spill] sm:$0xff] %v12253_v36  ;;  %v12261_v53 = vld [vmem:[#allocation9 + $0x164] ss:$16 sps:$4 sm:$0xff]   ;;  %v12285_v50 = vld [vmem:[#allocation9 + $0x120] ss:$16 sps:$4 sm:$0xff]  }
 0xbb0   :  { %10382 = vtanh.f32 %v5690_v1  ;;  %v12255_v1 = vld [vmem:[#allocation9 + $0x188] ss:$16 sps:$4 sm:$0xff]   ;;  %12968 = vst [vmem:[#allocation47_spill] sm:$0xff] %v12261_v53  ;;  %12976 = vst [vmem:[#allocation35_spill] sm:$0xff] %v12285_v50 }
 0xbb1   :  { %12967 = vst [vmem:[#allocation46_spill] sm:$0xff] %v12255_v1 }
 0xbbd   :  { %v10383_v48 = vpop.eup %10382 }
 0xbbe   :  { %v5693_v45 = vmul.f32 %v10383_v48, %v5692_v56  ;;  %v12263_v56 = vld [vmem:[#allocation9 + $0x16c] ss:$16 sps:$4 sm:$0xff]   ;;  %v12265_v48 = vld [vmem:[#allocation9 + $0x160] ss:$16 sps:$4 sm:$0xff]  }
 0xbbf   :  { %12969 = vst [vmem:[#allocation28_spill] sm:$0xff] %v12263_v56  ;;  %12970 = vst [vmem:[#allocation29_spill] sm:$0xff] %v12265_v48 }
 0xbc0   :  { %v12113_v22 = vadd.f32 %v5694_v51, %v5693_v45  ;;  %v12267_v51 = vld [vmem:[#allocation9 + $0x168] ss:$16 sps:$4 sm:$0xff]   ;;  %v12273_v45 = vld [vmem:[#allocation9 + $0x144] ss:$16 sps:$4 sm:$0xff]  }
 0xbc1   :  { %12971 = vst [vmem:[#allocation49_spill] sm:$0xff] %v12267_v51  ;;  %12972 = vst [vmem:[#allocation33_spill] sm:$0xff] %v12273_v45 }
 0xbc2   :  { %12961 = vst [vmem:[#allocation37_spill] sm:$0xff] %v12113_v22  ;;  %v5696_v60 = vpack.c.bf16 %v12113_v22, %v12113_v22 }
 0xbc4   :  { %5697 = vst [vmem:[#allocation2 + $0x4] sm:$0xf] %v5696_v60  ;;  %v12275_v60 = vld [vmem:[#allocation9 + $0x14c] ss:$16 sps:$4 sm:$0xff]  }
 0xbc5   :  { %12973 = vst [vmem:[#allocation30_spill] sm:$0xff] %v12275_v60 }
 0xbcb   :  { %v5703_v31 = vld [vmem:[#allocation2] sm:$0xff] }
 0xbcc   :  { %v9232_v12 = vcombine.high %v5703_v31, %v5703_v31  ;;  %v9231_v47 = vcombine.low %v5703_v31, %v5703_v31  ;;  %v12277_v31 = vld [vmem:[#allocation9 + $0x140] ss:$16 sps:$4 sm:$0xff]  }
 0xbcd   :  { %12974 = vst [vmem:[#allocation50_spill] sm:$0xff] %v12277_v31 }
 0xbce   :  { %6127 = vmatprep.mubr.bf16.mxu0 %v9232_v12  ;;  %6168 = vmatprep.mubr.bf16.mxu1 %v9232_v12  ;;  %v12279_v12 = vld [vmem:[#allocation9 + $0x148] ss:$16 sps:$4 sm:$0xff]  }
 0xbcf   :  { %6128 = vmatmul.mubr.bf16.vlgmr.msra.gmra.mxu0 %v9231_v47  ;;  %6169 = vmatmul.mubr.bf16.vlgmr.msra.gmra.mxu1 %v9231_v47  ;;  %12975 = vst [vmem:[#allocation34_spill] sm:$0xff] %v12279_v12  ;;  %v6209_v47 = vld [vmem:[#allocation4 + $0x30] sm:$0xf] }
 0xbd0   :  { %6604 = vmatpush1.bf16.msra.mxu0 %v12121_v15  ;;  %6645 = vmatpush1.bf16.msra.mxu1 %v12123_v42  ;;  %6210 = vst [vmem:[#allocation2] sm:$0xf] %v6209_v47 }
 0xbd1   :  { %6605 = vmatprep.subr.bf16.mxu0 %v12129_v5  ;;  %6646 = vmatprep.subr.bf16.mxu1 %v12131_v49 }
 0xbd4   :  { %6606 = vmatpush1.bf16.msra.mxu0 %v12133_v63  ;;  %6647 = vmatpush1.bf16.msra.mxu1 %v12135_v35 }
 0xbd5   :  { %6607 = vmatprep.subr.bf16.mxu0 %v12141_v11  ;;  %6648 = vmatprep.subr.bf16.mxu1 %v12143_v10 }
 0xbd8   :  { %6608 = vmatpush1.bf16.msra.mxu0 %v12145_v3  ;;  %6649 = vmatpush1.bf16.msra.mxu1 %v12147_v9 }
 0xbd9   :  { %6609 = vmatprep.subr.bf16.mxu0 %v12153_v52  ;;  %6650 = vmatprep.subr.bf16.mxu1 %v12155_v24 }
 0xbdc   :  { %6610 = vmatpush1.bf16.msra.mxu0 %v12157_v55  ;;  %6651 = vmatpush1.bf16.msra.mxu1 %v12159_v39 }
 0xbdd   :  { %6611 = vmatprep.subr.bf16.mxu0 %v12165_v6  ;;  %6652 = vmatprep.subr.bf16.mxu1 %v12167_v13 }
 0xbe0   :  { %6612 = vmatpush1.bf16.msra.mxu0 %v12169_v8  ;;  %6653 = vmatpush1.bf16.msra.mxu1 %v12171_v37 }
 0xbe1   :  { %6613 = vmatprep.subr.bf16.mxu0 %v12177_v0  ;;  %6654 = vmatprep.subr.bf16.mxu1 %v12179_v7 }
 0xbe4   :  { %6614 = vmatpush1.bf16.msra.mxu0 %v12181_v14  ;;  %6655 = vmatpush1.bf16.msra.mxu1 %v12183_v16 }
 0xbe5   :  { %6615 = vmatprep.subr.bf16.mxu0 %v12189_v17  ;;  %6656 = vmatprep.subr.bf16.mxu1 %v12191_v18 }
 0xbe8   :  { %6616 = vmatpush1.bf16.msra.mxu0 %v12193_v19  ;;  %6657 = vmatpush1.bf16.msra.mxu1 %v12195_v20 }
 0xbe9   :  { %6617 = vmatprep.subr.bf16.mxu0 %v12201_v21  ;;  %6658 = vmatprep.subr.bf16.mxu1 %v12203_v25 }
 0xbec   :  { %6618 = vmatpush1.bf16.msra.mxu0 %v12205_v26  ;;  %6659 = vmatpush1.bf16.msra.mxu1 %v12207_v27 }
 0xbed   :  { %6619 = vmatprep.subr.bf16.mxu0 %v12213_v28  ;;  %6660 = vmatprep.subr.bf16.mxu1 %v12215_v29 }
 0xbf0   :  { %6620 = vmatpush2.bf16.msra.mxu0 %v12217_v30  ;;  %6661 = vmatpush2.bf16.msra.mxu1 %v12219_v32 }
 0xbf1   :  { %6621 = vmatprep.subr.bf16.mxu0 %v12225_v33  ;;  %6662 = vmatprep.subr.bf16.mxu1 %v12227_v38 }
 0xbf4   :  { %6622 = vmatpush2.bf16.msra.mxu0 %v12229_v40  ;;  %6663 = vmatpush2.bf16.msra.mxu1 %v12231_v41 }
 0xbf5   :  { %6623 = vmatprep.subr.bf16.mxu0 %v12237_v43  ;;  %6664 = vmatprep.subr.bf16.mxu1 %v12239_v44 }
 0xbf8   :  { %6624 = vmatpush2.bf16.msra.mxu0 %v12241_v46  ;;  %6665 = vmatpush2.bf16.msra.mxu1 %v12243_v58 }
 0xbf9   :  { %6625 = vmatprep.subr.bf16.mxu0 %v12249_v61  ;;  %6666 = vmatprep.subr.bf16.mxu1 %v12251_v62 }
 0xbfc   :  { %6626 = vmatpush2.bf16.msra.mxu0 %v12253_v36  ;;  %6667 = vmatpush2.bf16.msra.mxu1 %v12255_v1 }
 0xbfd   :  { %6627 = vmatprep.subr.bf16.mxu0 %v12261_v53  ;;  %6668 = vmatprep.subr.bf16.mxu1 %v12263_v56  ;;  %v12293_v56 = vld [vmem:[#allocation9 + $0x104] ss:$16 sps:$4 sm:$0xff]  }
 0xbfe   :  { %12980 = vst [vmem:[#allocation39_spill] sm:$0xff] %v12293_v56 }
 0xc00   :  { %6628 = vmatpush2.bf16.msra.mxu0 %v12265_v48  ;;  %6669 = vmatpush2.bf16.msra.mxu1 %v12267_v51  ;;  %v12289_v51 = vld [vmem:[#allocation9 + $0x128] ss:$16 sps:$4 sm:$0xff]   ;;  %v12291_v48 = vld [vmem:[#allocation9 + $0x12c] ss:$16 sps:$4 sm:$0xff]  }
 0xc01   :  { %6629 = vmatprep.subr.bf16.mxu0 %v12273_v45  ;;  %6670 = vmatprep.subr.bf16.mxu1 %v12275_v60  ;;  %12978 = vst [vmem:[#allocation53_spill] sm:$0xff] %v12289_v51  ;;  %12979 = vst [vmem:[#allocation38_spill] sm:$0xff] %v12291_v48  ;;  %v12296_v45 = vld [vmem:[#allocation9 + $0x10c] ss:$16 sps:$4 sm:$0xff]  }
 0xc02   :  { %12981 = vst [vmem:[#allocation40_spill] sm:$0xff] %v12296_v45 }
 0xc04   :  { %6630 = vmatpush2.bf16.msra.mxu0 %v12277_v31  ;;  %6671 = vmatpush2.bf16.msra.mxu1 %v12279_v12  ;;  %v12301_v12 = vld [vmem:[#allocation9 + $0x100] ss:$16 sps:$4 sm:$0xff]   ;;  %v12303_v31 = vld [vmem:[#allocation9 + $0x108] ss:$16 sps:$4 sm:$0xff]  }
 0xc05   :  { %6631 = vmatprep.subr.bf16.mxu0 %v12287_v59  ;;  %6672 = vmatprep.subr.bf16.mxu1 %v12291_v48  ;;  %12982 = vst [vmem:[#allocation55_spill] sm:$0xff] %v12301_v12  ;;  %12983 = vst [vmem:[#allocation56_spill] sm:$0xff] %v12303_v31 }
 0xc08   :  { %6632 = vmatpush2.bf16.msra.mxu0 %v12285_v50  ;;  %6673 = vmatpush2.bf16.msra.mxu1 %v12289_v51 }
 0xc09   :  { %6633 = vmatprep.subr.bf16.mxu0 %v12293_v56  ;;  %6674 = vmatprep.subr.bf16.mxu1 %v12296_v45 }
 0xc0c   :  { %6634 = vmatpush2.bf16.msra.mxu0 %v12301_v12  ;;  %6675 = vmatpush2.bf16.msra.mxu1 %v12303_v31 }
 0xc0d   :  { %7111 = vmatprep.subr.bf16.mxu0 %v12117_v2  ;;  %7152 = vmatprep.subr.bf16.mxu1 %v12119_v54 }
 0xc8f   :  { %v6129_v47 = vpop.f32.mrf.mxu0  ;;  %v6170_v50 = vpop.f32.mrf.mxu1 }
 0xc90   :  { %v6179_v51 = vadd.f32 %v6129_v47, %v12958_v23  ;;  %v6194_v47 = vadd.f32 %v6170_v50, %v12037_v4  ;;  %v12984_v4 = vld [vmem:[#allocation43_spill] sm:$0xff]  ;;  %v12985_v50 = vld [vmem:[#allocation44_spill] sm:$0xff] }
 0xc91   :  { %v6131_v48 = vpop.f32.mrf.mxu0  ;;  %v6172_v59 = vpop.f32.mrf.mxu1 }
 0xc92   :  { %v9297_v60 = vmul.f32 -1.442695, %v6179_v51  ;;  %v6180_v12 = vadd.f32 %v6131_v48, %v12959_v34  ;;  %v6196_v61 = vadd.f32 %v6172_v59, %v12960_v57 }
 0xc93   :  { %v6133_v53 = vpop.f32.mrf.mxu0  ;;  %v6174_v1 = vpop.f32.mrf.mxu1 }
 0xc94   :  { %10384 = vpow2.f32 %v9297_v60  ;;  %v9298_v36 = vmul.f32 -1.442695, %v6180_v12  ;;  %v12988_v60 = vld [vmem:[#allocation47_spill] sm:$0xff]  ;;  %v12990_v12 = vld [vmem:[#allocation29_spill] sm:$0xff] }
 0xc95   :  { %v6134_v56 = vpop.f32.mrf.mxu0  ;;  %v6175_v45 = vpop.f32.mrf.mxu1 }
 0xc96   :  { %10386 = vpow2.f32 %v9298_v36 }
 0xca1   :  { %v10385_v31 = vpop.eup %10384 }
 0xca2   :  { %v6187_v2 = vadd.f32 1.0, %v10385_v31  ;;  %v12989_v31 = vld [vmem:[#allocation28_spill] sm:$0xff] }
 0xca3   :  { %v10387_v54 = vpop.eup %10386 }
 0xca4   :  { %10388 = vrcp.f32 %v6187_v2  ;;  %v6188_v62 = vadd.f32 1.0, %v10387_v54 }
 0xca6   :  { %10390 = vrcp.f32 %v6188_v62  ;;  %v12987_v62 = vld [vmem:[#allocation46_spill] sm:$0xff] }
 0xcb1   :  { %v10389_v23 = vpop.eup %10388 }
 0xcb2   :  { %v6197_v53 = vmul.f32 %v10389_v23, %v6196_v61  ;;  %v12986_v61 = vld [vmem:[#allocation45_spill] sm:$0xff] }
 0xcb3   :  { %v10391_v56 = vpop.eup %10390  ;;  %v12991_v23 = vld [vmem:[#allocation49_spill] sm:$0xff] }
 0xcb4   :  { %v6198_v1 = vadd.f32 %v6197_v53, %v6194_v47  ;;  %v6200_v51 = vsub.f32 1.0, %v10391_v56  ;;  %v6202_v34 = vmul.f32 %v10391_v56, %v12113_v22  ;;  %v12992_v47 = vld [vmem:[#allocation33_spill] sm:$0xff]  ;;  %v12993_v53 = vld [vmem:[#allocation30_spill] sm:$0xff] }
 0xcb5   :  { %v12995_v56 = vld [vmem:[#allocation34_spill] sm:$0xff]  ;;  %v13004_v22 = vld [vmem:[#allocation41_spill] sm:$0xff] }
 0xcb6   :  { %10392 = vtanh.f32 %v6198_v1  ;;  %v12994_v1 = vld [vmem:[#allocation50_spill] sm:$0xff] }
 0xcc3   :  { %v10393_v45 = vpop.eup %10392 }
 0xcc4   :  { %v6201_v36 = vmul.f32 %v10393_v45, %v6200_v51  ;;  %v12996_v51 = vld [vmem:[#allocation52_spill] sm:$0xff]  ;;  %v12997_v45 = vld [vmem:[#allocation38_spill] sm:$0xff] }
 0xcc6   :  { %v12316_v48 = vadd.f32 %v6202_v34, %v6201_v36  ;;  %v12998_v34 = vld [vmem:[#allocation35_spill] sm:$0xff]  ;;  %v12999_v36 = vld [vmem:[#allocation53_spill] sm:$0xff] }
 0xcc8   :  { %v6204_v2 = vpack.c.bf16 %v12316_v48, %v12316_v48 }
 0xcca   :  { %6205 = vst [vmem:[#allocation2 + $0x4] sm:$0xf] %v6204_v2  ;;  %v13000_v2 = vld [vmem:[#allocation39_spill] sm:$0xff] }
 0xcd1   :  { %v6211_v59 = vld [vmem:[#allocation2] sm:$0xff] }
 0xcd2   :  { %v9300_v57 = vcombine.high %v6211_v59, %v6211_v59  ;;  %v9299_v54 = vcombine.low %v6211_v59, %v6211_v59  ;;  %v13001_v59 = vld [vmem:[#allocation40_spill] sm:$0xff] }
 0xcd4   :  { %6635 = vmatprep.mubr.bf16.mxu0 %v9300_v57  ;;  %6676 = vmatprep.mubr.bf16.mxu1 %v9300_v57  ;;  %v13002_v57 = vld [vmem:[#allocation55_spill] sm:$0xff] }
 0xcd5   :  { %6636 = vmatmul.mubr.bf16.vlgmr.msra.gmra.mxu0 %v9299_v54  ;;  %6677 = vmatmul.mubr.bf16.vlgmr.msra.gmra.mxu1 %v9299_v54  ;;  %v13003_v54 = vld [vmem:[#allocation56_spill] sm:$0xff] }
 0xcd6   :  { %7112 = vmatpush1.bf16.msra.mxu0 %v12121_v15  ;;  %7153 = vmatpush1.bf16.msra.mxu1 %v12123_v42 }
 0xcd7   :  { %7113 = vmatprep.subr.bf16.mxu0 %v12129_v5  ;;  %7154 = vmatprep.subr.bf16.mxu1 %v12131_v49 }
 0xcda   :  { %7114 = vmatpush1.bf16.msra.mxu0 %v12133_v63  ;;  %7155 = vmatpush1.bf16.msra.mxu1 %v12135_v35 }
 0xcdb   :  { %7115 = vmatprep.subr.bf16.mxu0 %v12141_v11  ;;  %7156 = vmatprep.subr.bf16.mxu1 %v12143_v10 }
 0xcde   :  { %7116 = vmatpush1.bf16.msra.mxu0 %v12145_v3  ;;  %7157 = vmatpush1.bf16.msra.mxu1 %v12147_v9 }
 0xcdf   :  { %7117 = vmatprep.subr.bf16.mxu0 %v12153_v52  ;;  %7158 = vmatprep.subr.bf16.mxu1 %v12155_v24 }
 0xce2   :  { %7118 = vmatpush1.bf16.msra.mxu0 %v12157_v55  ;;  %7159 = vmatpush1.bf16.msra.mxu1 %v12159_v39 }
 0xce3   :  { %7119 = vmatprep.subr.bf16.mxu0 %v12165_v6  ;;  %7160 = vmatprep.subr.bf16.mxu1 %v12167_v13 }
 0xce6   :  { %7120 = vmatpush1.bf16.msra.mxu0 %v12169_v8  ;;  %7161 = vmatpush1.bf16.msra.mxu1 %v12171_v37 }
 0xce7   :  { %7121 = vmatprep.subr.bf16.mxu0 %v12177_v0  ;;  %7162 = vmatprep.subr.bf16.mxu1 %v12179_v7 }
 0xcea   :  { %7122 = vmatpush1.bf16.msra.mxu0 %v12181_v14  ;;  %7163 = vmatpush1.bf16.msra.mxu1 %v12183_v16 }
 0xceb   :  { %7123 = vmatprep.subr.bf16.mxu0 %v12189_v17  ;;  %7164 = vmatprep.subr.bf16.mxu1 %v12191_v18 }
 0xcee   :  { %7124 = vmatpush1.bf16.msra.mxu0 %v12193_v19  ;;  %7165 = vmatpush1.bf16.msra.mxu1 %v12195_v20 }
 0xcef   :  { %7125 = vmatprep.subr.bf16.mxu0 %v12201_v21  ;;  %7166 = vmatprep.subr.bf16.mxu1 %v12203_v25 }
 0xcf2   :  { %7126 = vmatpush1.bf16.msra.mxu0 %v12205_v26  ;;  %7167 = vmatpush1.bf16.msra.mxu1 %v12207_v27 }
 0xcf3   :  { %7127 = vmatprep.subr.bf16.mxu0 %v12213_v28  ;;  %7168 = vmatprep.subr.bf16.mxu1 %v12215_v29 }
 0xcf6   :  { %7128 = vmatpush2.bf16.msra.mxu0 %v12217_v30  ;;  %7169 = vmatpush2.bf16.msra.mxu1 %v12219_v32 }
 0xcf7   :  { %7129 = vmatprep.subr.bf16.mxu0 %v12225_v33  ;;  %7170 = vmatprep.subr.bf16.mxu1 %v12227_v38 }
 0xcfa   :  { %7130 = vmatpush2.bf16.msra.mxu0 %v12229_v40  ;;  %7171 = vmatpush2.bf16.msra.mxu1 %v12231_v41 }
 0xcfb   :  { %7131 = vmatprep.subr.bf16.mxu0 %v12237_v43  ;;  %7172 = vmatprep.subr.bf16.mxu1 %v12239_v44 }
 0xcfe   :  { %7132 = vmatpush2.bf16.msra.mxu0 %v12241_v46  ;;  %7173 = vmatpush2.bf16.msra.mxu1 %v12243_v58 }
 0xcff   :  { %7133 = vmatprep.subr.bf16.mxu0 %v12984_v4  ;;  %7174 = vmatprep.subr.bf16.mxu1 %v12985_v50 }
 0xd02   :  { %7134 = vmatpush2.bf16.msra.mxu0 %v12986_v61  ;;  %7175 = vmatpush2.bf16.msra.mxu1 %v12987_v62 }
 0xd03   :  { %7135 = vmatprep.subr.bf16.mxu0 %v12988_v60  ;;  %7176 = vmatprep.subr.bf16.mxu1 %v12989_v31 }
 0xd06   :  { %7136 = vmatpush2.bf16.msra.mxu0 %v12990_v12  ;;  %7177 = vmatpush2.bf16.msra.mxu1 %v12991_v23 }
 0xd07   :  { %7137 = vmatprep.subr.bf16.mxu0 %v12992_v47  ;;  %7178 = vmatprep.subr.bf16.mxu1 %v12993_v53 }
 0xd0a   :  { %7138 = vmatpush2.bf16.msra.mxu0 %v12994_v1  ;;  %7179 = vmatpush2.bf16.msra.mxu1 %v12995_v56  ;;  %v13005_v1 = vld [vmem:[#allocation42_spill] sm:$0xff]  ;;  %v6717_v56 = vld [vmem:[#allocation4 + $0x34] sm:$0xf] }
 0xd0b   :  { %7139 = vmatprep.subr.bf16.mxu0 %v12996_v51  ;;  %7180 = vmatprep.subr.bf16.mxu1 %v12997_v45  ;;  %6718 = vst [vmem:[#allocation2] sm:$0xf] %v6717_v56  ;;  %v12384_v51 = vld [vmem:[#allocation10] sm:$0xff] }
 0xd0c   :  { %13006 = vst [vmem:[#allocation43_spill] sm:$0xff] %v12384_v51 }
 0xd0e   :  { %7140 = vmatpush2.bf16.msra.mxu0 %v12998_v34  ;;  %7181 = vmatpush2.bf16.msra.mxu1 %v12999_v36 }
 0xd0f   :  { %7141 = vmatprep.subr.bf16.mxu0 %v13000_v2  ;;  %7182 = vmatprep.subr.bf16.mxu1 %v13001_v59  ;;  %v12387_v59 = vld [vmem:[#allocation10 + $0x8] sm:$0xff] }
 0xd10   :  { %13007 = vst [vmem:[#allocation44_spill] sm:$0xff] %v12387_v59 }
 0xd12   :  { %7142 = vmatpush2.bf16.msra.mxu0 %v13002_v57  ;;  %7183 = vmatpush2.bf16.msra.mxu1 %v13003_v54 }
 0xd13   :  { %7619 = vmatprep.subr.bf16.mxu0 %v13004_v22  ;;  %7660 = vmatprep.subr.bf16.mxu1 %v13005_v1 }
 0xd95   :  { %v6637_v45 = vpop.f32.mrf.mxu0  ;;  %v6678_v34 = vpop.f32.mrf.mxu1 }
 0xd96   :  { %v6687_v36 = vadd.f32 %v12384_v51, %v6637_v45  ;;  %v12393_v45 = vld [vmem:[%s12535_s5] sm:$0xff] }
 0xd97   :  { %v6639_v53 = vpop.f32.mrf.mxu0  ;;  %v6680_v2 = vpop.f32.mrf.mxu1  ;;  %13008 = vst [vmem:[#allocation45_spill] sm:$0xff] %v12393_v45  ;;  %v12395_v51 = vld [vmem:[#allocation12] sm:$0xff] }
 0xd98   :  { %v9365_v47 = vmul.f32 -1.442695, %v6687_v36  ;;  %v6688_v1 = vadd.f32 %v12387_v59, %v6639_v53 }
 0xd99   :  { %v6641_v57 = vpop.f32.mrf.mxu0  ;;  %v6682_v23 = vpop.f32.mrf.mxu1 }
 0xd9a   :  { %10394 = vpow2.f32 %v9365_v47  ;;  %v9366_v12 = vmul.f32 -1.442695, %v6688_v1  ;;  %v6704_v23 = vadd.f32 %v12393_v45, %v6680_v2  ;;  %v6702_v57 = vadd.f32 %v12395_v51, %v6678_v34 }
 0xd9b   :  { %v6642_v54 = vpop.f32.mrf.mxu0  ;;  %v6683_v22 = vpop.f32.mrf.mxu1 }
 0xd9c   :  { %10396 = vpow2.f32 %v9366_v12 }
 0xda7   :  { %v10395_v56 = vpop.eup %10394 }
 0xda8   :  { %v6695_v31 = vadd.f32 1.0, %v10395_v56 }
 0xda9   :  { %v10397_v60 = vpop.eup %10396 }
 0xdaa   :  { %10398 = vrcp.f32 %v6695_v31  ;;  %v6696_v36 = vadd.f32 1.0, %v10397_v60 }
 0xdac   :  { %10400 = vrcp.f32 %v6696_v36 }
 0xdb7   :  { %v10399_v47 = vpop.eup %10398 }
 0xdb8   :  { %v6705_v53 = vmul.f32 %v10399_v47, %v6704_v23 }
 0xdb9   :  { %v10401_v54 = vpop.eup %10400 }
 0xdba   :  { %v6706_v12 = vadd.f32 %v6705_v53, %v6702_v57  ;;  %v6708_v31 = vsub.f32 1.0, %v10401_v54  ;;  %v6710_v1 = vmul.f32 %v10401_v54, %v12316_v48  ;;  %v10170_v53 = vld [vmem:[#allocation9 + $0xe4] ss:$16 sps:$4 sm:$0xff]   ;;  %v10168_v54 = vld [vmem:[#allocation9 + $0xe0] ss:$16 sps:$4 sm:$0xff]  }
 0xdbc   :  { %10402 = vtanh.f32 %v6706_v12  ;;  %v10173_v12 = vld [vmem:[#allocation9 + $0xec] ss:$16 sps:$4 sm:$0xff]  }
 0xdc9   :  { %v10403_v22 = vpop.eup %10402 }
 0xdca   :  { %v6709_v56 = vmul.f32 %v10403_v22, %v6708_v31  ;;  %v10171_v31 = vld [vmem:[#allocation9 + $0xe8] ss:$16 sps:$4 sm:$0xff]   ;;  %v10176_v22 = vld [vmem:[#allocation9 + $0xc4] ss:$16 sps:$4 sm:$0xff]  }
 0xdcc   :  { %v12400_v59 = vadd.f32 %v6710_v1, %v6709_v56  ;;  %v10179_v1 = vld [vmem:[#allocation9 + $0xcc] ss:$16 sps:$4 sm:$0xff]   ;;  %v10174_v56 = vld [vmem:[#allocation9 + $0xc0] ss:$16 sps:$4 sm:$0xff]  }
 0xdce   :  { %v6712_v60 = vpack.c.bf16 %v12400_v59, %v12400_v59 }
 0xdd0   :  { %6713 = vst [vmem:[#allocation2 + $0x4] sm:$0xf] %v6712_v60  ;;  %v10177_v60 = vld [vmem:[#allocation9 + $0xc8] ss:$16 sps:$4 sm:$0xff]  }
 0xdd7   :  { %v6719_v2 = vld [vmem:[#allocation2] sm:$0xff] }
 0xdd8   :  { %v9368_v45 = vcombine.high %v6719_v2, %v6719_v2  ;;  %v9367_v62 = vcombine.low %v6719_v2, %v6719_v2  ;;  %v10182_v2 = vld [vmem:[#allocation9 + $0xa4] ss:$16 sps:$4 sm:$0xff]  }
 0xdda   :  { %7143 = vmatprep.mubr.bf16.mxu0 %v9368_v45  ;;  %7184 = vmatprep.mubr.bf16.mxu1 %v9368_v45 }
 0xddb   :  { %7144 = vmatmul.mubr.bf16.vlgmr.msra.gmra.mxu0 %v9367_v62  ;;  %7185 = vmatmul.mubr.bf16.vlgmr.msra.gmra.mxu1 %v9367_v62 }
 0xddc   :  { %7620 = vmatpush1.bf16.msra.mxu0 %v12121_v15  ;;  %7661 = vmatpush1.bf16.msra.mxu1 %v12123_v42  ;;  %v13009_v15 = vld [vmem:[#allocation46_spill] sm:$0xff]  ;;  %v13010_v42 = vld [vmem:[#allocation47_spill] sm:$0xff] }
 0xddd   :  { %7621 = vmatprep.subr.bf16.mxu0 %v12129_v5  ;;  %7662 = vmatprep.subr.bf16.mxu1 %v12131_v49  ;;  %v13011_v5 = vld [vmem:[#allocation28_spill] sm:$0xff]  ;;  %v13012_v49 = vld [vmem:[#allocation29_spill] sm:$0xff] }
 0xde0   :  { %7622 = vmatpush1.bf16.msra.mxu0 %v12133_v63  ;;  %7663 = vmatpush1.bf16.msra.mxu1 %v12135_v35  ;;  %v13013_v63 = vld [vmem:[#allocation49_spill] sm:$0xff] }
 0xde1   :  { %7623 = vmatprep.subr.bf16.mxu0 %v12141_v11  ;;  %7664 = vmatprep.subr.bf16.mxu1 %v12143_v10  ;;  %v13014_v35 = vld [vmem:[#allocation33_spill] sm:$0xff]  ;;  %v13015_v11 = vld [vmem:[#allocation30_spill] sm:$0xff] }
 0xde2   :  { %v13016_v10 = vld [vmem:[#allocation50_spill] sm:$0xff] }
 0xde4   :  { %7624 = vmatpush1.bf16.msra.mxu0 %v12145_v3  ;;  %7665 = vmatpush1.bf16.msra.mxu1 %v12147_v9  ;;  %v13017_v3 = vld [vmem:[#allocation34_spill] sm:$0xff]  ;;  %v13018_v9 = vld [vmem:[#allocation52_spill] sm:$0xff] }
 0xde5   :  { %7625 = vmatprep.subr.bf16.mxu0 %v12153_v52  ;;  %7666 = vmatprep.subr.bf16.mxu1 %v12155_v24  ;;  %v13019_v52 = vld [vmem:[#allocation38_spill] sm:$0xff]  ;;  %v13020_v24 = vld [vmem:[#allocation35_spill] sm:$0xff] }
 0xde8   :  { %7626 = vmatpush1.bf16.msra.mxu0 %v12157_v55  ;;  %7667 = vmatpush1.bf16.msra.mxu1 %v12159_v39  ;;  %v13021_v55 = vld [vmem:[#allocation53_spill] sm:$0xff]  ;;  %v13022_v39 = vld [vmem:[#allocation39_spill] sm:$0xff] }
 0xde9   :  { %7627 = vmatprep.subr.bf16.mxu0 %v12165_v6  ;;  %7668 = vmatprep.subr.bf16.mxu1 %v12167_v13  ;;  %v13023_v6 = vld [vmem:[#allocation40_spill] sm:$0xff]  ;;  %v13024_v13 = vld [vmem:[#allocation55_spill] sm:$0xff] }
 0xdec   :  { %7628 = vmatpush1.bf16.msra.mxu0 %v12169_v8  ;;  %7669 = vmatpush1.bf16.msra.mxu1 %v12171_v37  ;;  %v13025_v8 = vld [vmem:[#allocation56_spill] sm:$0xff]  ;;  %v7225_v37 = vld [vmem:[#allocation4 + $0x38] sm:$0xf] }
 0xded   :  { %7629 = vmatprep.subr.bf16.mxu0 %v12177_v0  ;;  %7670 = vmatprep.subr.bf16.mxu1 %v12179_v7  ;;  %7226 = vst [vmem:[#allocation2] sm:$0xf] %v7225_v37  ;;  %v10204_v37 = vld [vmem:[#allocation9 + $0x20] ss:$16 sps:$4 sm:$0xff]  }
 0xdf0   :  { %7630 = vmatpush1.bf16.msra.mxu0 %v12181_v14  ;;  %7671 = vmatpush1.bf16.msra.mxu1 %v12183_v16  ;;  %v13026_v14 = vld [vmem:[#allocation43_spill] sm:$0xff] }
 0xdf1   :  { %7631 = vmatprep.subr.bf16.mxu0 %v12189_v17  ;;  %7672 = vmatprep.subr.bf16.mxu1 %v12191_v18 }
 0xdf4   :  { %7632 = vmatpush1.bf16.msra.mxu0 %v12193_v19  ;;  %7673 = vmatpush1.bf16.msra.mxu1 %v12195_v20 }
 0xdf5   :  { %7633 = vmatprep.subr.bf16.mxu0 %v12201_v21  ;;  %7674 = vmatprep.subr.bf16.mxu1 %v12203_v25 }
 0xdf8   :  { %7634 = vmatpush1.bf16.msra.mxu0 %v12205_v26  ;;  %7675 = vmatpush1.bf16.msra.mxu1 %v12207_v27  ;;  %v13027_v27 = vld [vmem:[#allocation44_spill] sm:$0xff] }
 0xdf9   :  { %7635 = vmatprep.subr.bf16.mxu0 %v12213_v28  ;;  %7676 = vmatprep.subr.bf16.mxu1 %v12215_v29 }
 0xdfc   :  { %7636 = vmatpush2.bf16.msra.mxu0 %v12217_v30  ;;  %7677 = vmatpush2.bf16.msra.mxu1 %v12219_v32 }
 0xdfd   :  { %7637 = vmatprep.subr.bf16.mxu0 %v12225_v33  ;;  %7678 = vmatprep.subr.bf16.mxu1 %v12227_v38 }
 0xe00   :  { %7638 = vmatpush2.bf16.msra.mxu0 %v12229_v40  ;;  %7679 = vmatpush2.bf16.msra.mxu1 %v12231_v41  ;;  %v13028_v40 = vld [vmem:[#allocation45_spill] sm:$0xff] }
 0xe01   :  { %7639 = vmatprep.subr.bf16.mxu0 %v12237_v43  ;;  %7680 = vmatprep.subr.bf16.mxu1 %v12239_v44 }
 0xe04   :  { %7640 = vmatpush2.bf16.msra.mxu0 %v12241_v46  ;;  %7681 = vmatpush2.bf16.msra.mxu1 %v12243_v58 }
 0xe05   :  { %7641 = vmatprep.subr.bf16.mxu0 %v12984_v4  ;;  %7682 = vmatprep.subr.bf16.mxu1 %v12985_v50 }
 0xe08   :  { %7642 = vmatpush2.bf16.msra.mxu0 %v12986_v61  ;;  %7683 = vmatpush2.bf16.msra.mxu1 %v13009_v15  ;;  %v10185_v15 = vld [vmem:[#allocation9 + $0xac] ss:$16 sps:$4 sm:$0xff]  }
 0xe09   :  { %7643 = vmatprep.subr.bf16.mxu0 %v13010_v42  ;;  %7684 = vmatprep.subr.bf16.mxu1 %v13011_v5  ;;  %v10180_v42 = vld [vmem:[#allocation9 + $0xa0] ss:$16 sps:$4 sm:$0xff]   ;;  %v10183_v5 = vld [vmem:[#allocation9 + $0xa8] ss:$16 sps:$4 sm:$0xff]  }
 0xe0c   :  { %7644 = vmatpush2.bf16.msra.mxu0 %v13012_v49  ;;  %7685 = vmatpush2.bf16.msra.mxu1 %v13013_v63  ;;  %v10188_v49 = vld [vmem:[#allocation9 + $0x84] ss:$16 sps:$4 sm:$0xff]   ;;  %v10191_v63 = vld [vmem:[#allocation9 + $0x8c] ss:$16 sps:$4 sm:$0xff]  }
 0xe0d   :  { %7645 = vmatprep.subr.bf16.mxu0 %v13014_v35  ;;  %7686 = vmatprep.subr.bf16.mxu1 %v13015_v11  ;;  %v10186_v35 = vld [vmem:[#allocation9 + $0x80] ss:$16 sps:$4 sm:$0xff]   ;;  %v10189_v11 = vld [vmem:[#allocation9 + $0x88] ss:$16 sps:$4 sm:$0xff]  }
 0xe10   :  { %7646 = vmatpush2.bf16.msra.mxu0 %v13016_v10  ;;  %7687 = vmatpush2.bf16.msra.mxu1 %v13017_v3  ;;  %v10194_v10 = vld [vmem:[#allocation9 + $0x64] ss:$16 sps:$4 sm:$0xff]   ;;  %v10197_v3 = vld [vmem:[#allocation9 + $0x6c] ss:$16 sps:$4 sm:$0xff]  }
 0xe11   :  { %7647 = vmatprep.subr.bf16.mxu0 %v13018_v9  ;;  %7688 = vmatprep.subr.bf16.mxu1 %v13019_v52  ;;  %v10192_v9 = vld [vmem:[#allocation9 + $0x60] ss:$16 sps:$4 sm:$0xff]   ;;  %v10195_v52 = vld [vmem:[#allocation9 + $0x68] ss:$16 sps:$4 sm:$0xff]  }
 0xe14   :  { %7648 = vmatpush2.bf16.msra.mxu0 %v13020_v24  ;;  %7689 = vmatpush2.bf16.msra.mxu1 %v13021_v55  ;;  %v10200_v24 = vld [vmem:[#allocation9 + $0x44] ss:$16 sps:$4 sm:$0xff]   ;;  %v10203_v55 = vld [vmem:[#allocation9 + $0x4c] ss:$16 sps:$4 sm:$0xff]  }
 0xe15   :  { %7649 = vmatprep.subr.bf16.mxu0 %v13022_v39  ;;  %7690 = vmatprep.subr.bf16.mxu1 %v13023_v6  ;;  %v10198_v39 = vld [vmem:[#allocation9 + $0x40] ss:$16 sps:$4 sm:$0xff]   ;;  %v10201_v6 = vld [vmem:[#allocation9 + $0x48] ss:$16 sps:$4 sm:$0xff]  }
 0xe18   :  { %7650 = vmatpush2.bf16.msra.mxu0 %v13024_v13  ;;  %7691 = vmatpush2.bf16.msra.mxu1 %v13025_v8  ;;  %v10206_v13 = vld [vmem:[#allocation9 + $0x24] ss:$16 sps:$4 sm:$0xff]   ;;  %v10209_v8 = vld [vmem:[#allocation9 + $0x2c] ss:$16 sps:$4 sm:$0xff]  }
 0xe19   :  { %8127 = vmatprep.subr.bf16.mxu0 %v10170_v53  ;;  %8168 = vmatprep.subr.bf16.mxu1 %v10173_v12  ;;  %v10252_v53 = vld [vmem:[#allocation9 + $0x120] ss:$16 sps:$4 sm:$0xff]   ;;  %v10254_v12 = vld [vmem:[#allocation9 + $0x124] ss:$16 sps:$4 sm:$0xff]  }
 0xe9b   :  { %v7145_v0 = vpop.f32.mrf.mxu0  ;;  %v7186_v7 = vpop.f32.mrf.mxu1 }
 0xe9c   :  { %v7195_v16 = vadd.f32 %v7145_v0, %v13026_v14  ;;  %v7210_v44 = vadd.f32 %v7186_v7, %v12395_v51  ;;  %v10207_v0 = vld [vmem:[#allocation9 + $0x28] ss:$16 sps:$4 sm:$0xff]   ;;  %v10212_v7 = vld [vmem:[#allocation9 + $0x4] ss:$16 sps:$4 sm:$0xff]  }
 0xe9d   :  { %v7147_v17 = vpop.f32.mrf.mxu0  ;;  %v7188_v18 = vpop.f32.mrf.mxu1 }
 0xe9e   :  { %v9433_v19 = vmul.f32 -1.442695, %v7195_v16  ;;  %v7196_v28 = vadd.f32 %v7147_v17, %v13027_v27  ;;  %v7212_v41 = vadd.f32 %v7188_v18, %v13028_v40  ;;  %v10215_v16 = vld [vmem:[#allocation9 + $0xc] ss:$16 sps:$4 sm:$0xff]   ;;  %v10210_v17 = vld [vmem:[#allocation9] ss:$16 sps:$4 sm:$0xff]  }
 0xe9f   :  { %v7149_v20 = vpop.f32.mrf.mxu0  ;;  %v7190_v21 = vpop.f32.mrf.mxu1  ;;  %v10213_v18 = vld [vmem:[#allocation9 + $0x8] ss:$16 sps:$4 sm:$0xff]  }
 0xea0   :  { %10404 = vpow2.f32 %v9433_v19  ;;  %v9434_v29 = vmul.f32 -1.442695, %v7196_v28  ;;  %v10218_v19 = vld [vmem:[#allocation9 + $0x1e4] ss:$16 sps:$4 sm:$0xff]   ;;  %v10221_v20 = vld [vmem:[#allocation9 + $0x1ec] ss:$16 sps:$4 sm:$0xff]  }
 0xea1   :  { %v7150_v25 = vpop.f32.mrf.mxu0  ;;  %v7191_v26 = vpop.f32.mrf.mxu1  ;;  %v10216_v21 = vld [vmem:[#allocation9 + $0x1e0] ss:$16 sps:$4 sm:$0xff]   ;;  %v10227_v28 = vld [vmem:[#allocation9 + $0x1cc] ss:$16 sps:$4 sm:$0xff]  }
 0xea2   :  { %10406 = vpow2.f32 %v9434_v29  ;;  %v10219_v25 = vld [vmem:[#allocation9 + $0x1e8] ss:$16 sps:$4 sm:$0xff]   ;;  %v10224_v26 = vld [vmem:[#allocation9 + $0x1c4] ss:$16 sps:$4 sm:$0xff]   ;;  %v10222_v29 = vld [vmem:[#allocation9 + $0x1c0] ss:$16 sps:$4 sm:$0xff]  }
 0xead   :  { %v10405_v30 = vpop.eup %10404 }
 0xeae   :  { %v7203_v32 = vadd.f32 1.0, %v10405_v30  ;;  %v10225_v30 = vld [vmem:[#allocation9 + $0x1c8] ss:$16 sps:$4 sm:$0xff]  }
 0xeaf   :  { %v10407_v33 = vpop.eup %10406 }
 0xeb0   :  { %10408 = vrcp.f32 %v7203_v32  ;;  %v7204_v38 = vadd.f32 1.0, %v10407_v33  ;;  %v10230_v32 = vld [vmem:[#allocation9 + $0x1a4] ss:$16 sps:$4 sm:$0xff]   ;;  %v10233_v33 = vld [vmem:[#allocation9 + $0x1ac] ss:$16 sps:$4 sm:$0xff]  }
 0xeb2   :  { %10410 = vrcp.f32 %v7204_v38  ;;  %v10228_v38 = vld [vmem:[#allocation9 + $0x1a0] ss:$16 sps:$4 sm:$0xff]  }
 0xebd   :  { %v10409_v43 = vpop.eup %10408 }
 0xebe   :  { %v7213_v46 = vmul.f32 %v10409_v43, %v7212_v41  ;;  %v10231_v41 = vld [vmem:[#allocation9 + $0x1a8] ss:$16 sps:$4 sm:$0xff]   ;;  %v10236_v43 = vld [vmem:[#allocation9 + $0x184] ss:$16 sps:$4 sm:$0xff]  }
 0xebf   :  { %v10411_v4 = vpop.eup %10410 }
 0xec0   :  { %v7214_v58 = vadd.f32 %v7213_v46, %v7210_v44  ;;  %v7216_v50 = vsub.f32 1.0, %v10411_v4  ;;  %v7218_v62 = vmul.f32 %v10411_v4, %v12400_v59  ;;  %v10239_v44 = vld [vmem:[#allocation9 + $0x18c] ss:$16 sps:$4 sm:$0xff]   ;;  %v10234_v46 = vld [vmem:[#allocation9 + $0x180] ss:$16 sps:$4 sm:$0xff]  }
 0xec1   :  { %v10242_v4 = vld [vmem:[#allocation9 + $0x164] ss:$16 sps:$4 sm:$0xff]  }
 0xec2   :  { %10412 = vtanh.f32 %v7214_v58  ;;  %v10237_v58 = vld [vmem:[#allocation9 + $0x188] ss:$16 sps:$4 sm:$0xff]  }
 0xecf   :  { %v10413_v61 = vpop.eup %10412 }
 0xed0   :  { %v7217_v34 = vmul.f32 %v10413_v61, %v7216_v50  ;;  %v10245_v50 = vld [vmem:[#allocation9 + $0x16c] ss:$16 sps:$4 sm:$0xff]   ;;  %v10240_v61 = vld [vmem:[#allocation9 + $0x160] ss:$16 sps:$4 sm:$0xff]  }
 0xed2   :  { %v12471_v45 = vadd.f32 %v7218_v62, %v7217_v34  ;;  %v10243_v62 = vld [vmem:[#allocation9 + $0x168] ss:$16 sps:$4 sm:$0xff]   ;;  %v10248_v34 = vld [vmem:[#allocation9 + $0x144] ss:$16 sps:$4 sm:$0xff]  }
 0xed4   :  { %v7220_v36 = vpack.c.bf16 %v12471_v45, %v12471_v45 }
 0xed6   :  { %7221 = vst [vmem:[#allocation2 + $0x4] sm:$0xf] %v7220_v36  ;;  %v10251_v36 = vld [vmem:[#allocation9 + $0x14c] ss:$16 sps:$4 sm:$0xff]  }
 0xedd   :  { %v7227_v23 = vld [vmem:[#allocation2] sm:$0xff] }
 0xede   :  { %v9436_v47 = vcombine.high %v7227_v23, %v7227_v23  ;;  %v9435_v57 = vcombine.low %v7227_v23, %v7227_v23  ;;  %v10246_v23 = vld [vmem:[#allocation9 + $0x140] ss:$16 sps:$4 sm:$0xff]  }
 0xee0   :  { %7651 = vmatprep.mubr.bf16.mxu0 %v9436_v47  ;;  %7692 = vmatprep.mubr.bf16.mxu1 %v9436_v47  ;;  %v10249_v47 = vld [vmem:[#allocation9 + $0x148] ss:$16 sps:$4 sm:$0xff]  }
 0xee1   :  { %7652 = vmatmul.mubr.bf16.vlgmr.msra.gmra.mxu0 %v9435_v57  ;;  %7693 = vmatmul.mubr.bf16.vlgmr.msra.gmra.mxu1 %v9435_v57  ;;  %v7733_v57 = vld [vmem:[#allocation4 + $0x3c] sm:$0xf] }
 0xee2   :  { %8128 = vmatpush1.bf16.msra.mxu0 %v10168_v54  ;;  %8169 = vmatpush1.bf16.msra.mxu1 %v10171_v31  ;;  %v10255_v54 = vld [vmem:[#allocation9 + $0x128] ss:$16 sps:$4 sm:$0xff]   ;;  %7734 = vst [vmem:[#allocation2] sm:$0xf] %v7733_v57  ;;  %v10257_v31 = vld [vmem:[#allocation9 + $0x12c] ss:$16 sps:$4 sm:$0xff]  }
 0xee3   :  { %8129 = vmatprep.subr.bf16.mxu0 %v10176_v22  ;;  %8170 = vmatprep.subr.bf16.mxu1 %v10179_v1  ;;  %v10260_v22 = vld [vmem:[#allocation9 + $0x104] ss:$16 sps:$4 sm:$0xff]   ;;  %v10263_v1 = vld [vmem:[#allocation9 + $0x10c] ss:$16 sps:$4 sm:$0xff]  }
 0xee6   :  { %8130 = vmatpush1.bf16.msra.mxu0 %v10174_v56  ;;  %8171 = vmatpush1.bf16.msra.mxu1 %v10177_v60  ;;  %v10258_v56 = vld [vmem:[#allocation9 + $0x100] ss:$16 sps:$4 sm:$0xff]   ;;  %v10261_v60 = vld [vmem:[#allocation9 + $0x108] ss:$16 sps:$4 sm:$0xff]  }
 0xee7   :  { %8131 = vmatprep.subr.bf16.mxu0 %v10182_v2  ;;  %8172 = vmatprep.subr.bf16.mxu1 %v10185_v15  ;;  %v10265_v2 = vld [vmem:[#allocation13 + $0x38] sm:$0xff]  }
 0xeea   :  { %8132 = vmatpush1.bf16.msra.mxu0 %v10180_v42  ;;  %8173 = vmatpush1.bf16.msra.mxu1 %v10183_v5 }
 0xeeb   :  { %8133 = vmatprep.subr.bf16.mxu0 %v10188_v49  ;;  %8174 = vmatprep.subr.bf16.mxu1 %v10191_v63 }
 0xeee   :  { %8134 = vmatpush1.bf16.msra.mxu0 %v10186_v35  ;;  %8175 = vmatpush1.bf16.msra.mxu1 %v10189_v11 }
 0xeef   :  { %8135 = vmatprep.subr.bf16.mxu0 %v10194_v10  ;;  %8176 = vmatprep.subr.bf16.mxu1 %v10197_v3 }
 0xef2   :  { %8136 = vmatpush1.bf16.msra.mxu0 %v10192_v9  ;;  %8177 = vmatpush1.bf16.msra.mxu1 %v10195_v52 }
 0xef3   :  { %8137 = vmatprep.subr.bf16.mxu0 %v10200_v24  ;;  %8178 = vmatprep.subr.bf16.mxu1 %v10203_v55 }
 0xef6   :  { %8138 = vmatpush1.bf16.msra.mxu0 %v10198_v39  ;;  %8179 = vmatpush1.bf16.msra.mxu1 %v10201_v6 }
 0xef7   :  { %8139 = vmatprep.subr.bf16.mxu0 %v10206_v13  ;;  %8180 = vmatprep.subr.bf16.mxu1 %v10209_v8 }
 0xefa   :  { %8140 = vmatpush1.bf16.msra.mxu0 %v10204_v37  ;;  %8181 = vmatpush1.bf16.msra.mxu1 %v10207_v0 }
 0xefb   :  { %8141 = vmatprep.subr.bf16.mxu0 %v10212_v7  ;;  %8182 = vmatprep.subr.bf16.mxu1 %v10215_v16 }
 0xefe   :  { %8142 = vmatpush1.bf16.msra.mxu0 %v10210_v17  ;;  %8183 = vmatpush1.bf16.msra.mxu1 %v10213_v18 }
 0xeff   :  { %8143 = vmatprep.subr.bf16.mxu0 %v10218_v19  ;;  %8184 = vmatprep.subr.bf16.mxu1 %v10221_v20 }
 0xf02   :  { %8144 = vmatpush2.bf16.msra.mxu0 %v10216_v21  ;;  %8185 = vmatpush2.bf16.msra.mxu1 %v10219_v25 }
 0xf03   :  { %8145 = vmatprep.subr.bf16.mxu0 %v10224_v26  ;;  %8186 = vmatprep.subr.bf16.mxu1 %v10227_v28  ;;  %v13029_v28 = vld [vmem:[#allocation24_spill] sm:$0xff] }
 0xf06   :  { %8146 = vmatpush2.bf16.msra.mxu0 %v10222_v29  ;;  %8187 = vmatpush2.bf16.msra.mxu1 %v10225_v30  ;;  %v13030_v29 = vld [vmem:[#allocation25_spill] sm:$0xff] }
 0xf07   :  { %8147 = vmatprep.subr.bf16.mxu0 %v10230_v32  ;;  %8188 = vmatprep.subr.bf16.mxu1 %v10233_v33  ;;  %v8257_v30 = vpack.c.bf16 %v13030_v29, %v13029_v28  ;;  %v13031_v32 = vld [vmem:[#allocation54_spill] sm:$0xff]  ;;  %v13032_v33 = vld [vmem:[#allocation36_spill] sm:$0xff] }
 0xf0a   :  { %8148 = vmatpush2.bf16.msra.mxu0 %v10228_v38  ;;  %8189 = vmatpush2.bf16.msra.mxu1 %v10231_v41  ;;  %v8261_v38 = vpack.c.bf16 %v13032_v33, %v13031_v32  ;;  %v10268_v41 = vld [vmem:[#allocation13 + $0x28] sm:$0xff]  }
 0xf0b   :  { %8149 = vmatprep.subr.bf16.mxu0 %v10236_v43  ;;  %8190 = vmatprep.subr.bf16.mxu1 %v10239_v44  ;;  %v10269_v43 = vld [vmem:[#allocation13 + $0x20] sm:$0xff]   ;;  %v10270_v44 = vld [vmem:[#allocation13 + $0x18] sm:$0xff]  }
 0xf0e   :  { %8150 = vmatpush2.bf16.msra.mxu0 %v10234_v46  ;;  %8191 = vmatpush2.bf16.msra.mxu1 %v10237_v58  ;;  %v10271_v46 = vld [vmem:[#allocation13 + $0x10] sm:$0xff]   ;;  %v10272_v58 = vld [vmem:[#allocation13 + $0x8] sm:$0xff]  }
 0xf0f   :  { %8151 = vmatprep.subr.bf16.mxu0 %v10242_v4  ;;  %8192 = vmatprep.subr.bf16.mxu1 %v10245_v50  ;;  %v10273_v4 = vld [vmem:[#allocation13] sm:$0xff]   ;;  %v13033_v50 = vld [vmem:[#allocation48_spill] sm:$0xff] }
 0xf12   :  { %8152 = vmatpush2.bf16.msra.mxu0 %v10240_v61  ;;  %8193 = vmatpush2.bf16.msra.mxu1 %v10243_v62  ;;  %v13034_v61 = vld [vmem:[#allocation26_spill] sm:$0xff] }
 0xf13   :  { %8153 = vmatprep.subr.bf16.mxu0 %v10248_v34  ;;  %8194 = vmatprep.subr.bf16.mxu1 %v10251_v36  ;;  %v8258_v62 = vpack.c.bf16 %v13034_v61, %v13033_v50  ;;  %v13035_v34 = vld [vmem:[#allocation37_spill] sm:$0xff] }
 0xf14   :  { %v8262_v36 = vpack.c.bf16 %v12316_v48, %v13035_v34 }
 0xf16   :  { %8154 = vmatpush2.bf16.msra.mxu0 %v10246_v23  ;;  %8195 = vmatpush2.bf16.msra.mxu1 %v10249_v47  ;;  %v13036_v23 = vld [vmem:[#allocation27_spill] sm:$0xff] }
 0xf17   :  { %8155 = vmatprep.subr.bf16.mxu0 %v10254_v12  ;;  %8196 = vmatprep.subr.bf16.mxu1 %v10257_v31  ;;  %v13037_v47 = vld [vmem:[#allocation51_spill] sm:$0xff] }
 0xf18   :  { %v8259_v57 = vpack.c.bf16 %v13037_v47, %v13036_v23  ;;  %v13038_v12 = vld [vmem:[#allocation31_spill] sm:$0xff] }
 0xf1a   :  { %8156 = vmatpush2.bf16.msra.mxu0 %v10252_v53  ;;  %8197 = vmatpush2.bf16.msra.mxu1 %v10255_v54  ;;  %v8263_v53 = vpack.c.bf16 %v12471_v45, %v12400_v59  ;;  %v13039_v54 = vld [vmem:[#allocation32_spill] sm:$0xff] }
 0xf1b   :  { %8157 = vmatprep.subr.bf16.mxu0 %v10260_v22  ;;  %8198 = vmatprep.subr.bf16.mxu1 %v10263_v1  ;;  %v8260_v31 = vpack.c.bf16 %v13039_v54, %v13038_v12  ;;  %v8209_v22 = vld [vmem:[#allocation10] sm:$0xff] }
 0xf1e   :  { %8158 = vmatpush2.bf16.msra.mxu0 %v10258_v56  ;;  %8199 = vmatpush2.bf16.msra.mxu1 %v10261_v60 }
 0xf1f   :  { %9596 = vmatprep.subr.bf16.mxu0 %v10265_v2  ;;  %9628 = vmatprep.subr.bf16.mxu1 %v10265_v2 }
 0xfa1   :  { %v7653_v15 = vpop.f32.mrf.mxu0  ;;  %v7694_v42 = vpop.f32.mrf.mxu1 }
 0xfa2   :  { %v7703_v5 = vadd.f32 %v7653_v15, %v13026_v14  ;;  %v7718_v37 = vadd.f32 %v7694_v42, %v12395_v51  ;;  %v10267_v51 = vld [vmem:[#allocation13 + $0x30] sm:$0xff]  }
 0xfa3   :  { %v7655_v49 = vpop.f32.mrf.mxu0  ;;  %v7696_v63 = vpop.f32.mrf.mxu1  ;;  %v8210_v42 = vld [vmem:[#allocation10 + $0x8] sm:$0xff] }
 0xfa4   :  { %v9501_v35 = vmul.f32 -1.442695, %v7703_v5  ;;  %v7704_v52 = vadd.f32 %v7655_v49, %v13027_v27  ;;  %v7720_v8 = vadd.f32 %v7696_v63, %v13028_v40 }
 0xfa5   :  { %v7657_v11 = vpop.f32.mrf.mxu0  ;;  %v7698_v10 = vpop.f32.mrf.mxu1 }
 0xfa6   :  { %10414 = vpow2.f32 %v9501_v35  ;;  %v9502_v24 = vmul.f32 -1.442695, %v7704_v52  ;;  %v12504_v52 = vld [vmem:[%s12537_s7] ss:$0 sm:$0xff] }
 0xfa7   :  { %v7658_v3 = vpop.f32.mrf.mxu0  ;;  %v7699_v9 = vpop.f32.mrf.mxu1 }
 0xfa8   :  { %10416 = vpow2.f32 %v9502_v24  ;;  %v8227_v9 = vld [vmem:[%s12535_s5] sm:$0xff]  ;;  %s10669_s5 = smov [#allocation16]  }
 0xfa9   :  { %v8225_v24 = vld [vmem:[#allocation12] sm:$0xff]  ;;  %s8467_s7 = sshll.u32 %s10669_s5, 4  ;;  %s8468_s7 = int_to_ptr.vmem [resolvable:$true] %s8467_s7 }
 0xfaa   :  { %s10607_s28 = scalar_lea.vmem %s8468_s7, 128  ;;  %p10612_p3 = scmp.lt.s32.totalorder %s8468_s7, %s8468_s7 }
 0xfab   :  { %p10608_p2 = scmp.ne.s32.totalorder %s8468_s7, %s10607_s28  ;;  %p10613_p4 = scmp.lt.s32.totalorder %s10607_s28, %s10607_s28 }
 0xfad   :  { %p10614_p5 = por %p10613_p4, %p10612_p3 }
 0xfaf   :  { %p10615_p6 = pnand %p10614_p5, %p10608_p2 }
 0xfb3   :  { %v10415_v55 = vpop.eup %10414 }
 0xfb4   :  { %v7711_v39 = vadd.f32 1.0, %v10415_v55 }
 0xfb5   :  { %v10417_v6 = vpop.eup %10416 }
 0xfb6   :  { %10418 = vrcp.f32 %v7711_v39  ;;  %v7712_v13 = vadd.f32 1.0, %v10417_v6 }
 0xfb8   :  { %10420 = vrcp.f32 %v7712_v13 }
 0xfc3   :  { %v10419_v14 = vpop.eup %10418 }
 0xfc4   :  { %v7721_v0 = vmul.f32 %v10419_v14, %v7720_v8 }
 0xfc5   :  { %v10421_v16 = vpop.eup %10420 }
 0xfc6   :  { %v7722_v7 = vadd.f32 %v7721_v0, %v7718_v37  ;;  %v7724_v17 = vsub.f32 1.0, %v10421_v16  ;;  %v7726_v27 = vmul.f32 %v10421_v16, %v12471_v45 }
 0xfc8   :  { %10422 = vtanh.f32 %v7722_v7 }
 0xfd5   :  { %v10423_v18 = vpop.eup %10422 }
 0xfd6   :  { %v7725_v19 = vmul.f32 %v10423_v18, %v7724_v17 }
 0xfd8   :  { %v12480_v20 = vadd.f32 %v7726_v27, %v7725_v19 }
 0xfda   :  { %v7728_v21 = vpack.c.bf16 %v12480_v20, %v12480_v20 }
 0xfdc   :  { %7729 = vst [vmem:[#allocation2 + $0x4] sm:$0xf] %v7728_v21 }
 0xfe3   :  { %v7735_v40 = vld [vmem:[#allocation2] sm:$0xff] }
 0xfe4   :  { %v9504_v25 = vcombine.high %v7735_v40, %v7735_v40  ;;  %v9503_v26 = vcombine.low %v7735_v40, %v7735_v40 }
 0xfe6   :  { %8159 = vmatprep.mubr.bf16.mxu0 %v9504_v25  ;;  %8200 = vmatprep.mubr.bf16.mxu1 %v9504_v25 }
 0xfe7   :  { %8160 = vmatmul.mubr.bf16.vlgmr.msra.gmra.mxu0 %v9503_v26  ;;  %8201 = vmatmul.mubr.bf16.vlgmr.msra.gmra.mxu1 %v9503_v26 }
 0xfe8   :  { %9597 = vmatpush3.bf16.msra.mxu0 %v10265_v2  ;;  %9636 = vmatpush3.bf16.msra.mxu1 %v10265_v2 }
 0xfe9   :  { %9612 = vmatprep.mubr.bf16.mxu0 %v8257_v30  ;;  %9620 = vmatprep.mubr.bf16.mxu1 %v8261_v38 }
 0xfea   :  { %9598 = vmatprep.subr.bf16.mxu0 %v10267_v51  ;;  %9629 = vmatprep.subr.bf16.mxu1 %v10267_v51 }
 0xfec   :  { %9599 = vmatpush3.bf16.msra.mxu0 %v10267_v51  ;;  %9637 = vmatpush3.bf16.msra.mxu1 %v10267_v51 }
 0xfed   :  { %9600 = vmatprep.subr.bf16.mxu0 %v10268_v41  ;;  %9630 = vmatprep.subr.bf16.mxu1 %v10268_v41 }
 0xff0   :  { %9601 = vmatpush3.bf16.msra.mxu0 %v10268_v41  ;;  %9638 = vmatpush3.bf16.msra.mxu1 %v10268_v41 }
 0xff1   :  { %9602 = vmatprep.subr.bf16.mxu0 %v10269_v43  ;;  %9631 = vmatprep.subr.bf16.mxu1 %v10269_v43 }
 0xff4   :  { %9603 = vmatpush3.bf16.msra.mxu0 %v10269_v43  ;;  %9639 = vmatpush3.bf16.msra.mxu1 %v10269_v43 }
 0xff5   :  { %9604 = vmatprep.subr.bf16.mxu0 %v10270_v44  ;;  %9632 = vmatprep.subr.bf16.mxu1 %v10270_v44 }
 0xff8   :  { %9605 = vmatpush3.bf16.msra.mxu0 %v10270_v44  ;;  %9640 = vmatpush3.bf16.msra.mxu1 %v10270_v44 }
 0xff9   :  { %9606 = vmatprep.subr.bf16.mxu0 %v10271_v46  ;;  %9633 = vmatprep.subr.bf16.mxu1 %v10271_v46 }
 0xffc   :  { %9607 = vmatpush3.bf16.msra.mxu0 %v10271_v46  ;;  %9641 = vmatpush3.bf16.msra.mxu1 %v10271_v46 }
 0xffd   :  { %9608 = vmatprep.subr.bf16.mxu0 %v10272_v58  ;;  %9634 = vmatprep.subr.bf16.mxu1 %v10272_v58 }
0x1000   :  { %9609 = vmatpush3.bf16.msra.mxu0 %v10272_v58  ;;  %9642 = vmatpush3.bf16.msra.mxu1 %v10272_v58 }
0x1001   :  { %9610 = vmatprep.subr.bf16.mxu0 %v10273_v4  ;;  %9635 = vmatprep.subr.bf16.mxu1 %v10273_v4 }
0x1004   :  { %9611 = vmatpush3.bf16.msra.mxu0 %v10273_v4  ;;  %9643 = vmatpush3.bf16.msra.mxu1 %v10273_v4 }
0x1007   :  { %9613 = vmatmul.mubr.bf16.vlgmr.msra.gmra.mxu0 %v8258_v62  ;;  %9621 = vmatmul.mubr.bf16.vlgmr.msra.gmra.mxu1 %v8262_v36 }
0x1008   :  { %9616 = vmatprep.mubr.bf16.mxu0 %v8259_v57  ;;  %9624 = vmatprep.mubr.bf16.mxu1 %v8263_v53 }
0x100f   :  { %9617 = vmatmul.mubr.bf16.gmra.mxu0 %v8260_v31 }
0x10a7   :  { %v8161_v1 = vpop.f32.mrf.mxu0  ;;  %v8202_v56 = vpop.f32.mrf.mxu1 }
0x10a8   :  { %v8211_v60 = vadd.f32 %v8209_v22, %v8161_v1  ;;  %v8226_v0 = vadd.f32 %v8225_v24, %v8202_v56 }
0x10a9   :  { %v8163_v2 = vpop.f32.mrf.mxu0  ;;  %v8204_v48 = vpop.f32.mrf.mxu1 }
0x10aa   :  { %v9569_v15 = vmul.f32 -1.442695, %v8211_v60  ;;  %v8212_v63 = vadd.f32 %v8210_v42, %v8163_v2  ;;  %v8228_v13 = vadd.f32 %v8227_v9, %v8204_v48 }
0x10ab   :  { %v8165_v5 = vpop.f32.mrf.mxu0  ;;  %v8206_v49 = vpop.f32.mrf.mxu1 }
0x10ac   :  { %10424 = vpow2.f32 %v9569_v15  ;;  %v9570_v35 = vmul.f32 -1.442695, %v8212_v63 }
0x10ad   :  { %v8166_v59 = vpop.f32.mrf.mxu0  ;;  %v8207_v45 = vpop.f32.mrf.mxu1 }
0x10ae   :  { %10426 = vpow2.f32 %v9570_v35 }
0x10b9   :  { %v10425_v11 = vpop.eup %10424 }
0x10ba   :  { %v8219_v10 = vadd.f32 1.0, %v10425_v11 }
0x10bb   :  { %v10427_v3 = vpop.eup %10426 }
0x10bc   :  { %10428 = vrcp.f32 %v8219_v10  ;;  %v8220_v55 = vadd.f32 1.0, %v10427_v3 }
0x10be   :  { %10430 = vrcp.f32 %v8220_v55 }
0x10c7   :  { %v9614_v39 = vpop.f32.mrf.mxu0  ;;  %v9622_v6 = vpop.f32.mrf.mxu1 }
0x10c8   :  { %v8379_v8 = vadd.f32 %v9614_v39, %v12504_v52  ;;  %v8411_v14 = vadd.f32 %v9622_v6, %v12504_v52 }
0x10c9   :  { %v10429_v37 = vpop.eup %10428  ;;  %v8370_v7 = vpop.f32.mrf.mxu0 }
0x10ca   :  { %v8402_v16 = vpop.f32.mrf.mxu1  ;;  %v8229_v17 = vmul.f32 %v10429_v37, %v8228_v13  ;;  %8435 = vst [vmem:[#allocation15 + $0x10] sm:$0xff] %v8379_v8  ;;  %8443 = vst [vmem:[#allocation15 + $0x50] sm:$0xff] %v8411_v14  ;;  %v8371_v18 = vadd.f32 %v12504_v52, %v8370_v7 }
0x10cb   :  { %v8403_v27 = vadd.f32 %v12504_v52, %v8402_v16  ;;  %v9615_v19 = vpop.f32.mrf.mxu0  ;;  %v10431_v4 = vpop.eup %10430 }
0x10cc   :  { %v9623_v21 = vpop.f32.mrf.mxu1  ;;  %v8230_v40 = vadd.f32 %v8229_v17, %v8226_v0  ;;  %8433 = vst [vmem:[#allocation15] sm:$0xff] %v8371_v18  ;;  %v8382_v25 = vadd.f32 %v9615_v19, %v12504_v52  ;;  %v8232_v50 = vsub.f32 1.0, %v10431_v4  ;;  %v8234_v34 = vmul.f32 %v10431_v4, %v12480_v20 }
0x10cd   :  { %8441 = vst [vmem:[#allocation15 + $0x40] sm:$0xff] %v8403_v27  ;;  %v8414_v26 = vadd.f32 %v9623_v21, %v12504_v52  ;;  %v8373_v51 = vpop.f32.mrf.mxu0 }
0x10ce   :  { %v8405_v28 = vpop.f32.mrf.mxu1  ;;  %10432 = vtanh.f32 %v8230_v40  ;;  %8436 = vst [vmem:[#allocation15 + $0x18] sm:$0xff] %v8382_v25  ;;  %v8374_v29 = vadd.f32 %v12504_v52, %v8373_v51 }
0x10cf   :  { %8444 = vst [vmem:[#allocation15 + $0x58] sm:$0xff] %v8414_v26  ;;  %v8406_v30 = vadd.f32 %v12504_v52, %v8405_v28  ;;  %v9618_v32 = vpop.f32.mrf.mxu0 }
0x10d0   :  { %8434 = vst [vmem:[#allocation15 + $0x8] sm:$0xff] %v8374_v29  ;;  %v8395_v33 = vadd.f32 %v9618_v32, %v12504_v52 }
0x10d1   :  { %8442 = vst [vmem:[#allocation15 + $0x48] sm:$0xff] %v8406_v30  ;;  %v8386_v38 = vpop.f32.mrf.mxu0 }
0x10d2   :  { %8439 = vst [vmem:[#allocation15 + $0x30] sm:$0xff] %v8395_v33  ;;  %v8387_v41 = vadd.f32 %v12504_v52, %v8386_v38 }
0x10d3   :  { %v9619_v43 = vpop.f32.mrf.mxu0 }
0x10d4   :  { %8437 = vst [vmem:[#allocation15 + $0x20] sm:$0xff] %v8387_v41  ;;  %v8398_v44 = vadd.f32 %v9619_v43, %v12504_v52 }
0x10d5   :  { %v8389_v46 = vpop.f32.mrf.mxu0 }
0x10d6   :  { %8440 = vst [vmem:[#allocation15 + $0x38] sm:$0xff] %v8398_v44  ;;  %v8390_v58 = vadd.f32 %v12504_v52, %v8389_v46 }
0x10d8   :  { %8438 = vst [vmem:[#allocation15 + $0x28] sm:$0xff] %v8390_v58 }
0x10db   :  { %v10433_v61 = vpop.eup %10432 }
0x10dc   :  { %v8233_v62 = vmul.f32 %v10433_v61, %v8232_v50 }
0x10de   :  { %v8235_v36 = vadd.f32 %v8234_v34, %v8233_v62 }
0x10e0   :  { %v8236_v23 = vpack.c.bf16 %v8235_v36, %v8235_v36  ;;  %v8264_v47 = vpack.c.bf16 %v8235_v36, %v12480_v20  ;;  %8240 = vst [vmem:[#allocation16] sm:$0xff] %v8235_v36 }
0x10e2   :  { %8237 = vst [vmem:[#allocation2 + $0x4] sm:$0xf] %v8236_v23  ;;  %9625 = vmatmul.mubr.bf16.gmra.mxu1 %v8264_v47 }
0x10e3   :  { %10618 = shalt.err (!%p10615_p6)
}
0x10e4   :  { %8470 = dma.vmem_to_hbm [thread:$0]  %s8468_s7, 128, %s12539_s9, [#allocation17]  }
0x10e5   :  { %s10670_s10 = smov [#allocation15]  }
0x10e6   :  { %s8454_s11 = sshll.u32 %s10670_s10, 4  ;;  %s8455_s11 = int_to_ptr.vmem [resolvable:$true] %s8454_s11 }
0x10e7   :  { %s10627_s9 = scalar_lea.vmem %s8455_s11, 2048  ;;  %p10632_p8 = scmp.lt.s32.totalorder %s8455_s11, %s8455_s11 }
0x10e8   :  { %p10628_p7 = scmp.ne.s32.totalorder %s8455_s11, %s10627_s9  ;;  %p10633_p9 = scmp.lt.s32.totalorder %s10627_s9, %s10627_s9 }
0x10ea   :  { %p10634_p10 = por %p10633_p9, %p10632_p8 }
0x10ec   :  { %p10635_p11 = pnand %p10634_p10, %p10628_p7 }
0x11a2   :  { %v9626_v57 = vpop.f32.mrf.mxu1 }
0x11a3   :  { %v8427_v20 = vadd.f32 %v9626_v57, %v12504_v52 }
0x11a4   :  { %v8418_v53 = vpop.f32.mrf.mxu1 }
0x11a5   :  { %8447 = vst [vmem:[#allocation15 + $0x70] sm:$0xff] %v8427_v20  ;;  %v8419_v12 = vadd.f32 %v12504_v52, %v8418_v53 }
0x11a6   :  { %v9627_v54 = vpop.f32.mrf.mxu1 }
0x11a7   :  { %8445 = vst [vmem:[#allocation15 + $0x60] sm:$0xff] %v8419_v12  ;;  %v8430_v31 = vadd.f32 %v9627_v54, %v12504_v52 }
0x11a8   :  { %v8421_v22 = vpop.f32.mrf.mxu1 }
0x11a9   :  { %8448 = vst [vmem:[#allocation15 + $0x78] sm:$0xff] %v8430_v31  ;;  %v8422_v1 = vadd.f32 %v12504_v52, %v8421_v22 }
0x11ab   :  { %8446 = vst [vmem:[#allocation15 + $0x68] sm:$0xff] %v8422_v1 }
0x11ac   :  { %10638 = shalt.err (!%p10635_p11)
}
0x11ad   :  { %s10671_s12 = smov 128   ;;  %s10672_s0 = smov 8  }
0x11ae   :  { %8460 = dma.vmem_to_hbm [thread:$0]  %s8455_s11, 2048, %s12538_s8, [#allocation6], %s10671_s12, %s10671_s12, %s10672_s0  }
0x11af   :  { %10655 = dma.done.wait [#allocation6], 2048  }
0x11b0   :  { %10656 = vsyncadd [#allocation6], 4294965248 }
0x11b1   :  { %10657 = dma.done.wait [#allocation17], 128  }
0x11b2   :  { %10658 = vsyncadd [#allocation17], 4294967168 }
0x11b3   :  { %8477 = vsyncpa [#allocation5], 1 }
0x11b4   :  { %8478 = vsyncpa [#allocation8], 1 }
0x11b5   :  { %8479 = vsyncpa [#allocation11], 1 }
0x11b6   :  { %8480 = vsyncpa [#allocation14], 1 }
0x11b7   :  { %8481 = vsyncpa [#allocation6], 1 }
0x11b8   :  { %8482 = vsyncpa [#allocation17], 1 }

</bundles_post_ra>
